<compile_context>
chip_gen: v5e
topology: v5e:2x2
jax: 0.10.0
libtpu: 0.0.40
codegen_flags: <defaults>
</compile_context>

<pallas_src>
import jax
import jax.numpy as jnp
from jax.experimental import pallas as pl
from jax.experimental.pallas import tpu as pltpu


# ----------------------------- in-kernel helpers -----------------------------

def _swish(u):
    # u * sigmoid(u).  exp and the approximate reciprocal both land on the EUP
    # slot, keeping the activation off the VALU critical path.
    return u * pl.reciprocal(1.0 + jnp.exp(-u), approx=True)


def _softmax_lastdim(s):
    # torch.softmax(s, dim=1) for a (B, 1) score tensor.  The reduced dim is
    # statically 1 (so the result is identically 1.0), but we compute the full
    # stable softmax so the kernel mirrors the reference graph (exact division
    # keeps it bit-exact at 1.0).
    m = jnp.max(s, axis=-1, keepdims=True)
    e = jnp.exp(s - m)
    return e / jnp.sum(e, axis=-1, keepdims=True)


def _round_up(x, m):
    return (x + m - 1) // m * m


def _full_spec(shape):
    # Whole (small) parameter array resident in VMEM with a constant index map;
    # Mosaic's pipeliner sees the unchanged block index and skips redundant copies.
    zeros = (0,) * len(shape)
    return pl.BlockSpec(shape, lambda i: zeros)


def _batch_tiling(B, tile_b):
    # Pad the batch to a multiple of 16 (safe sublane granularity for bf16 too)
    # and cap the tile at the padded batch.  For large B this yields many
    # 128/256-row tiles (good MXU row utilization, both v7x TCs busy); for tiny
    # B it is a single grid step.
    b_pad = _round_up(max(B, 16), 16)
    tile = min(tile_b, b_pad)
    b_pad = _round_up(b_pad, tile)
    return tile, b_pad


# ------------- fused kernel: MetadataBranch + Attention x2 + fc head ----------

def combined_kernel(meta_ref, ximg_ref,
                    w1_ref, t1_ref, w2_ref, t2_ref, w3_ref, t3_ref,
                    a1i_ref, b1i_ref, a2i_ref, b2i_ref,
                    a1m_ref, b1m_ref, a2m_ref, b2m_ref,
                    wfi_ref, wfm_ref, bf_ref,
                    wo_ref, bo_ref,
                    o_ref):
    # ---- MetadataBranch: (Linear(+folded BN) -> Swish -> Dropout[id]) x3 ----
    x = meta_ref[...].astype(jnp.bfloat16)
    h = jnp.dot(x, w1_ref[...], preferred_element_type=jnp.float32)
    h = _swish(h + t1_ref[...])                       # f32 elementwise (v5e-safe)
    h = jnp.dot(h.astype(jnp.bfloat16), w2_ref[...], preferred_element_type=jnp.float32)
    h = _swish(h + t2_ref[...])
    h = jnp.dot(h.astype(jnp.bfloat16), w3_ref[...], preferred_element_type=jnp.float32)
    x_meta = _swish(h + t3_ref[...]).astype(jnp.bfloat16)   # (tile, 128), stays on-chip

    x_img = ximg_ref[...]                              # (tile, 1280) bf16

    # ---- image Attention: Linear(1280,128) -> Swish -> Linear(128,1) -> softmax(dim=1)
    hi = _swish(jnp.dot(x_img, a1i_ref[...], preferred_element_type=jnp.float32)
                + b1i_ref[...])
    s_img = jnp.sum(hi * a2i_ref[...], axis=-1, keepdims=True) + b2i_ref[...]
    w_img = _softmax_lastdim(s_img)                    # singleton dim -> 1.0
    x_img_a = x_img * w_img.astype(x_img.dtype)        # attn_applied = x * attn_weights

    # ---- metadata Attention: Linear(128,128) -> Swish -> Linear(128,1) -> softmax(dim=1)
    hm = _swish(jnp.dot(x_meta, a1m_ref[...], preferred_element_type=jnp.float32)
                + b1m_ref[...])
    s_meta = jnp.sum(hm * a2m_ref[...], axis=-1, keepdims=True) + b2m_ref[...]
    w_meta = _softmax_lastdim(s_meta)
    x_meta_a = x_meta * w_meta.astype(x_meta.dtype)

    # ---- fc head on concat([x_img_a, x_meta_a]) without materializing the concat
    z = (jnp.dot(x_img_a, wfi_ref[...], preferred_element_type=jnp.float32)
         + jnp.dot(x_meta_a, wfm_ref[...], preferred_element_type=jnp.float32)
         + bf_ref[...])
    z = _swish(z)                                      # Dropout(p=0.3) = identity (eval)
    logit = jnp.sum(z * wo_ref[...], axis=-1, keepdims=True) + bo_ref[...]
    o_ref[...] = (1.0 / (1.0 + jnp.exp(-logit))).astype(o_ref.dtype)   # final Sigmoid


def combined_attention_forward(image_features, metadata, params, *, tile_b=256):
    """image_features: (B, 1280) f32, metadata: (B, metadata_dim) f32 -> (B, 1) f32."""
    # TODO(synk): the ImageBranch EfficientNet-B0 CNN is not implemented in Pallas;
    # this entry point consumes its pooled 1280-d features directly.
    B, DI = image_features.shape
    _, DM = metadata.shape

    tile, b_pad = _batch_tiling(B, tile_b)             # 256 default; use 128 on v5e
    if b_pad != B:
        image_features = jnp.pad(image_features, ((0, b_pad - B), (0, 0)))
        metadata = jnp.pad(metadata, ((0, b_pad - B), (0, 0)))

    x_img = image_features.astype(jnp.bfloat16)        # halves the dominant input DMA
    x_md = metadata                                     # f32, tiny

    w1 = params["mb_w1"].astype(jnp.bfloat16)
    w2 = params["mb_w2"].astype(jnp.bfloat16)
    w3 = params["mb_w3"].astype(jnp.bfloat16)
    t1, t2, t3 = params["mb_t1"], params["mb_t2"], params["mb_t3"]
    a1i = params["att_img_w1"].astype(jnp.bfloat16)
    b1i, a2i, b2i = params["att_img_b1"], params["att_img_w2"], params["att_img_b2"]
    a1m = params["att_meta_w1"].astype(jnp.bfloat16)
    b1m, a2m, b2m = params["att_meta_b1"], params["att_meta_w2"], params["att_meta_b2"]
    wfi = params["fc1_w_img"].astype(jnp.bfloat16)
    wfm = params["fc1_w_meta"].astype(jnp.bfloat16)
    bf, wo, bo = params["fc1_b"], params["fc2_w"], params["fc2_b"]

    out = pl.pallas_call(
        combined_kernel,
        out_shape=jax.ShapeDtypeStruct((b_pad, 1), jnp.float32),
        grid_spec=pltpu.PrefetchScalarGridSpec(
            num_scalar_prefetch=0,
            grid=(b_pad // tile,),
            in_specs=[
                pl.BlockSpec((tile, DM), lambda i: (i, 0)),     # metadata batch tile
                pl.BlockSpec((tile, DI), lambda i: (i, 0)),     # image-feature batch tile
                _full_spec(w1.shape), _full_spec(t1.shape),
                _full_spec(w2.shape), _full_spec(t2.shape),
                _full_spec(w3.shape), _full_spec(t3.shape),
                _full_spec(a1i.shape), _full_spec(b1i.shape),
                _full_spec(a2i.shape), _full_spec(b2i.shape),
                _full_spec(a1m.shape), _full_spec(b1m.shape),
                _full_spec(a2m.shape), _full_spec(b2m.shape),
                _full_spec(wfi.shape), _full_spec(wfm.shape), _full_spec(bf.shape),
                _full_spec(wo.shape), _full_spec(bo.shape),
            ],
            out_specs=pl.BlockSpec((tile, 1), lambda i: (i, 0)),
        ),
        compiler_params=pltpu.CompilerParams(
            dimension_semantics=("parallel",)),
    )(x_md, x_img,
      w1, t1, w2, t2, w3, t3,
      a1i, b1i, a2i, b2i, a1m, b1m, a2m, b2m,
      wfi, wfm, bf, wo, bo)
    return out[:B]


# --------------------------- parameters (folded, f32) -------------------------

def make_params(key, metadata_dim, hidden_dims=(512, 128), metadata_output_dim=128,
                image_feat_dim=1280, eps=1e-5):
    keys = iter(jax.random.split(key, 64))
    nk = lambda: next(keys)
    params = {}

    def linear(fan_in, fan_out):
        w = jax.random.normal(nk(), (fan_in, fan_out), jnp.float32) / jnp.sqrt(fan_in)
        b = 0.1 * jax.random.normal(nk(), (fan_out,), jnp.float32)
        return w, b

    # MetadataBranch: fold Linear bias + eval-mode BatchNorm1d into (w', shift).
    dims = [metadata_dim, hidden_dims[0], hidden_dims[1], metadata_output_dim]
    for n in range(3):
        fo = dims[n + 1]
        w, b = linear(dims[n], fo)
        gamma = 1.0 + 0.1 * jax.random.normal(nk(), (fo,), jnp.float32)
        beta = 0.1 * jax.random.normal(nk(), (fo,), jnp.float32)
        rmean = 0.1 * jax.random.normal(nk(), (fo,), jnp.float32)
        rvar = 0.5 + jnp.abs(jax.random.normal(nk(), (fo,), jnp.float32))
        scale = gamma / jnp.sqrt(rvar + eps)
        params[f"mb_w{n+1}"] = w * scale[None, :]                       # scale folded into W
        params[f"mb_t{n+1}"] = ((b - rmean) * scale + beta).reshape(1, fo)

    # Attention blocks: Linear(d, 128) -> Swish -> Linear(128, 1)
    for name, d in (("img", image_feat_dim), ("meta", metadata_output_dim)):
        w1, b1 = linear(d, 128)
        w2, b2 = linear(128, 1)
        params[f"att_{name}_w1"] = w1
        params[f"att_{name}_b1"] = b1.reshape(1, 128)
        params[f"att_{name}_w2"] = w2.reshape(1, 128)   # row form: score = sum(h*w2)+b2
        params[f"att_{name}_b2"] = b2.reshape(1, 1)

    # fc head: Linear(1280+128, 256) -> Swish -> Dropout -> Linear(256, 1)
    wf, bfb = linear(image_feat_dim + metadata_output_dim, 256)
    params["fc1_w_img"] = wf[:image_feat_dim]
    params["fc1_w_meta"] = wf[image_feat_dim:]
    params["fc1_b"] = bfb.reshape(1, 256)
    w2, b2 = linear(256, 1)
    params["fc2_w"] = w2.reshape(1, 256)
    params["fc2_b"] = b2.reshape(1, 1)
    return params


# --------------------------- references (pure JAX, f32) ------------------------

def metadata_branch_ref(x, p):
    swish = lambda u: u * jax.nn.sigmoid(u)
    h = swish(x @ p["mb_w1"] + p["mb_t1"])
    h = swish(h @ p["mb_w2"] + p["mb_t2"])
    return swish(h @ p["mb_w3"] + p["mb_t3"])


def combined_forward_ref(image_features, metadata, p):
    swish = lambda u: u * jax.nn.sigmoid(u)
    x_meta = metadata_branch_ref(metadata, p)

    def attention(x, w1, b1, w2, b2):
        h = swish(x @ w1 + b1)
        s = jnp.sum(h * w2, axis=-1, keepdims=True) + b2
        return x * jax.nn.softmax(s, axis=1)

    xi = attention(image_features, p["att_img_w1"], p["att_img_b1"],
                   p["att_img_w2"], p["att_img_b2"])
    xm = attention(x_meta, p["att_meta_w1"], p["att_meta_b1"],
                   p["att_meta_w2"], p["att_meta_b2"])
    z = swish(xi @ p["fc1_w_img"] + xm @ p["fc1_w_meta"] + p["fc1_b"])
    logit = jnp.sum(z * p["fc2_w"], axis=-1, keepdims=True) + p["fc2_b"]
    return jax.nn.sigmoid(logit)


# ------------------------------------ main -------------------------------------

if __name__ == "__main__":
    key = jax.random.PRNGKey(0)
    k_img, k_meta, k_p = jax.random.split(key, 3)

    B = 16
    METADATA_DIM = 32
    IMAGE_FEAT_DIM = 1280   # EfficientNet-B0 pooled feature dim from ImageBranch

    image_features = jax.random.normal(k_img, (B, IMAGE_FEAT_DIM), jnp.float32)
    metadata = jax.random.normal(k_meta, (B, METADATA_DIM), jnp.float32)
    params = make_params(k_p, METADATA_DIM)

    # Full post-CNN forward (metadata branch -> both attentions -> fc -> sigmoid),
    # fused in a single Pallas kernel.  bf16 matmuls + approx reciprocal -> loose tol.
    out = jax.block_until_ready(
        combined_attention_forward(image_features, metadata, params))
    ref = combined_forward_ref(image_features, metadata, params)
    assert out.shape == (B, 1)
    assert bool(jnp.all(jnp.isfinite(out)))
    assert jnp.allclose(out, ref, atol=2e-2, rtol=2e-2), \
        "combined forward mismatch vs JAX reference"

    print("KERNEL_OK")
</pallas_src>

<mosaic_0001>
module attributes {stable_mosaic.version = 11 : i64} {
  func.func @combined_kernel(%arg0: i32, %arg1: memref<16x32xf32, #tpu.memory_space<vmem>>, %arg2: memref<16x1280xbf16, #tpu.memory_space<vmem>>, %arg3: memref<32x512xbf16, #tpu.memory_space<vmem>>, %arg4: memref<1x512xf32, #tpu.memory_space<vmem>>, %arg5: memref<512x128xbf16, #tpu.memory_space<vmem>>, %arg6: memref<1x128xf32, #tpu.memory_space<vmem>>, %arg7: memref<128x128xbf16, #tpu.memory_space<vmem>>, %arg8: memref<1x128xf32, #tpu.memory_space<vmem>>, %arg9: memref<1280x128xbf16, #tpu.memory_space<vmem>>, %arg10: memref<1x128xf32, #tpu.memory_space<vmem>>, %arg11: memref<1x128xf32, #tpu.memory_space<vmem>>, %arg12: memref<1x1xf32, #tpu.memory_space<vmem>>, %arg13: memref<128x128xbf16, #tpu.memory_space<vmem>>, %arg14: memref<1x128xf32, #tpu.memory_space<vmem>>, %arg15: memref<1x128xf32, #tpu.memory_space<vmem>>, %arg16: memref<1x1xf32, #tpu.memory_space<vmem>>, %arg17: memref<1280x256xbf16, #tpu.memory_space<vmem>>, %arg18: memref<128x256xbf16, #tpu.memory_space<vmem>>, %arg19: memref<1x256xf32, #tpu.memory_space<vmem>>, %arg20: memref<1x256xf32, #tpu.memory_space<vmem>>, %arg21: memref<1x1xf32, #tpu.memory_space<vmem>>, %arg22: memref<16x1xf32, #tpu.memory_space<vmem>>) attributes {dimension_semantics = [#tpu.dimension_semantics<parallel>], iteration_bounds = array<i64: 1>, scalar_prefetch = 0 : i64, scratch_operands = 0 : i64, tpu.core_type = #tpu.core_type<tc>, window_params = [{transform_indices = @transform_0, window_bounds = array<i64: 16, 32>}, {transform_indices = @transform_1, window_bounds = array<i64: 16, 1280>}, {pipeline_mode = #tpu.pipeline_mode<synchronous>, transform_indices = @transform_2, window_bounds = array<i64: 32, 512>}, {pipeline_mode = #tpu.pipeline_mode<synchronous>, transform_indices = @transform_3, window_bounds = array<i64: 1, 512>}, {pipeline_mode = #tpu.pipeline_mode<synchronous>, transform_indices = @transform_4, window_bounds = array<i64: 512, 128>}, {pipeline_mode = #tpu.pipeline_mode<synchronous>, transform_indices = @transform_5, window_bounds = array<i64: 1, 128>}, {pipeline_mode = #tpu.pipeline_mode<synchronous>, transform_indices = @transform_6, window_bounds = array<i64: 128, 128>}, {pipeline_mode = #tpu.pipeline_mode<synchronous>, transform_indices = @transform_7, window_bounds = array<i64: 1, 128>}, {pipeline_mode = #tpu.pipeline_mode<synchronous>, transform_indices = @transform_8, window_bounds = array<i64: 1280, 128>}, {pipeline_mode = #tpu.pipeline_mode<synchronous>, transform_indices = @transform_9, window_bounds = array<i64: 1, 128>}, {pipeline_mode = #tpu.pipeline_mode<synchronous>, transform_indices = @transform_10, window_bounds = array<i64: 1, 128>}, {pipeline_mode = #tpu.pipeline_mode<synchronous>, transform_indices = @transform_11, window_bounds = array<i64: 1, 1>}, {pipeline_mode = #tpu.pipeline_mode<synchronous>, transform_indices = @transform_12, window_bounds = array<i64: 128, 128>}, {pipeline_mode = #tpu.pipeline_mode<synchronous>, transform_indices = @transform_13, window_bounds = array<i64: 1, 128>}, {pipeline_mode = #tpu.pipeline_mode<synchronous>, transform_indices = @transform_14, window_bounds = array<i64: 1, 128>}, {pipeline_mode = #tpu.pipeline_mode<synchronous>, transform_indices = @transform_15, window_bounds = array<i64: 1, 1>}, {pipeline_mode = #tpu.pipeline_mode<synchronous>, transform_indices = @transform_16, window_bounds = array<i64: 1280, 256>}, {pipeline_mode = #tpu.pipeline_mode<synchronous>, transform_indices = @transform_17, window_bounds = array<i64: 128, 256>}, {pipeline_mode = #tpu.pipeline_mode<synchronous>, transform_indices = @transform_18, window_bounds = array<i64: 1, 256>}, {pipeline_mode = #tpu.pipeline_mode<synchronous>, transform_indices = @transform_19, window_bounds = array<i64: 1, 256>}, {pipeline_mode = #tpu.pipeline_mode<synchronous>, transform_indices = @transform_20, window_bounds = array<i64: 1, 1>}, {transform_indices = @transform_21, window_bounds = array<i64: 16, 1>}]} {
    %c0 = arith.constant 0 : index
    %c0_0 = arith.constant 0 : index
    %0 = vector.load %arg1[%c0, %c0_0] : memref<16x32xf32, #tpu.memory_space<vmem>>, vector<16x32xf32>
    %1 = arith.truncf %0 : vector<16x32xf32> to vector<16x32xbf16>
    %c0_1 = arith.constant 0 : index
    %c0_2 = arith.constant 0 : index
    %2 = vector.load %arg3[%c0_1, %c0_2] : memref<32x512xbf16, #tpu.memory_space<vmem>>, vector<32x512xbf16>
    %cst = arith.constant dense<0.000000e+00> : vector<16x512xf32>
    %3 = tpu.matmul %1, %2, %cst {dimension_numbers = #tpu.dot_dimension_numbers<[1], [0], [0], [1], [0, 0, 1, 1], [], []>} : vector<16x32xbf16>, vector<32x512xbf16>, vector<16x512xf32> -> vector<16x512xf32>
    %c0_3 = arith.constant 0 : index
    %c0_4 = arith.constant 0 : index
    %4 = vector.load %arg4[%c0_3, %c0_4] : memref<1x512xf32, #tpu.memory_space<vmem>>, vector<1x512xf32>
    %5 = vector.broadcast %4 : vector<1x512xf32> to vector<16x512xf32>
    %6 = arith.addf %3, %5 : vector<16x512xf32>
    %cst_5 = arith.constant 0.000000e+00 : f32
    %7 = vector.broadcast %cst_5 : f32 to vector<16x512xf32>
    %8 = arith.subf %7, %6 : vector<16x512xf32>
    %9 = math.exp %8 : vector<16x512xf32>
    %cst_6 = arith.constant 1.000000e+00 : f32
    %10 = vector.broadcast %cst_6 : f32 to vector<16x512xf32>
    %11 = arith.addf %10, %9 : vector<16x512xf32>
    %12 = tpu.reciprocal %11 {approx = true} : vector<16x512xf32> -> vector<16x512xf32>
    %13 = arith.mulf %6, %12 : vector<16x512xf32>
    %14 = arith.truncf %13 : vector<16x512xf32> to vector<16x512xbf16>
    %c0_7 = arith.constant 0 : index
    %c0_8 = arith.constant 0 : index
    %15 = vector.load %arg5[%c0_7, %c0_8] : memref<512x128xbf16, #tpu.memory_space<vmem>>, vector<512x128xbf16>
    %cst_9 = arith.constant dense<0.000000e+00> : vector<16x128xf32>
    %16 = tpu.matmul %14, %15, %cst_9 {dimension_numbers = #tpu.dot_dimension_numbers<[1], [0], [0], [1], [0, 0, 1, 1], [], []>} : vector<16x512xbf16>, vector<512x128xbf16>, vector<16x128xf32> -> vector<16x128xf32>
    %c0_10 = arith.constant 0 : index
    %c0_11 = arith.constant 0 : index
    %17 = vector.load %arg6[%c0_10, %c0_11] : memref<1x128xf32, #tpu.memory_space<vmem>>, vector<1x128xf32>
    %18 = vector.broadcast %17 : vector<1x128xf32> to vector<16x128xf32>
    %19 = arith.addf %16, %18 : vector<16x128xf32>
    %cst_12 = arith.constant 0.000000e+00 : f32
    %20 = vector.broadcast %cst_12 : f32 to vector<16x128xf32>
    %21 = arith.subf %20, %19 : vector<16x128xf32>
    %22 = math.exp %21 : vector<16x128xf32>
    %cst_13 = arith.constant 1.000000e+00 : f32
    %23 = vector.broadcast %cst_13 : f32 to vector<16x128xf32>
    %24 = arith.addf %23, %22 : vector<16x128xf32>
    %25 = tpu.reciprocal %24 {approx = true} : vector<16x128xf32> -> vector<16x128xf32>
    %26 = arith.mulf %19, %25 : vector<16x128xf32>
    %27 = arith.truncf %26 : vector<16x128xf32> to vector<16x128xbf16>
    %c0_14 = arith.constant 0 : index
    %c0_15 = arith.constant 0 : index
    %28 = vector.load %arg7[%c0_14, %c0_15] : memref<128x128xbf16, #tpu.memory_space<vmem>>, vector<128x128xbf16>
    %cst_16 = arith.constant dense<0.000000e+00> : vector<16x128xf32>
    %29 = tpu.matmul %27, %28, %cst_16 {dimension_numbers = #tpu.dot_dimension_numbers<[1], [0], [0], [1], [0, 0, 1, 1], [], []>} : vector<16x128xbf16>, vector<128x128xbf16>, vector<16x128xf32> -> vector<16x128xf32>
    %c0_17 = arith.constant 0 : index
    %c0_18 = arith.constant 0 : index
    %30 = vector.load %arg8[%c0_17, %c0_18] : memref<1x128xf32, #tpu.memory_space<vmem>>, vector<1x128xf32>
    %31 = vector.broadcast %30 : vector<1x128xf32> to vector<16x128xf32>
    %32 = arith.addf %29, %31 : vector<16x128xf32>
    %cst_19 = arith.constant 0.000000e+00 : f32
    %33 = vector.broadcast %cst_19 : f32 to vector<16x128xf32>
    %34 = arith.subf %33, %32 : vector<16x128xf32>
    %35 = math.exp %34 : vector<16x128xf32>
    %cst_20 = arith.constant 1.000000e+00 : f32
    %36 = vector.broadcast %cst_20 : f32 to vector<16x128xf32>
    %37 = arith.addf %36, %35 : vector<16x128xf32>
    %38 = tpu.reciprocal %37 {approx = true} : vector<16x128xf32> -> vector<16x128xf32>
    %39 = arith.mulf %32, %38 : vector<16x128xf32>
    %40 = arith.truncf %39 : vector<16x128xf32> to vector<16x128xbf16>
    %c0_21 = arith.constant 0 : index
    %c0_22 = arith.constant 0 : index
    %41 = vector.load %arg2[%c0_21, %c0_22] : memref<16x1280xbf16, #tpu.memory_space<vmem>>, vector<16x1280xbf16>
    %c0_23 = arith.constant 0 : index
    %c0_24 = arith.constant 0 : index
    %42 = vector.load %arg9[%c0_23, %c0_24] : memref<1280x128xbf16, #tpu.memory_space<vmem>>, vector<1280x128xbf16>
    %cst_25 = arith.constant dense<0.000000e+00> : vector<16x128xf32>
    %43 = tpu.matmul %41, %42, %cst_25 {dimension_numbers = #tpu.dot_dimension_numbers<[1], [0], [0], [1], [0, 0, 1, 1], [], []>} : vector<16x1280xbf16>, vector<1280x128xbf16>, vector<16x128xf32> -> vector<16x128xf32>
    %c0_26 = arith.constant 0 : index
    %c0_27 = arith.constant 0 : index
    %44 = vector.load %arg10[%c0_26, %c0_27] : memref<1x128xf32, #tpu.memory_space<vmem>>, vector<1x128xf32>
    %45 = vector.broadcast %44 : vector<1x128xf32> to vector<16x128xf32>
    %46 = arith.addf %43, %45 : vector<16x128xf32>
    %cst_28 = arith.constant 0.000000e+00 : f32
    %47 = vector.broadcast %cst_28 : f32 to vector<16x128xf32>
    %48 = arith.subf %47, %46 : vector<16x128xf32>
    %49 = math.exp %48 : vector<16x128xf32>
    %cst_29 = arith.constant 1.000000e+00 : f32
    %50 = vector.broadcast %cst_29 : f32 to vector<16x128xf32>
    %51 = arith.addf %50, %49 : vector<16x128xf32>
    %52 = tpu.reciprocal %51 {approx = true} : vector<16x128xf32> -> vector<16x128xf32>
    %53 = arith.mulf %46, %52 : vector<16x128xf32>
    %c0_30 = arith.constant 0 : index
    %c0_31 = arith.constant 0 : index
    %54 = vector.load %arg11[%c0_30, %c0_31] : memref<1x128xf32, #tpu.memory_space<vmem>>, vector<1x128xf32>
    %55 = vector.broadcast %54 : vector<1x128xf32> to vector<16x128xf32>
    %56 = arith.mulf %53, %55 : vector<16x128xf32>
    %cst_32 = arith.constant dense<0.000000e+00> : vector<16xf32>
    %57 = vector.multi_reduction <add>, %56, %cst_32 [1] : vector<16x128xf32> to vector<16xf32>
    %58 = vector.shape_cast %57 : vector<16xf32> to vector<16x1xf32>
    %c0_33 = arith.constant 0 : index
    %c0_34 = arith.constant 0 : index
    %59 = vector.load %arg12[%c0_33, %c0_34] : memref<1x1xf32, #tpu.memory_space<vmem>>, vector<1x1xf32>
    %60 = vector.broadcast %59 : vector<1x1xf32> to vector<16x1xf32>
    %61 = arith.addf %58, %60 : vector<16x1xf32>
    %cst_35 = arith.constant dense<0xFF800000> : vector<16xf32>
    %62 = vector.multi_reduction <maximumf>, %61, %cst_35 [1] : vector<16x1xf32> to vector<16xf32>
    %63 = vector.shape_cast %62 : vector<16xf32> to vector<16x1xf32>
    %64 = arith.subf %61, %63 : vector<16x1xf32>
    %65 = math.exp %64 : vector<16x1xf32>
    %cst_36 = arith.constant dense<0.000000e+00> : vector<16xf32>
    %66 = vector.multi_reduction <add>, %65, %cst_36 [1] : vector<16x1xf32> to vector<16xf32>
    %67 = vector.shape_cast %66 : vector<16xf32> to vector<16x1xf32>
    %68 = arith.divf %65, %67 : vector<16x1xf32>
    %69 = arith.truncf %68 : vector<16x1xf32> to vector<16x1xbf16>
    %70 = vector.broadcast %69 : vector<16x1xbf16> to vector<16x1280xbf16>
    %71 = arith.mulf %41, %70 : vector<16x1280xbf16>
    %c0_37 = arith.constant 0 : index
    %c0_38 = arith.constant 0 : index
    %72 = vector.load %arg13[%c0_37, %c0_38] : memref<128x128xbf16, #tpu.memory_space<vmem>>, vector<128x128xbf16>
    %cst_39 = arith.constant dense<0.000000e+00> : vector<16x128xf32>
    %73 = tpu.matmul %40, %72, %cst_39 {dimension_numbers = #tpu.dot_dimension_numbers<[1], [0], [0], [1], [0, 0, 1, 1], [], []>} : vector<16x128xbf16>, vector<128x128xbf16>, vector<16x128xf32> -> vector<16x128xf32>
    %c0_40 = arith.constant 0 : index
    %c0_41 = arith.constant 0 : index
    %74 = vector.load %arg14[%c0_40, %c0_41] : memref<1x128xf32, #tpu.memory_space<vmem>>, vector<1x128xf32>
    %75 = vector.broadcast %74 : vector<1x128xf32> to vector<16x128xf32>
    %76 = arith.addf %73, %75 : vector<16x128xf32>
    %cst_42 = arith.constant 0.000000e+00 : f32
    %77 = vector.broadcast %cst_42 : f32 to vector<16x128xf32>
    %78 = arith.subf %77, %76 : vector<16x128xf32>
    %79 = math.exp %78 : vector<16x128xf32>
    %cst_43 = arith.constant 1.000000e+00 : f32
    %80 = vector.broadcast %cst_43 : f32 to vector<16x128xf32>
    %81 = arith.addf %80, %79 : vector<16x128xf32>
    %82 = tpu.reciprocal %81 {approx = true} : vector<16x128xf32> -> vector<16x128xf32>
    %83 = arith.mulf %76, %82 : vector<16x128xf32>
    %c0_44 = arith.constant 0 : index
    %c0_45 = arith.constant 0 : index
    %84 = vector.load %arg15[%c0_44, %c0_45] : memref<1x128xf32, #tpu.memory_space<vmem>>, vector<1x128xf32>
    %85 = vector.broadcast %84 : vector<1x128xf32> to vector<16x128xf32>
    %86 = arith.mulf %83, %85 : vector<16x128xf32>
    %cst_46 = arith.constant dense<0.000000e+00> : vector<16xf32>
    %87 = vector.multi_reduction <add>, %86, %cst_46 [1] : vector<16x128xf32> to vector<16xf32>
    %88 = vector.shape_cast %87 : vector<16xf32> to vector<16x1xf32>
    %c0_47 = arith.constant 0 : index
    %c0_48 = arith.constant 0 : index
    %89 = vector.load %arg16[%c0_47, %c0_48] : memref<1x1xf32, #tpu.memory_space<vmem>>, vector<1x1xf32>
    %90 = vector.broadcast %89 : vector<1x1xf32> to vector<16x1xf32>
    %91 = arith.addf %88, %90 : vector<16x1xf32>
    %cst_49 = arith.constant dense<0xFF800000> : vector<16xf32>
    %92 = vector.multi_reduction <maximumf>, %91, %cst_49 [1] : vector<16x1xf32> to vector<16xf32>
    %93 = vector.shape_cast %92 : vector<16xf32> to vector<16x1xf32>
    %94 = arith.subf %91, %93 : vector<16x1xf32>
    %95 = math.exp %94 : vector<16x1xf32>
    %cst_50 = arith.constant dense<0.000000e+00> : vector<16xf32>
    %96 = vector.multi_reduction <add>, %95, %cst_50 [1] : vector<16x1xf32> to vector<16xf32>
    %97 = vector.shape_cast %96 : vector<16xf32> to vector<16x1xf32>
    %98 = arith.divf %95, %97 : vector<16x1xf32>
    %99 = arith.truncf %98 : vector<16x1xf32> to vector<16x1xbf16>
    %100 = vector.broadcast %99 : vector<16x1xbf16> to vector<16x128xbf16>
    %101 = arith.mulf %40, %100 : vector<16x128xbf16>
    %c0_51 = arith.constant 0 : index
    %c0_52 = arith.constant 0 : index
    %102 = vector.load %arg17[%c0_51, %c0_52] : memref<1280x256xbf16, #tpu.memory_space<vmem>>, vector<1280x256xbf16>
    %cst_53 = arith.constant dense<0.000000e+00> : vector<16x256xf32>
    %103 = tpu.matmul %71, %102, %cst_53 {dimension_numbers = #tpu.dot_dimension_numbers<[1], [0], [0], [1], [0, 0, 1, 1], [], []>} : vector<16x1280xbf16>, vector<1280x256xbf16>, vector<16x256xf32> -> vector<16x256xf32>
    %c0_54 = arith.constant 0 : index
    %c0_55 = arith.constant 0 : index
    %104 = vector.load %arg18[%c0_54, %c0_55] : memref<128x256xbf16, #tpu.memory_space<vmem>>, vector<128x256xbf16>
    %cst_56 = arith.constant dense<0.000000e+00> : vector<16x256xf32>
    %105 = tpu.matmul %101, %104, %cst_56 {dimension_numbers = #tpu.dot_dimension_numbers<[1], [0], [0], [1], [0, 0, 1, 1], [], []>} : vector<16x128xbf16>, vector<128x256xbf16>, vector<16x256xf32> -> vector<16x256xf32>
    %106 = arith.addf %103, %105 : vector<16x256xf32>
    %c0_57 = arith.constant 0 : index
    %c0_58 = arith.constant 0 : index
    %107 = vector.load %arg19[%c0_57, %c0_58] : memref<1x256xf32, #tpu.memory_space<vmem>>, vector<1x256xf32>
    %108 = vector.broadcast %107 : vector<1x256xf32> to vector<16x256xf32>
    %109 = arith.addf %106, %108 : vector<16x256xf32>
    %cst_59 = arith.constant 0.000000e+00 : f32
    %110 = vector.broadcast %cst_59 : f32 to vector<16x256xf32>
    %111 = arith.subf %110, %109 : vector<16x256xf32>
    %112 = math.exp %111 : vector<16x256xf32>
    %cst_60 = arith.constant 1.000000e+00 : f32
    %113 = vector.broadcast %cst_60 : f32 to vector<16x256xf32>
    %114 = arith.addf %113, %112 : vector<16x256xf32>
    %115 = tpu.reciprocal %114 {approx = true} : vector<16x256xf32> -> vector<16x256xf32>
    %116 = arith.mulf %109, %115 : vector<16x256xf32>
    %c0_61 = arith.constant 0 : index
    %c0_62 = arith.constant 0 : index
    %117 = vector.load %arg20[%c0_61, %c0_62] : memref<1x256xf32, #tpu.memory_space<vmem>>, vector<1x256xf32>
    %118 = vector.broadcast %117 : vector<1x256xf32> to vector<16x256xf32>
    %119 = arith.mulf %116, %118 : vector<16x256xf32>
    %cst_63 = arith.constant dense<0.000000e+00> : vector<16xf32>
    %120 = vector.multi_reduction <add>, %119, %cst_63 [1] : vector<16x256xf32> to vector<16xf32>
    %121 = vector.shape_cast %120 : vector<16xf32> to vector<16x1xf32>
    %c0_64 = arith.constant 0 : index
    %c0_65 = arith.constant 0 : index
    %122 = vector.load %arg21[%c0_64, %c0_65] : memref<1x1xf32, #tpu.memory_space<vmem>>, vector<1x1xf32>
    %123 = vector.broadcast %122 : vector<1x1xf32> to vector<16x1xf32>
    %124 = arith.addf %121, %123 : vector<16x1xf32>
    %cst_66 = arith.constant 0.000000e+00 : f32
    %125 = vector.broadcast %cst_66 : f32 to vector<16x1xf32>
    %126 = arith.subf %125, %124 : vector<16x1xf32>
    %127 = math.exp %126 : vector<16x1xf32>
    %cst_67 = arith.constant 1.000000e+00 : f32
    %128 = vector.broadcast %cst_67 : f32 to vector<16x1xf32>
    %129 = arith.addf %128, %127 : vector<16x1xf32>
    %cst_68 = arith.constant 1.000000e+00 : f32
    %130 = vector.broadcast %cst_68 : f32 to vector<16x1xf32>
    %131 = arith.divf %130, %129 : vector<16x1xf32>
    %c0_69 = arith.constant 0 : index
    %c0_70 = arith.constant 0 : index
    %132 = vector.load %arg22[%c0_69, %c0_70] : memref<16x1xf32, #tpu.memory_space<vmem>>, vector<16x1xf32>
    tpu.vector_store %arg22[%c0_69, %c0_70], %131 {strides = array<i32>} : memref<16x1xf32, #tpu.memory_space<vmem>>, vector<16x1xf32>,
    return
  }
  func.func @transform_0(%arg0: i32) -> (i32, i32) {
    %c0_i32 = arith.constant 0 : i32
    %c0_i32_0 = arith.constant 0 : i32
    return %arg0, %c0_i32 : i32, i32
  }
  func.func @transform_1(%arg0: i32) -> (i32, i32) {
    %c0_i32 = arith.constant 0 : i32
    %c0_i32_0 = arith.constant 0 : i32
    return %arg0, %c0_i32 : i32, i32
  }
  func.func @transform_2(%arg0: i32) -> (i32, i32) {
    %c0_i32 = arith.constant 0 : i32
    %c0_i32_0 = arith.constant 0 : i32
    %c0_i32_1 = arith.constant 0 : i32
    return %c0_i32, %c0_i32_0 : i32, i32
  }
  func.func @transform_3(%arg0: i32) -> (i32, i32) {
    %c0_i32 = arith.constant 0 : i32
    %c0_i32_0 = arith.constant 0 : i32
    %c0_i32_1 = arith.constant 0 : i32
    return %c0_i32, %c0_i32_0 : i32, i32
  }
  func.func @transform_4(%arg0: i32) -> (i32, i32) {
    %c0_i32 = arith.constant 0 : i32
    %c0_i32_0 = arith.constant 0 : i32
    %c0_i32_1 = arith.constant 0 : i32
    return %c0_i32, %c0_i32_0 : i32, i32
  }
  func.func @transform_5(%arg0: i32) -> (i32, i32) {
    %c0_i32 = arith.constant 0 : i32
    %c0_i32_0 = arith.constant 0 : i32
    %c0_i32_1 = arith.constant 0 : i32
    return %c0_i32, %c0_i32_0 : i32, i32
  }
  func.func @transform_6(%arg0: i32) -> (i32, i32) {
    %c0_i32 = arith.constant 0 : i32
    %c0_i32_0 = arith.constant 0 : i32
    %c0_i32_1 = arith.constant 0 : i32
    return %c0_i32, %c0_i32_0 : i32, i32
  }
  func.func @transform_7(%arg0: i32) -> (i32, i32) {
    %c0_i32 = arith.constant 0 : i32
    %c0_i32_0 = arith.constant 0 : i32
    %c0_i32_1 = arith.constant 0 : i32
    return %c0_i32, %c0_i32_0 : i32, i32
  }
  func.func @transform_8(%arg0: i32) -> (i32, i32) {
    %c0_i32 = arith.constant 0 : i32
    %c0_i32_0 = arith.constant 0 : i32
    %c0_i32_1 = arith.constant 0 : i32
    return %c0_i32, %c0_i32_0 : i32, i32
  }
  func.func @transform_9(%arg0: i32) -> (i32, i32) {
    %c0_i32 = arith.constant 0 : i32
    %c0_i32_0 = arith.constant 0 : i32
    %c0_i32_1 = arith.constant 0 : i32
    return %c0_i32, %c0_i32_0 : i32, i32
  }
  func.func @transform_10(%arg0: i32) -> (i32, i32) {
    %c0_i32 = arith.constant 0 : i32
    %c0_i32_0 = arith.constant 0 : i32
    %c0_i32_1 = arith.constant 0 : i32
    return %c0_i32, %c0_i32_0 : i32, i32
  }
  func.func @transform_11(%arg0: i32) -> (i32, i32) {
    %c0_i32 = arith.constant 0 : i32
    %c0_i32_0 = arith.constant 0 : i32
    %c0_i32_1 = arith.constant 0 : i32
    return %c0_i32, %c0_i32_0 : i32, i32
  }
  func.func @transform_12(%arg0: i32) -> (i32, i32) {
    %c0_i32 = arith.constant 0 : i32
    %c0_i32_0 = arith.constant 0 : i32
    %c0_i32_1 = arith.constant 0 : i32
    return %c0_i32, %c0_i32_0 : i32, i32
  }
  func.func @transform_13(%arg0: i32) -> (i32, i32) {
    %c0_i32 = arith.constant 0 : i32
    %c0_i32_0 = arith.constant 0 : i32
    %c0_i32_1 = arith.constant 0 : i32
    return %c0_i32, %c0_i32_0 : i32, i32
  }
  func.func @transform_14(%arg0: i32) -> (i32, i32) {
    %c0_i32 = arith.constant 0 : i32
    %c0_i32_0 = arith.constant 0 : i32
    %c0_i32_1 = arith.constant 0 : i32
    return %c0_i32, %c0_i32_0 : i32, i32
  }
  func.func @transform_15(%arg0: i32) -> (i32, i32) {
    %c0_i32 = arith.constant 0 : i32
    %c0_i32_0 = arith.constant 0 : i32
    %c0_i32_1 = arith.constant 0 : i32
    return %c0_i32, %c0_i32_0 : i32, i32
  }
  func.func @transform_16(%arg0: i32) -> (i32, i32) {
    %c0_i32 = arith.constant 0 : i32
    %c0_i32_0 = arith.constant 0 : i32
    %c0_i32_1 = arith.constant 0 : i32
    return %c0_i32, %c0_i32_0 : i32, i32
  }
  func.func @transform_17(%arg0: i32) -> (i32, i32) {
    %c0_i32 = arith.constant 0 : i32
    %c0_i32_0 = arith.constant 0 : i32
    %c0_i32_1 = arith.constant 0 : i32
    return %c0_i32, %c0_i32_0 : i32, i32
  }
  func.func @transform_18(%arg0: i32) -> (i32, i32) {
    %c0_i32 = arith.constant 0 : i32
    %c0_i32_0 = arith.constant 0 : i32
    %c0_i32_1 = arith.constant 0 : i32
    return %c0_i32, %c0_i32_0 : i32, i32
  }
  func.func @transform_19(%arg0: i32) -> (i32, i32) {
    %c0_i32 = arith.constant 0 : i32
    %c0_i32_0 = arith.constant 0 : i32
    %c0_i32_1 = arith.constant 0 : i32
    return %c0_i32, %c0_i32_0 : i32, i32
  }
  func.func @transform_20(%arg0: i32) -> (i32, i32) {
    %c0_i32 = arith.constant 0 : i32
    %c0_i32_0 = arith.constant 0 : i32
    %c0_i32_1 = arith.constant 0 : i32
    return %c0_i32, %c0_i32_0 : i32, i32
  }
  func.func @transform_21(%arg0: i32) -> (i32, i32) {
    %c0_i32 = arith.constant 0 : i32
    %c0_i32_0 = arith.constant 0 : i32
    return %arg0, %c0_i32 : i32, i32
  }
}

</mosaic_0001>

<bundles_post_ra>
// kernel: tpu_custom_call.1
= control target key start
LH: loop header
LB: loop body
LE: loop exit
PB: predicated region body
PF: predicated region fallthrough
CT: control target
= control target key end

     0   :  { %s5777_s0 = inlined_call_operand.hbm [shape: f32[16,32], index: 0, kind: input, shape index: {}]   ;;  %s5778_s1 = inlined_call_operand.hbm [shape: bf16[16,1280], index: 1, kind: input, shape index: {}]   ;;  %s5779_s2 = inlined_call_operand.hbm [shape: bf16[32,512], index: 2, kind: input, shape index: {}]   ;;  %s5780_s3 = inlined_call_operand.vmem [shape: f32[1,512], index: 3, kind: input, shape index: {}]   ;;  %s5781_s4 = inlined_call_operand.hbm [shape: bf16[512,128], index: 4, kind: input, shape index: {}]   ;;  %s5782_s5 = inlined_call_operand.vmem [shape: f32[1,128], index: 5, kind: input, shape index: {}]   ;;  %s5783_s6 = inlined_call_operand.hbm [shape: bf16[128,128], index: 6, kind: input, shape index: {}]   ;;  %s5784_s7 = inlined_call_operand.vmem [shape: f32[1,128], index: 7, kind: input, shape index: {}]   ;;  %s5785_s8 = inlined_call_operand.hbm [shape: bf16[1280,128], index: 8, kind: input, shape index: {}]   ;;  %s5786_s9 = inlined_call_operand.vmem [shape: f32[1,128], index: 9, kind: input, shape index: {}]   ;;  %s5787_s10 = inlined_call_operand.vmem [shape: f32[1,128], index: 10, kind: input, shape index: {}]   ;;  %s5788_s11 = inlined_call_operand.<no memory space> [shape: f32[1,1], index: 11, kind: input, shape index: {}]   ;;  %s5789_s12 = inlined_call_operand.hbm [shape: bf16[128,128], index: 12, kind: input, shape index: {}]   ;;  %s5790_s13 = inlined_call_operand.vmem [shape: f32[1,128], index: 13, kind: input, shape index: {}]   ;;  %s5791_s14 = inlined_call_operand.vmem [shape: f32[1,128], index: 14, kind: input, shape index: {}]   ;;  %s5792_s16 = inlined_call_operand.hbm [shape: bf16[1280,256], index: 16, kind: input, shape index: {}]   ;;  %s5793_s17 = inlined_call_operand.hbm [shape: bf16[128,256], index: 17, kind: input, shape index: {}]   ;;  %s5794_s18 = inlined_call_operand.vmem [shape: f32[1,256], index: 18, kind: input, shape index: {}]   ;;  %s5795_s19 = inlined_call_operand.vmem [shape: f32[1,256], index: 19, kind: input, shape index: {}]   ;;  %s5796_s21 = inlined_call_operand.vmem [shape: f32[16,1], index: 21, kind: output, shape index: {}]   ;;  %s5797_s15 = inlined_call_operand.<no memory space> [shape: f32[1,1], index: 15, kind: input, shape index: {}]   ;;  %s5798_s20 = inlined_call_operand.<no memory space> [shape: f32[1,1], index: 20, kind: input, shape index: {}]  }
   0x1   :  { %5799 = sst [smem:[#allocation24_spill]] %s5777_s0  ;;  %v26_v0 = vstv %s5788_s11  ;;  %v28_v1 = vstv %s5797_s15  ;;  %v30_v2 = vstv %s5798_s20 }
   0x2   :  { %5800 = sst [smem:[#allocation25_spill]] %s5778_s1  ;;  %27 = vst [vmem:[#allocation2] sm:$0x1] %v26_v0 }
   0x3   :  { %5801 = sst [smem:[#allocation26_spill]] %s5779_s2  ;;  %29 = vst [vmem:[#allocation3] sm:$0x1] %v28_v1 }
   0x4   :  { %5802 = sst [smem:[#allocation27_spill]] %s5780_s3  ;;  %31 = vst [vmem:[#allocation4] sm:$0x1] %v30_v2 }
   0x5   :  { %5803 = sst [smem:[#allocation28_spill]] %s5781_s4 }
   0x6   :  { %5804 = sst [smem:[#allocation29_spill]] %s5782_s5 }
   0x7   :  { %32 = vsyncpa [#allocation6], 0 }
   0x8   :  { %33 = vsyncpa [#allocation8], 0 }
   0x9   :  { %34 = vsyncpa [#allocation11], 0 }
   0xa   :  { %35 = vsyncpa [#allocation14], 0  ;;  %s5805_s4 = sld [smem:[#allocation25_spill]] }
  0x10   :  { %s54_s30 = sshll.u32 %s5805_s4, 4  ;;  %s55_s30 = int_to_ptr.hbm [resolvable:$true] %s54_s30 }
  0x11   :  { %36 = vsyncpa [#allocation17], 0  ;;  %s5421_s11 = smov [#allocation7]   ;;  %s5806_s23 = sld [smem:[#allocation28_spill]] }
  0x12   :  { %s56_s5 = sshll.u32 %s5421_s11, 4  ;;  %s5422_s1 = smov 640   ;;  %s57_s5 = int_to_ptr.vmem [resolvable:$true] %s56_s5 }
  0x13   :  { %s5423_s24 = smov 40   ;;  %s5424_s2 = smov [#allocation10]  }
  0x14   :  { %62 = dma.hbm_to_vmem [thread:$0]  %s55_s30, 1280, %s57_s5, [#allocation8], %s5422_s1, %s5422_s1, %s5423_s24  }
  0x15   :  { %s84_s25 = sshll.u32 %s5424_s2, 4  ;;  %s5425_s26 = smov 64   ;;  %s85_s25 = int_to_ptr.vmem [resolvable:$true] %s84_s25 }
  0x16   :  { %s5426_s27 = smov 4   ;;  %s112_s29 = sshll.u32 %s5785_s8, 4  ;;  %s113_s29 = int_to_ptr.hbm [resolvable:$true] %s112_s29 }
  0x17   :  { %s82_s20 = sshll.u32 %s5806_s23, 4  ;;  %s5427_s0 = smov [#allocation13]   ;;  %s83_s20 = int_to_ptr.hbm [resolvable:$true] %s82_s20 }
  0x18   :  { %90 = dma.hbm_to_vmem [thread:$0]  %s83_s20, 4096, %s85_s25, [#allocation11], %s5425_s26, %s5425_s26, %s5426_s27  }
  0x19   :  { %s114_s4 = sshll.u32 %s5427_s0, 4  ;;  %s150_s5 = sshll.u32 %s5792_s16, 4  ;;  %s115_s4 = int_to_ptr.vmem [resolvable:$true] %s114_s4  ;;  %s151_s5 = int_to_ptr.hbm [resolvable:$true] %s150_s5 }
  0x1a   :  { %120 = dma.hbm_to_vmem [thread:$0]  %s113_s29, 10240, %s115_s4, [#allocation14], %s5425_s26, %s5425_s26, %s5426_s27  }
  0x1b   :  { %s5428_s15 = smov [#allocation16]   ;;  %s5807_s1 = sld [smem:[#allocation24_spill]] }
  0x1c   :  { %s152_s22 = sshll.u32 %s5428_s15, 4  ;;  %s5429_s8 = smov 128   ;;  %s153_s22 = int_to_ptr.vmem [resolvable:$true] %s152_s22 }
  0x1d   :  { %s5430_s2 = smov 8   ;;  %s5808_s28 = sld [smem:[#allocation26_spill]] }
  0x1e   :  { %158 = dma.hbm_to_vmem [thread:$0]  %s151_s5, 20480, %s153_s22, [#allocation17], %s5429_s8, %s5429_s8, %s5430_s2  }
  0x1f   :  { %s5431_s16 = smov [#allocation5]   ;;  %s5432_s4 = smov [#allocation9]  }
  0x20   :  { %s43_s0 = sshll.u32 %s5431_s16, 4  ;;  %s69_s30 = sshll.u32 %s5432_s4, 4  ;;  %s44_s0 = int_to_ptr.vmem [resolvable:$true] %s43_s0  ;;  %s70_s30 = int_to_ptr.vmem [resolvable:$true] %s69_s30 }
  0x21   :  { %s41_s24 = sshll.u32 %s5807_s1, 4  ;;  %s5433_s11 = smov 256   ;;  %s42_s24 = int_to_ptr.hbm [resolvable:$true] %s41_s24 }
  0x22   :  { %49 = dma.hbm_to_vmem [thread:$0]  %s42_s24, 256, %s44_s0, [#allocation6], %s5429_s8, %s5429_s8, %s5430_s2  }
  0x23   :  { %s67_s29 = sshll.u32 %s5808_s28, 4  ;;  %s5434_s15 = smov 16   ;;  %s68_s29 = int_to_ptr.hbm [resolvable:$true] %s67_s29 }
  0x24   :  { %75 = dma.hbm_to_vmem [thread:$0]  %s68_s29, 1024, %s70_s30, [#allocation8], %s5433_s11, %s5433_s11, %s5434_s15  }
  0x25   :  { %s97_s22 = sshll.u32 %s5783_s6, 4  ;;  %s5435_s20 = smov [#allocation12]   ;;  %s98_s22 = int_to_ptr.hbm [resolvable:$true] %s97_s22 }
  0x26   :  { %s99_s1 = sshll.u32 %s5435_s20, 4  ;;  %s131_s28 = sshll.u32 %s5789_s12, 4  ;;  %s100_s1 = int_to_ptr.vmem [resolvable:$true] %s99_s1  ;;  %s132_s28 = int_to_ptr.hbm [resolvable:$true] %s131_s28 }
  0x27   :  { %105 = dma.hbm_to_vmem [thread:$0]  %s98_s22, 1024, %s100_s1, [#allocation11], %s5425_s26, %s5425_s26, %s5426_s27  }
  0x28   :  { %s5436_s24 = smov [#allocation15]   ;;  %s163_s4 = sshll.u32 %s5793_s17, 4  ;;  %s164_s4 = int_to_ptr.hbm [resolvable:$true] %s163_s4 }
  0x29   :  { %s133_s16 = sshll.u32 %s5436_s24, 4  ;;  %s5437_s6 = smov [#allocation18]   ;;  %s134_s16 = int_to_ptr.vmem [resolvable:$true] %s133_s16 }
  0x2a   :  { %139 = dma.hbm_to_vmem [thread:$0]  %s132_s28, 1024, %s134_s16, [#allocation14], %s5425_s26, %s5425_s26, %s5426_s27  }
  0x2b   :  { %s165_s30 = sshll.u32 %s5437_s6, 4  ;;  %s166_s30 = int_to_ptr.vmem [resolvable:$true] %s165_s30 }
  0x2c   :  { %171 = dma.hbm_to_vmem [thread:$0]  %s164_s4, 2048, %s166_s30, [#allocation17], %s5429_s8, %s5429_s8, %s5430_s2  }
  0x2d   :  { %5411 = dma.done.wait [#allocation6], 256  }
  0x2e   :  { %5412 = vsyncadd [#allocation6], 4294967040 }
  0x2f   :  { %5413 = dma.done.wait [#allocation8], 2304  }
  0x30   :  { %5414 = vsyncadd [#allocation8], 4294964992 }
  0x31   :  { %5415 = dma.done.wait [#allocation11], 5120  }
  0x32   :  { %5416 = vsyncadd [#allocation11], 4294962176 }
  0x33   :  { %5417 = dma.done.wait [#allocation14], 11264  }
  0x34   :  { %5418 = vsyncadd [#allocation14], 4294956032 }
  0x35   :  { %5419 = dma.done.wait [#allocation17], 22528  }
  0x36   :  { %5420 = vsyncadd [#allocation17], 4294944768  ;;  %v3464_v3 = vld [vmem:[#allocation9 + $0x20] sm:$0xf]  ;;  %v4744_v4 = vld [vmem:[#allocation9 + $0x2c] sm:$0xf0] }
  0x37   :  { %v4742_v5 = vld [vmem:[#allocation9 + $0x24] sm:$0xf]  ;;  %v3465_v6 = vor.u32 %v4744_v4, %v3464_v3  ;;  %v3466_v7 = vld [vmem:[#allocation9 + $0x30] sm:$0xf0]  ;;  %v3448_v8 = vld [vmem:[#allocation9] sm:$0xf] }
  0x38   :  { %v4740_v9 = vld [vmem:[#allocation9 + $0xc] sm:$0xf0]  ;;  %v3469_v10 = vor.u32 %v4742_v5, %v3466_v7  ;;  %v4738_v11 = vld [vmem:[#allocation9 + $0x4] sm:$0xf]  ;;  %v3450_v12 = vld [vmem:[#allocation9 + $0x10] sm:$0xf0] }
  0x39   :  { %v215_v13 = vld [vmem:[#allocation5] sm:$0xff]  ;;  %286 = vmatpush.bf16.msra.mxu2 %v3465_v6  ;;  %v3449_v14 = vor.u32 %v4740_v9, %v3448_v8  ;;  %v216_v15 = vld [vmem:[#allocation5 + $0x8] sm:$0xff]  ;;  %v4745_v17 = vld [vmem:[#allocation9 + $0x34] sm:$0xf0]  ;;  %v3453_v18 = vor.u32 %v4738_v11, %v3450_v12  ;;  %vm276_vm0 = vcmask 261120   ;;  %s5809_s26 = sld [smem:[#allocation27_spill]] }
  0x3a   :  { %v3472_v16 = vld [vmem:[#allocation9 + $0x28] sm:$0xf]  ;;  %300 = vmatpush.bf16.msra.mxu3 %v3469_v10  ;;  %v4743_v20 = vld [vmem:[#allocation9 + $0x2c] sm:$0xf]  ;;  %v3474_v21 = vld [vmem:[#allocation9 + $0x38] sm:$0xf0]  ;;  %v217_v26 = vpack.c.bf16 %v216_v15, %v215_v13 }
  0x3b   :  { %v3473_v19 = vor.u32 %v4745_v17, %v3472_v16  ;;  %v3477_v22 = vor.u32 %v4743_v20, %v3474_v21  ;;  %v3456_v23 = vld [vmem:[#allocation9 + $0x8] sm:$0xf]  ;;  %v4741_v24 = vld [vmem:[#allocation9 + $0x14] sm:$0xf0]  ;;  %v4739_v25 = vld [vmem:[#allocation9 + $0xc] sm:$0xf] }
  0x3c   :  { %v3458_v27 = vld [vmem:[#allocation9 + $0x18] sm:$0xf0]  ;;  %v3457_v28 = vor.u32 %v4741_v24, %v3456_v23  ;;  %v4752_v32 = vld [vmem:[#allocation10 + $0x30] sm:$0xff]  ;;  %v4751_v34 = vld [vmem:[#allocation10 + $0x28] sm:$0xff]  ;;  %s5810_s2 = sld [smem:[#allocation29_spill]] }
  0x3d   :  { %287 = vmatpush.bf16.msra.mxu2 %v3449_v14  ;;  %v3461_v29 = vor.u32 %v4739_v25, %v3458_v27  ;;  %v4753_v30 = vld [vmem:[#allocation10 + $0x38] sm:$0xff]  ;;  %v4760_v33 = vld [vmem:[#allocation10 + $0x70] sm:$0xff]  ;;  %v4759_v35 = vld [vmem:[#allocation10 + $0x68] sm:$0xff] }
  0x3e   :  { %301 = vmatpush.bf16.msra.mxu3 %v3453_v18  ;;  %v4761_v31 = vld [vmem:[#allocation10 + $0x78] sm:$0xff]  ;;  %648 = vmatpush.bf16.msra.mxu0 %v4753_v30  ;;  %v4750_v36 = vld [vmem:[#allocation10 + $0x20] sm:$0xff]  ;;  %v4748_v42 = vld [vmem:[#allocation10 + $0x10] sm:$0xff] }
  0x3f   :  { %662 = vmatpush.bf16.msra.mxu1 %v4761_v31  ;;  %v4758_v37 = vld [vmem:[#allocation10 + $0x60] sm:$0xff]  ;;  %v4749_v38 = vld [vmem:[#allocation10 + $0x18] sm:$0xff]  ;;  %v4756_v43 = vld [vmem:[#allocation10 + $0x50] sm:$0xff] }
  0x40   :  { %3478 = vmatmul.msk.bf16.vlgmr.msra.gmra.mxu2 %vm276_vm0, %v217_v26  ;;  %v4757_v39 = vld [vmem:[#allocation10 + $0x58] sm:$0xff]  ;;  %v4768_v44 = vld [vmem:[#allocation10 + $0xb0] sm:$0xff]  ;;  %v4747_v48 = vld [vmem:[#allocation10 + $0x8] sm:$0xff] }
  0x41   :  { %314 = vmatpush.bf16.msrb.mxu2 %v3473_v19  ;;  %3479 = vmatmul.msk.bf16.vlgmr.msra.gmra.mxu3 %vm276_vm0, %v217_v26  ;;  %v4769_v40 = vld [vmem:[#allocation10 + $0xb8] sm:$0xff]  ;;  %v4776_v46 = vld [vmem:[#allocation10 + $0xf0] sm:$0xff]  ;;  %v4755_v49 = vld [vmem:[#allocation10 + $0x48] sm:$0xff] }
  0x42   :  { %328 = vmatpush.bf16.msrb.mxu3 %v3477_v22  ;;  %649 = vmatpush.bf16.msra.mxu0 %v4752_v32  ;;  %v4777_v41 = vld [vmem:[#allocation10 + $0xf8] sm:$0xff]  ;;  %v4767_v50 = vld [vmem:[#allocation10 + $0xa8] sm:$0xff]  ;;  %v4746_v56 = vld [vmem:[#allocation10] sm:$0xff] }
  0x43   :  { %663 = vmatpush.bf16.msra.mxu1 %v4760_v33  ;;  %v5610_v45 = vld [vmem:[%s5809_s26] sm:$0xf]  ;;  %v4775_v52 = vld [vmem:[#allocation10 + $0xe8] sm:$0xff]  ;;  %v4764_v6 = vld [vmem:[#allocation10 + $0x90] sm:$0xff] }
  0x44   :  { %v228_v47 = vperm.slane %v5610_v45, 0  ;;  %v229_v51 = vperm.slane %v5610_v45, 1  ;;  %v4754_v57 = vld [vmem:[#allocation10 + $0x40] sm:$0xff]  ;;  %v4765_v0 = vld [vmem:[#allocation10 + $0x98] sm:$0xff]  ;;  %v4772_v7 = vld [vmem:[#allocation10 + $0xd0] sm:$0xff]  ;;  %v230_v12 = vperm.slane %v5610_v45, 2 }
  0x45   :  { %315 = vmatpush.bf16.msrb.mxu2 %v3457_v28  ;;  %v4766_v58 = vld [vmem:[#allocation10 + $0xa0] sm:$0xff]  ;;  %v4773_v1 = vld [vmem:[#allocation10 + $0xd8] sm:$0xff]  ;;  %v4763_v13 = vld [vmem:[#allocation10 + $0x88] sm:$0xff]  ;;  %v231_v16 = vperm.slane %v5610_v45, 3 }
  0x46   :  { %329 = vmatpush.bf16.msrb.mxu3 %v3461_v29  ;;  %650 = vmatpush.bf16.msra.mxu0 %v4751_v34  ;;  %v4774_v60 = vld [vmem:[#allocation10 + $0xe0] sm:$0xff]  ;;  %v4771_v14 = vld [vmem:[#allocation10 + $0xc8] sm:$0xff] }
  0x47   :  { %664 = vmatpush.bf16.msra.mxu1 %v4759_v35  ;;  %v4762_v22 = vld [vmem:[#allocation10 + $0x80] sm:$0xff] }
  0x48   :  { %v4770_v23 = vld [vmem:[#allocation10 + $0xc0] sm:$0xff] }
  0x49   :  { %676 = vmatpush.bf16.msra.mxu2 %v4769_v40 }
  0x4a   :  { %651 = vmatpush.bf16.msra.mxu0 %v4750_v36  ;;  %690 = vmatpush.bf16.msra.mxu3 %v4777_v41 }
  0x4b   :  { %665 = vmatpush.bf16.msra.mxu1 %v4758_v37 }
  0x4d   :  { %677 = vmatpush.bf16.msra.mxu2 %v4768_v44 }
  0x4e   :  { %652 = vmatpush.bf16.msra.mxu0 %v4749_v38  ;;  %691 = vmatpush.bf16.msra.mxu3 %v4776_v46 }
  0x4f   :  { %666 = vmatpush.bf16.msra.mxu1 %v4757_v39 }
  0x50   :  { %3480 = vmatmul.msk.bf16.vlgmr.msrb.gmra.mxu2 %vm276_vm0, %v217_v26 }
  0x51   :  { %3481 = vmatmul.msk.bf16.vlgmr.msrb.gmra.mxu3 %vm276_vm0, %v217_v26  ;;  %678 = vmatpush.bf16.msra.mxu2 %v4767_v50 }
  0x52   :  { %653 = vmatpush.bf16.msra.mxu0 %v4748_v42  ;;  %692 = vmatpush.bf16.msra.mxu3 %v4775_v52 }
  0x53   :  { %667 = vmatpush.bf16.msra.mxu1 %v4756_v43 }
  0x55   :  { %679 = vmatpush.bf16.msra.mxu2 %v4766_v58 }
  0x56   :  { %654 = vmatpush.bf16.msra.mxu0 %v4747_v48  ;;  %693 = vmatpush.bf16.msra.mxu3 %v4774_v60 }
  0x57   :  { %668 = vmatpush.bf16.msra.mxu1 %v4755_v49 }
  0x59   :  { %680 = vmatpush.bf16.msra.mxu2 %v4765_v0 }
  0x5a   :  { %655 = vmatpush.bf16.msra.mxu0 %v4746_v56  ;;  %694 = vmatpush.bf16.msra.mxu3 %v4773_v1 }
  0x5b   :  { %669 = vmatpush.bf16.msra.mxu1 %v4754_v57 }
  0x5d   :  { %681 = vmatpush.bf16.msra.mxu2 %v4764_v6 }
  0x5e   :  { %695 = vmatpush.bf16.msra.mxu3 %v4772_v7  ;;  %v4811_v7 = vld [vmem:[#allocation13 + $0x78] sm:$0xff] }
  0x61   :  { %682 = vmatpush.bf16.msra.mxu2 %v4763_v13  ;;  %v4809_v13 = vld [vmem:[#allocation13 + $0x68] sm:$0xff] }
  0x62   :  { %696 = vmatpush.bf16.msra.mxu3 %v4771_v14  ;;  %v4783_v14 = vld [vmem:[#allocation12 + $0x28] sm:$0xff] }
  0x65   :  { %683 = vmatpush.bf16.msra.mxu2 %v4762_v22  ;;  %v4806_v22 = vld [vmem:[#allocation13 + $0x50] sm:$0xff] }
  0x66   :  { %697 = vmatpush.bf16.msra.mxu3 %v4770_v23  ;;  %v4780_v23 = vld [vmem:[#allocation12 + $0x10] sm:$0xff] }
  0x69   :  { %1531 = vmatpush.bf16.msrb.mxu2 %v4811_v7  ;;  %v4821_v7 = vld [vmem:[#allocation13 + $0xc8] sm:$0xff] }
  0xc3   :  { %v289_v53 = vpop.f32.mrf.mxu2 }
  0xc4   :  { %v5614_v54 = vadd.f32 %v289_v53, %v228_v47  ;;  %v303_v55 = vpop.f32.mrf.mxu3 }
  0xc5   :  { %v5616_v59 = vadd.f32 %v303_v55, %v229_v51 }
  0xc6   :  { %v336_v61 = vsub.f32 0.0, %v5614_v54 }
  0xc7   :  { %v337_v62 = vsub.f32 0.0, %v5616_v59 }
  0xc8   :  { %v344_v63 = vmul.f32 1.442695, %v336_v61 }
  0xc9   :  { %v346_v2 = vmul.f32 1.442695, %v337_v62 }
  0xca   :  { %5091 = vpow2.f32 %v344_v63 }
  0xcb   :  { %v291_v3 = vpop.f32.mrf.mxu2  ;;  %5093 = vpow2.f32 %v346_v2 }
  0xcc   :  { %v292_v4 = vadd.f32 %v291_v3, %v228_v47  ;;  %v305_v5 = vpop.f32.mrf.mxu3 }
  0xcd   :  { %v306_v8 = vadd.f32 %v305_v5, %v229_v51 }
  0xce   :  { %v340_v9 = vsub.f32 0.0, %v292_v4 }
  0xcf   :  { %v341_v10 = vsub.f32 0.0, %v306_v8 }
  0xd0   :  { %v352_v11 = vmul.f32 1.442695, %v340_v9  ;;  %v5092_v17 = vpop.eup %5091  ;;  %v4803_v9 = vld [vmem:[#allocation13 + $0x38] sm:$0xff] }
  0xd1   :  { %v354_v15 = vmul.f32 1.442695, %v341_v10  ;;  %v5094_v18 = vpop.eup %5093  ;;  %v360_v24 = vadd.f32 1.0, %v5092_v17  ;;  %v4810_v10 = vld [vmem:[#allocation13 + $0x70] sm:$0xff]  ;;  %1517 = vmatpush.bf16.msrb.mxu1 %v4803_v9  ;;  %v4782_v17 = vld [vmem:[#allocation12 + $0x20] sm:$0xff] }
  0xd2   :  { %5095 = vpow2.f32 %v352_v11  ;;  %v361_v26 = vadd.f32 1.0, %v5094_v18  ;;  %1532 = vmatpush.bf16.msrb.mxu2 %v4810_v10  ;;  %v4784_v11 = vld [vmem:[#allocation12 + $0x30] sm:$0xff]  ;;  %v4800_v18 = vld [vmem:[#allocation13 + $0x20] sm:$0xff] }
  0xd3   :  { %v317_v19 = vpop.f32.mrf.mxu2  ;;  %5097 = vpow2.f32 %v354_v15  ;;  %v4801_v15 = vld [vmem:[#allocation13 + $0x28] sm:$0xff]  ;;  %v4786_v9 = vld [vmem:[#allocation7 + $0x4] sm:$0xf] }
  0xd4   :  { %v318_v20 = vadd.f32 %v317_v19, %v230_v12  ;;  %v331_v21 = vpop.f32.mrf.mxu3  ;;  %5099 = vrcp.f32 %v360_v24  ;;  %v4807_v19 = vld [vmem:[#allocation13 + $0x58] sm:$0xff] }
  0xd5   :  { %v332_v25 = vadd.f32 %v331_v21, %v231_v16  ;;  %5101 = vrcp.f32 %v361_v26  ;;  %v4799_v21 = vld [vmem:[#allocation13 + $0x18] sm:$0xff]  ;;  %v4805_v26 = vld [vmem:[#allocation13 + $0x48] sm:$0xff] }
  0xd6   :  { %v338_v27 = vsub.f32 0.0, %v318_v20  ;;  %1533 = vmatpush.bf16.msrb.mxu2 %v4809_v13  ;;  %v4819_v24 = vld [vmem:[#allocation13 + $0xb8] sm:$0xff]  ;;  %v4836_v13 = vld [vmem:[#allocation13 + $0x140] sm:$0xff] }
  0xd7   :  { %v339_v28 = vsub.f32 0.0, %v332_v25  ;;  %1545 = vmatpush.bf16.msrb.mxu3 %v4819_v24 }
  0xd8   :  { %v5096_v29 = vpop.eup %5095  ;;  %v348_v30 = vmul.f32 1.442695, %v338_v27  ;;  %v4779_v27 = vld [vmem:[#allocation12 + $0x8] sm:$0xff] }
  0xd9   :  { %v364_v31 = vadd.f32 1.0, %v5096_v29  ;;  %v350_v32 = vmul.f32 1.442695, %v339_v28  ;;  %v5098_v33 = vpop.eup %5097  ;;  %v4818_v28 = vld [vmem:[#allocation13 + $0xb0] sm:$0xff]  ;;  %v4797_v29 = vld [vmem:[#allocation13 + $0x8] sm:$0xff] }
  0xda   :  { %v365_v35 = vadd.f32 1.0, %v5098_v33  ;;  %v5100_v40 = vpop.eup %5099  ;;  %v4817_v33 = vld [vmem:[#allocation13 + $0xa8] sm:$0xff] }
  0xdb   :  { %5103 = vrcp.f32 %v364_v31  ;;  %v319_v34 = vpop.f32.mrf.mxu2  ;;  %v5102_v42 = vpop.eup %5101  ;;  %v376_v47 = vmul.f32 %v5100_v40, %v5614_v54  ;;  %1546 = vmatpush.bf16.msrb.mxu3 %v4818_v28  ;;  %v4843_v31 = vld [vmem:[#allocation13 + $0x178] sm:$0xff]  ;;  %v4834_v40 = vld [vmem:[#allocation13 + $0x130] sm:$0xff] }
  0xdc   :  { %5105 = vpow2.f32 %v348_v30  ;;  %v320_v36 = vadd.f32 %v319_v34, %v230_v12  ;;  %v333_v37 = vpop.f32.mrf.mxu3  ;;  %v377_v52 = vmul.f32 %v5102_v42, %v5616_v59  ;;  %v4802_v12 = vld [vmem:[#allocation13 + $0x30] sm:$0xff]  ;;  %v4804_v30 = vld [vmem:[#allocation13 + $0x40] sm:$0xff]  ;;  %v4827_v34 = vld [vmem:[#allocation13 + $0xf8] sm:$0xff] }
  0xdd   :  { %5107 = vpow2.f32 %v350_v32  ;;  %v334_v38 = vadd.f32 %v333_v37, %v231_v16  ;;  %1518 = vmatpush.bf16.msrb.mxu1 %v4802_v12  ;;  %v4808_v16 = vld [vmem:[#allocation13 + $0x60] sm:$0xff]  ;;  %v4842_v37 = vld [vmem:[#allocation13 + $0x170] sm:$0xff]  ;;  %v4829_v12 = vld [vmem:[#allocation13 + $0x108] sm:$0xff] }
  0xde   :  { %5109 = vrcp.f32 %v365_v35  ;;  %v342_v39 = vsub.f32 0.0, %v320_v36  ;;  %1534 = vmatpush.bf16.msrb.mxu2 %v4808_v16  ;;  %v4778_v32 = vld [vmem:[#allocation12] sm:$0xff] }
  0xdf   :  { %v343_v41 = vsub.f32 0.0, %v334_v38  ;;  %v4796_v35 = vld [vmem:[#allocation13] sm:$0xff]  ;;  %1547 = vmatpush.bf16.msrb.mxu3 %v4817_v33 }
  0xe0   :  { %v356_v43 = vmul.f32 1.442695, %v342_v39  ;;  %v4826_v39 = vld [vmem:[#allocation13 + $0xf0] sm:$0xff] }
  0xe1   :  { %v5104_v44 = vpop.eup %5103  ;;  %v358_v45 = vmul.f32 1.442695, %v343_v41  ;;  %1519 = vmatpush.bf16.msrb.mxu1 %v4801_v15  ;;  %v4841_v41 = vld [vmem:[#allocation13 + $0x168] sm:$0xff] }
  0xe2   :  { %v5106_v46 = vpop.eup %5105  ;;  %v380_v48 = vmul.f32 %v5104_v44, %v292_v4  ;;  %5111 = vpow2.f32 %v356_v43  ;;  %1535 = vmatpush.bf16.msrb.mxu2 %v4807_v19  ;;  %v4815_v43 = vld [vmem:[#allocation13 + $0x98] sm:$0xff]  ;;  %v4825_v44 = vld [vmem:[#allocation13 + $0xe8] sm:$0xff]  ;;  %v4820_v19 = vld [vmem:[#allocation13 + $0xc0] sm:$0xff] }
  0xe3   :  { %v5108_v49 = vpop.eup %5107  ;;  %5113 = vpow2.f32 %v358_v45  ;;  %v362_v55 = vadd.f32 1.0, %v5106_v46  ;;  %v5082_v45 = vld [vmem:[%s5810_s2] ss:$0 sm:$0xff]  ;;  %v4833_v46 = vld [vmem:[#allocation13 + $0x128] sm:$0xff] }
  0xe4   :  { %v5110_v50 = vpop.eup %5109  ;;  %v384_v51 = vpack.c.bf16 %v380_v48, %v376_v47  ;;  %v363_v56 = vadd.f32 1.0, %v5108_v49  ;;  %v4840_v47 = vld [vmem:[#allocation13 + $0x160] sm:$0xff]  ;;  %v4814_v48 = vld [vmem:[#allocation13 + $0x90] sm:$0xff] }
  0xe5   :  { %v381_v53 = vmul.f32 %v5110_v50, %v306_v8  ;;  %5115 = vrcp.f32 %v362_v55  ;;  %v4785_v8 = vld [vmem:[#allocation12 + $0x38] sm:$0xff]  ;;  %1520 = vmatpush.bf16.msrb.mxu1 %v4800_v18  ;;  %v4824_v49 = vld [vmem:[#allocation13 + $0xe0] sm:$0xff]  ;;  %v4813_v55 = vld [vmem:[#allocation13 + $0x88] sm:$0xff] }
  0xe6   :  { %656 = vmatmul.bf16.vlgmr.msra.gmra.mxu0 %v384_v51  ;;  %5117 = vrcp.f32 %v363_v56  ;;  %1536 = vmatpush.bf16.msrb.mxu2 %v4806_v22  ;;  %v4823_v56 = vld [vmem:[#allocation13 + $0xd8] sm:$0xff] }
  0xe7   :  { %v385_v57 = vpack.c.bf16 %v381_v53, %v377_v52  ;;  %785 = vmatpush.bf16.msrb.mxu0 %v4785_v8  ;;  %v4832_v52 = vld [vmem:[#allocation13 + $0x120] sm:$0xff]  ;;  %v4839_v53 = vld [vmem:[#allocation13 + $0x158] sm:$0xff]  ;;  %v4850_v8 = vld [vmem:[#allocation13 + $0x1b0] sm:$0xff] }
  0xe8   :  { %v5112_v58 = vpop.eup %5111 }
  0xe9   :  { %v366_v60 = vadd.f32 1.0, %v5112_v58  ;;  %670 = vmatmul.bf16.vlgmr.msra.gmra.mxu1 %v385_v57  ;;  %v5114_v61 = vpop.eup %5113 }
  0xea   :  { %v367_v54 = vadd.f32 1.0, %v5114_v61  ;;  %1521 = vmatpush.bf16.msrb.mxu1 %v4799_v21  ;;  %1537 = vmatpush.bf16.msrb.mxu2 %v4805_v26  ;;  %v4831_v61 = vld [vmem:[#allocation13 + $0x118] sm:$0xff]  ;;  %v4828_v26 = vld [vmem:[#allocation13 + $0x100] sm:$0xff] }
  0xeb   :  { %5119 = vrcp.f32 %v366_v60  ;;  %v5116_v62 = vpop.eup %5115  ;;  %786 = vmatpush.bf16.msrb.mxu0 %v4784_v11  ;;  %v3646_v11 = vld [vmem:[#allocation7 + $0x28] sm:$0xf0]  ;;  %v4791_v21 = vld [vmem:[#allocation7 + $0x24] sm:$0xf0] }
  0xec   :  { %5121 = vrcp.f32 %v367_v54  ;;  %v5118_v63 = vpop.eup %5117  ;;  %v378_v1 = vmul.f32 %v5116_v62, %v318_v20  ;;  %v4781_v20 = vld [vmem:[#allocation12 + $0x18] sm:$0xff]  ;;  %v4838_v54 = vld [vmem:[#allocation13 + $0x150] sm:$0xff]  ;;  %v3649_v16 = vor.u32 %v4786_v9, %v3646_v11 }
  0xed   :  { %v379_v3 = vmul.f32 %v5118_v63, %v332_v25  ;;  %v4798_v25 = vld [vmem:[#allocation13 + $0x10] sm:$0xff]  ;;  %v4812_v63 = vld [vmem:[#allocation13 + $0x80] sm:$0xff]  ;;  %v3678_v9 = vld [vmem:[#allocation7 + $0x48] sm:$0xf0] }
  0xee   :  { %1522 = vmatpush.bf16.msrb.mxu1 %v4798_v25  ;;  %1538 = vmatpush.bf16.msrb.mxu2 %v4804_v30  ;;  %v3652_v30 = vld [vmem:[#allocation7 + $0x8] sm:$0xf] }
  0xef   :  { %787 = vmatpush.bf16.msrb.mxu0 %v4783_v14 }
  0xf1   :  { %v5120_v0 = vpop.eup %5119 }
  0xf2   :  { %v382_v2 = vmul.f32 %v5120_v0, %v320_v36  ;;  %v5122_v59 = vpop.eup %5121  ;;  %1523 = vmatpush.bf16.msrb.mxu1 %v4797_v29  ;;  %v4835_v36 = vld [vmem:[#allocation13 + $0x138] sm:$0xff]  ;;  %v4822_v0 = vld [vmem:[#allocation13 + $0xd0] sm:$0xff] }
  0xf3   :  { %v383_v5 = vmul.f32 %v5122_v59, %v334_v38  ;;  %788 = vmatpush.bf16.msrb.mxu0 %v4782_v17  ;;  %v4816_v38 = vld [vmem:[#allocation13 + $0xa0] sm:$0xff]  ;;  %v4830_v59 = vld [vmem:[#allocation13 + $0x110] sm:$0xff]  ;;  %v4875_v17 = vld [vmem:[#allocation13 + $0x278] sm:$0xff] }
  0xf4   :  { %v386_v4 = vpack.c.bf16 %v382_v2, %v378_v1  ;;  %1548 = vmatpush.bf16.msrb.mxu3 %v4816_v38  ;;  %v4851_v1 = vld [vmem:[#allocation13 + $0x1b8] sm:$0xff]  ;;  %v4874_v29 = vld [vmem:[#allocation13 + $0x270] sm:$0xff] }
  0xf5   :  { %v387_v6 = vpack.c.bf16 %v383_v5, %v379_v3  ;;  %v4837_v3 = vld [vmem:[#allocation13 + $0x148] sm:$0xff] }
  0xf6   :  { %684 = vmatmul.bf16.vlgmr.msra.gmra.mxu2 %v386_v4  ;;  %1524 = vmatpush.bf16.msrb.mxu1 %v4796_v35 }
  0xf7   :  { %698 = vmatmul.bf16.vlgmr.msra.gmra.mxu3 %v387_v6  ;;  %789 = vmatpush.bf16.msrb.mxu0 %v4781_v20  ;;  %v3644_v20 = vld [vmem:[#allocation7] sm:$0xf] }
  0xf8   :  { %1587 = vmatpush.bf16.msra.mxu2 %v4843_v31  ;;  %1549 = vmatpush.bf16.msrb.mxu3 %v4815_v43  ;;  %v3645_v24 = vor.u32 %v4791_v21, %v3644_v20  ;;  %v4792_v31 = vld [vmem:[#allocation7 + $0x2c] sm:$0xf0]  ;;  %v4855_v20 = vld [vmem:[#allocation13 + $0x1d8] sm:$0xff]  ;;  %v4854_v21 = vld [vmem:[#allocation13 + $0x1d0] sm:$0xff] }
  0xf9   :  { %v4872_v43 = vld [vmem:[#allocation13 + $0x260] sm:$0xff] }
  0xfa   :  { %1573 = vmatpush.bf16.msra.mxu1 %v4835_v36  ;;  %v4866_v36 = vld [vmem:[#allocation13 + $0x230] sm:$0xff] }
  0xfb   :  { %790 = vmatpush.bf16.msrb.mxu0 %v4780_v23  ;;  %v4849_v23 = vld [vmem:[#allocation13 + $0x1a8] sm:$0xff]  ;;  %1525 = vmatmul.bf16.vlgmr.msrb.gmra.mxu1 %v3645_v24 }
  0xfc   :  { %1588 = vmatpush.bf16.msra.mxu2 %v4842_v37  ;;  %1550 = vmatpush.bf16.msrb.mxu3 %v4814_v48  ;;  %v4873_v37 = vld [vmem:[#allocation13 + $0x268] sm:$0xff] }
  0xfd   :  { %v4793_v48 = vld [vmem:[#allocation7 + $0x34] sm:$0xf0]  ;;  %v4789_v24 = vld [vmem:[#allocation7 + $0x1c] sm:$0xf] }
  0xfe   :  { %1574 = vmatpush.bf16.msra.mxu1 %v4834_v40  ;;  %v4788_v40 = vld [vmem:[#allocation7 + $0x14] sm:$0xf] }
  0xff   :  { %791 = vmatpush.bf16.msrb.mxu0 %v4779_v27  ;;  %v4867_v27 = vld [vmem:[#allocation13 + $0x238] sm:$0xff] }
 0x100   :  { %1589 = vmatpush.bf16.msra.mxu2 %v4841_v41  ;;  %1551 = vmatpush.bf16.msrb.mxu3 %v4813_v55  ;;  %v3662_v41 = vld [vmem:[#allocation7 + $0x38] sm:$0xf0] }
 0x101   :  { %v4845_v55 = vld [vmem:[#allocation13 + $0x188] sm:$0xff] }
 0x102   :  { %1575 = vmatpush.bf16.msra.mxu1 %v4833_v46  ;;  %v3665_v46 = vor.u32 %v4788_v40, %v3662_v41  ;;  %v4877_v40 = vld [vmem:[#allocation15 + $0x8] sm:$0xff] }
 0x103   :  { %792 = vmatpush.bf16.msrb.mxu0 %v4778_v32  ;;  %v3653_v32 = vor.u32 %v4792_v31, %v3652_v30  ;;  %v4880_v30 = vld [vmem:[#allocation15 + $0x20] sm:$0xff] }
 0x104   :  { %1590 = vmatpush.bf16.msra.mxu2 %v4840_v47  ;;  %1552 = vmatpush.bf16.msrb.mxu3 %v4812_v63  ;;  %v3660_v47 = vld [vmem:[#allocation7 + $0x10] sm:$0xf]  ;;  %v4869_v63 = vld [vmem:[#allocation13 + $0x248] sm:$0xff] }
 0x106   :  { %1576 = vmatpush.bf16.msra.mxu1 %v4832_v52  ;;  %1539 = vmatmul.bf16.vlgmr.msrb.gmra.mxu2 %v3649_v16  ;;  %v4856_v16 = vld [vmem:[#allocation13 + $0x1e0] sm:$0xff] }
 0x107   :  { %1559 = vmatpush.bf16.msra.mxu0 %v4827_v34  ;;  %v4848_v34 = vld [vmem:[#allocation13 + $0x1a0] sm:$0xff]  ;;  %1553 = vmatmul.bf16.vlgmr.msrb.gmra.mxu3 %v3653_v32 }
 0x108   :  { %1591 = vmatpush.bf16.msra.mxu2 %v4839_v53  ;;  %1601 = vmatpush.bf16.msra.mxu3 %v4851_v1  ;;  %v3661_v53 = vor.u32 %v4793_v48, %v3660_v47 }
 0x10a   :  { %1577 = vmatpush.bf16.msra.mxu1 %v4831_v61  ;;  %v4794_v61 = vld [vmem:[#allocation7 + $0x3c] sm:$0xf0] }
 0x10b   :  { %1560 = vmatpush.bf16.msra.mxu0 %v4826_v39  ;;  %v4847_v39 = vld [vmem:[#allocation13 + $0x198] sm:$0xff] }
 0x10c   :  { %1592 = vmatpush.bf16.msra.mxu2 %v4838_v54  ;;  %1602 = vmatpush.bf16.msra.mxu3 %v4850_v8  ;;  %v4790_v8 = vld [vmem:[#allocation7 + $0x24] sm:$0xf] }
 0x10d   :  { %v3681_v11 = vor.u32 %v4790_v8, %v3678_v9 }
 0x10e   :  { %1578 = vmatpush.bf16.msra.mxu1 %v4830_v59 }
 0x10f   :  { %1561 = vmatpush.bf16.msra.mxu0 %v4825_v44 }
 0x110   :  { %1593 = vmatpush.bf16.msra.mxu2 %v4837_v3  ;;  %1603 = vmatpush.bf16.msra.mxu3 %v4849_v23  ;;  %v4859_v3 = vld [vmem:[#allocation13 + $0x1f8] sm:$0xff]  ;;  %v4852_v23 = vld [vmem:[#allocation13 + $0x1c0] sm:$0xff] }
 0x112   :  { %1579 = vmatpush.bf16.msra.mxu1 %v4829_v12  ;;  %v4860_v12 = vld [vmem:[#allocation13 + $0x200] sm:$0xff] }
 0x113   :  { %1562 = vmatpush.bf16.msra.mxu0 %v4824_v49 }
 0x114   :  { %1594 = vmatpush.bf16.msra.mxu2 %v4836_v13  ;;  %1604 = vmatpush.bf16.msra.mxu3 %v4848_v34  ;;  %v4795_v13 = vld [vmem:[#allocation7 + $0x44] sm:$0xf0]  ;;  %v5083_v34 = vld [vmem:[%s5784_s7] ss:$0 sm:$0xff] }
 0x116   :  { %1580 = vmatpush.bf16.msra.mxu1 %v4828_v26 }
 0x117   :  { %1563 = vmatpush.bf16.msra.mxu0 %v4823_v56  ;;  %1595 = vmatmul.bf16.vlgmr.msra.gmra.mxu2 %v3665_v46  ;;  %v4863_v56 = vld [vmem:[#allocation13 + $0x218] sm:$0xff]  ;;  %v4876_v46 = vld [vmem:[#allocation15] sm:$0xff] }
 0x118   :  { %1643 = vmatpush.bf16.msrb.mxu2 %v4875_v17  ;;  %1605 = vmatpush.bf16.msra.mxu3 %v4847_v39  ;;  %v4787_v17 = vld [vmem:[#allocation7 + $0xc] sm:$0xf] }
 0x119   :  { %1581 = vmatmul.bf16.vlgmr.msra.gmra.mxu1 %v3661_v53  ;;  %v5084_v39 = vld [vmem:[%s5786_s9] ss:$0 sm:$0xff] }
 0x11a   :  { %1629 = vmatpush.bf16.msrb.mxu1 %v4867_v27  ;;  %v4883_v27 = vld [vmem:[#allocation15 + $0x38] sm:$0xff] }
 0x11b   :  { %1564 = vmatpush.bf16.msra.mxu0 %v4822_v0 }
 0x11c   :  { %1644 = vmatpush.bf16.msrb.mxu2 %v4874_v29  ;;  %v4881_v29 = vld [vmem:[#allocation15 + $0x28] sm:$0xff] }
 0x11e   :  { %1630 = vmatpush.bf16.msrb.mxu1 %v4866_v36 }
 0x11f   :  { %1565 = vmatpush.bf16.msra.mxu0 %v4821_v7  ;;  %v4868_v7 = vld [vmem:[#allocation13 + $0x240] sm:$0xff] }
 0x120   :  { %1645 = vmatpush.bf16.msrb.mxu2 %v4873_v37 }
 0x123   :  { %1566 = vmatpush.bf16.msra.mxu0 %v4820_v19 }
 0x124   :  { %1646 = vmatpush.bf16.msrb.mxu2 %v4872_v43 }
 0x163   :  { %v657_v42 = vpop.f32.mrf.mxu0 }
 0x164   :  { %v658_v50 = vadd.f32 %v5082_v45, %v657_v42  ;;  %v4865_v42 = vld [vmem:[#allocation13 + $0x228] sm:$0xff] }
 0x165   :  { %1631 = vmatpush.bf16.msrb.mxu1 %v4865_v42 }
 0x166   :  { %v671_v51 = vpop.f32.mrf.mxu1 }
 0x167   :  { %v672_v57 = vadd.f32 %v671_v51, %v658_v50  ;;  %v4864_v50 = vld [vmem:[#allocation13 + $0x220] sm:$0xff]  ;;  %v4871_v51 = vld [vmem:[#allocation13 + $0x258] sm:$0xff] }
 0x168   :  { %1647 = vmatpush.bf16.msrb.mxu2 %v4871_v51 }
 0x169   :  { %1632 = vmatpush.bf16.msrb.mxu1 %v4864_v50 }
 0x16b   :  { %v659_v58 = vpop.f32.mrf.mxu0 }
 0x16c   :  { %v660_v4 = vadd.f32 %v5082_v45, %v659_v58  ;;  %v4846_v45 = vld [vmem:[#allocation13 + $0x190] sm:$0xff]  ;;  %v4844_v58 = vld [vmem:[#allocation13 + $0x180] sm:$0xff] }
 0x16d   :  { %1606 = vmatpush.bf16.msra.mxu3 %v4846_v45  ;;  %1633 = vmatpush.bf16.msrb.mxu1 %v4863_v56 }
 0x16e   :  { %v673_v10 = vpop.f32.mrf.mxu1 }
 0x16f   :  { %v674_v14 = vadd.f32 %v673_v10, %v660_v4  ;;  %v4861_v4 = vld [vmem:[#allocation13 + $0x208] sm:$0xff]  ;;  %v4858_v10 = vld [vmem:[#allocation13 + $0x1f0] sm:$0xff] }
 0x171   :  { %1607 = vmatpush.bf16.msra.mxu3 %v4845_v55 }
 0x175   :  { %1608 = vmatpush.bf16.msra.mxu3 %v4844_v58 }
 0x178   :  { %v1526_v31 = vpop.f32.mrf.mxu1 }
 0x179   :  { %v685_v60 = vpop.f32.mrf.mxu2  ;;  %1869 = vmatpush.bf16.msrb.mxu3 %v4883_v27  ;;  %v1527_v45 = vadd.f32 %v5084_v39, %v1526_v31 }
 0x17a   :  { %v686_v62 = vadd.f32 %v685_v60, %v672_v57  ;;  %v699_v2 = vpop.f32.mrf.mxu3  ;;  %v4870_v57 = vld [vmem:[#allocation13 + $0x250] sm:$0xff]  ;;  %v3668_v60 = vld [vmem:[#allocation7 + $0x18] sm:$0xf] }
 0x17b   :  { %1648 = vmatpush.bf16.msrb.mxu2 %v4870_v57  ;;  %v3669_v1 = vor.u32 %v4794_v61, %v3668_v60 }
 0x17c   :  { %v5627_v5 = vadd.f32 %v699_v2, %v686_v62  ;;  %v4862_v62 = vld [vmem:[#allocation13 + $0x210] sm:$0xff] }
 0x17d   :  { %1634 = vmatpush.bf16.msrb.mxu1 %v4862_v62  ;;  %1609 = vmatmul.bf16.vlgmr.msra.gmra.mxu3 %v3669_v1 }
 0x17e   :  { %v704_v6 = vsub.f32 0.0, %v5627_v5 }
 0x17f   :  { %1649 = vmatpush.bf16.msrb.mxu2 %v4869_v63 }
 0x180   :  { %v706_v15 = vmul.f32 1.442695, %v704_v6  ;;  %v1528_v37 = vpop.f32.mrf.mxu1 }
 0x181   :  { %v687_v18 = vpop.f32.mrf.mxu2  ;;  %1635 = vmatpush.bf16.msrb.mxu1 %v4861_v4  ;;  %v1529_v56 = vadd.f32 %v5084_v39, %v1528_v37 }
 0x182   :  { %v688_v22 = vadd.f32 %v687_v18, %v674_v14  ;;  %v701_v25 = vpop.f32.mrf.mxu3  ;;  %5123 = vpow2.f32 %v706_v15  ;;  %v4857_v14 = vld [vmem:[#allocation13 + $0x1e8] sm:$0xff]  ;;  %v3654_v18 = vld [vmem:[#allocation7 + $0x30] sm:$0xf0] }
 0x183   :  { %1650 = vmatpush.bf16.msrb.mxu2 %v4868_v7  ;;  %v3657_v19 = vor.u32 %v4787_v17, %v3654_v18 }
 0x184   :  { %v5630_v28 = vadd.f32 %v701_v25, %v688_v22  ;;  %v4853_v22 = vld [vmem:[#allocation13 + $0x1c8] sm:$0xff]  ;;  %v3670_v25 = vld [vmem:[#allocation7 + $0x40] sm:$0xf0] }
 0x185   :  { %1636 = vmatpush.bf16.msrb.mxu1 %v4860_v12  ;;  %v3673_v26 = vor.u32 %v4789_v24, %v3670_v25 }
 0x186   :  { %v705_v33 = vsub.f32 0.0, %v5630_v28  ;;  %1651 = vmatmul.bf16.vlgmr.msrb.gmra.mxu2 %v3681_v11 }
 0x188   :  { %v708_v35 = vmul.f32 1.442695, %v705_v33  ;;  %v5124_v38 = vpop.eup %5123  ;;  %v4879_v33 = vld [vmem:[#allocation15 + $0x18] sm:$0xff] }
 0x189   :  { %v710_v44 = vadd.f32 1.0, %v5124_v38  ;;  %v1540_v32 = vpop.f32.mrf.mxu2 }
 0x18a   :  { %5125 = vpow2.f32 %v708_v35  ;;  %v4878_v35 = vld [vmem:[#allocation15 + $0x10] sm:$0xff]  ;;  %v1554_v43 = vpop.f32.mrf.mxu3 }
 0x18b   :  { %5127 = vrcp.f32 %v710_v44 }
 0x190   :  { %v5126_v49 = vpop.eup %5125 }
 0x191   :  { %v711_v52 = vadd.f32 1.0, %v5126_v49  ;;  %v5128_v54 = vpop.eup %5127  ;;  %v1542_v41 = vpop.f32.mrf.mxu2  ;;  %v1541_v49 = vadd.f32 %v1540_v32, %v1527_v45 }
 0x192   :  { %v714_v2 = vmul.f32 %v5128_v54, %v5627_v5  ;;  %v3676_v5 = vld [vmem:[#allocation7 + $0x20] sm:$0xf]  ;;  %v1556_v60 = vpop.f32.mrf.mxu3  ;;  %v1543_v54 = vadd.f32 %v1542_v41, %v1529_v56  ;;  %v5085_v41 = vld [vmem:[%s5787_s10] ss:$0 sm:$0xff] }
 0x193   :  { %5129 = vrcp.f32 %v711_v52  ;;  %v3677_v15 = vor.u32 %v4795_v13, %v3676_v5  ;;  %v1555_v57 = vadd.f32 %v1554_v43, %v1541_v49  ;;  %v5086_v49 = vld [vmem:[%s5790_s13] ss:$0 sm:$0xff] }
 0x194   :  { %v5087_v56 = vld [vmem:[#allocation2] ss:$0 sm:$0xff] }
 0x195   :  { %1637 = vmatmul.bf16.vlgmr.msrb.gmra.mxu1 %v3677_v15 }
 0x196   :  { %v1582_v50 = vpop.f32.mrf.mxu1 }
 0x199   :  { %v5130_v0 = vpop.eup %5129 }
 0x19a   :  { %v715_v59 = vmul.f32 %v5130_v0, %v5630_v28  ;;  %v4882_v28 = vld [vmem:[#allocation15 + $0x30] sm:$0xff]  ;;  %v1596_v52 = vpop.f32.mrf.mxu2 }
 0x19b   :  { %1870 = vmatpush.bf16.msrb.mxu3 %v4882_v28 }
 0x19c   :  { %v716_v6 = vpack.c.bf16 %v715_v59, %v714_v2  ;;  %v1557_v2 = vadd.f32 %v1556_v60, %v1543_v54 }
 0x19e   :  { %793 = vmatmul.bf16.vlgmr.msrb.gmra.mxu0 %v716_v6  ;;  %v1584_v63 = vpop.f32.mrf.mxu1 }
 0x19f   :  { %1615 = vmatpush.bf16.msrb.mxu0 %v4859_v3  ;;  %1871 = vmatpush.bf16.msrb.mxu3 %v4881_v29 }
 0x1a2   :  { %v1598_v3 = vpop.f32.mrf.mxu2 }
 0x1a3   :  { %1616 = vmatpush.bf16.msrb.mxu0 %v4858_v10  ;;  %1872 = vmatpush.bf16.msrb.mxu3 %v4880_v30 }
 0x1a7   :  { %1617 = vmatpush.bf16.msrb.mxu0 %v4857_v14  ;;  %1873 = vmatpush.bf16.msrb.mxu3 %v4879_v33 }
 0x1ab   :  { %1618 = vmatpush.bf16.msrb.mxu0 %v4856_v16  ;;  %1874 = vmatpush.bf16.msrb.mxu3 %v4878_v35 }
 0x1ae   :  { %1567 = vmatmul.bf16.vlgmr.msra.gmra.mxu0 %v3657_v19 }
 0x1af   :  { %1619 = vmatpush.bf16.msrb.mxu0 %v4855_v20  ;;  %1875 = vmatpush.bf16.msrb.mxu3 %v4877_v40 }
 0x1b3   :  { %1620 = vmatpush.bf16.msrb.mxu0 %v4854_v21  ;;  %1876 = vmatpush.bf16.msrb.mxu3 %v4876_v46 }
 0x1b7   :  { %1621 = vmatpush.bf16.msrb.mxu0 %v4853_v22 }
 0x1bb   :  { %1622 = vmatpush.bf16.msrb.mxu0 %v4852_v23 }
 0x1be   :  { %1623 = vmatmul.bf16.vlgmr.msrb.gmra.mxu0 %v3673_v26 }
 0x200   :  { %v1610_v7 = vpop.f32.mrf.mxu3 }
 0x208   :  { %v1612_v21 = vpop.f32.mrf.mxu3 }
 0x209   :  { %v1652_v17 = vpop.f32.mrf.mxu2 }
 0x211   :  { %v1654_v33 = vpop.f32.mrf.mxu2 }
 0x212   :  { %v1638_v13 = vpop.f32.mrf.mxu1 }
 0x21a   :  { %v1640_v30 = vpop.f32.mrf.mxu1 }
 0x21b   :  { %v794_v36 = vpop.f32.mrf.mxu0 }
 0x21c   :  { %v795_v38 = vadd.f32 %v5083_v34, %v794_v36 }
 0x21e   :  { %v799_v42 = vsub.f32 0.0, %v795_v38 }
 0x220   :  { %v801_v44 = vmul.f32 1.442695, %v799_v42 }
 0x222   :  { %5131 = vpow2.f32 %v801_v44 }
 0x223   :  { %v796_v47 = vpop.f32.mrf.mxu0 }
 0x224   :  { %v797_v48 = vadd.f32 %v5083_v34, %v796_v47 }
 0x226   :  { %v800_v51 = vsub.f32 0.0, %v797_v48 }
 0x228   :  { %v5132_v53 = vpop.eup %5131  ;;  %v803_v55 = vmul.f32 1.442695, %v800_v51 }
 0x229   :  { %v805_v58 = vadd.f32 1.0, %v5132_v53  ;;  %v5438_v53 = vmov 0  }
 0x22a   :  { %5133 = vpow2.f32 %v803_v55  ;;  %5081 = vset.pattern.permute.xlu1 %v5438_v53  ;;  %5080 = vset.pattern.permute.xlu0 %v5438_v53 }
 0x22b   :  { %v1568_v61 = vpop.f32.mrf.mxu0  ;;  %5135 = vrcp.f32 %v805_v58  ;;  %5079 = vset.pattern.permute.xlu2 %v5438_v53  ;;  %v4188_v53 = vld [vmem:[#allocation16 + $0xb0] sm:$0xf] }
 0x22c   :  { %v1569_v62 = vadd.f32 %v1568_v61, %v1555_v57 }
 0x22e   :  { %v1583_v1 = vadd.f32 %v1582_v50, %v1569_v62 }
 0x230   :  { %v5134_v0 = vpop.eup %5133  ;;  %v1597_v8 = vadd.f32 %v1596_v52, %v1583_v1 }
 0x231   :  { %v806_v59 = vadd.f32 1.0, %v5134_v0  ;;  %v5136_v4 = vpop.eup %5135 }
 0x232   :  { %v809_v10 = vmul.f32 %v5136_v4, %v795_v38  ;;  %v1611_v12 = vadd.f32 %v1610_v7, %v1597_v8  ;;  %v5088_v8 = vld [vmem:[%s5791_s14] ss:$0 sm:$0xff] }
 0x233   :  { %5137 = vrcp.f32 %v806_v59  ;;  %v1570_v6 = vpop.f32.mrf.mxu0 }
 0x234   :  { %v1571_v9 = vadd.f32 %v1570_v6, %v1557_v2  ;;  %v5641_v14 = vpack.c.bf16 %v809_v10, %v809_v10 }
 0x236   :  { %v1585_v11 = vadd.f32 %v1584_v63, %v1571_v9  ;;  %v1817_v22 = vunpack.c.l.b16 %v5641_v14 }
 0x238   :  { %v1599_v19 = vadd.f32 %v1598_v3, %v1585_v11 }
 0x239   :  { %v5138_v5 = vpop.eup %5137 }
 0x23a   :  { %v810_v15 = vmul.f32 %v5138_v5, %v797_v48  ;;  %v1613_v27 = vadd.f32 %v1612_v21, %v1599_v19  ;;  %v4156_v5 = vld [vmem:[#allocation16 + $0x70] sm:$0xf]  ;;  %v4148_v21 = vld [vmem:[#allocation16 + $0x60] sm:$0xf] }
 0x23b   :  { %v1624_v16 = vpop.f32.mrf.mxu0 }
 0x23c   :  { %v5643_v18 = vpack.c.bf16 %v810_v15, %v810_v15  ;;  %v1625_v20 = vadd.f32 %v1624_v16, %v1611_v12  ;;  %v4220_v15 = vld [vmem:[#allocation16 + $0xf0] sm:$0xf]  ;;  %v4915_v16 = vld [vmem:[#allocation16 + $0xf4] sm:$0xf0] }
 0x23e   :  { %v1818_v23 = vunpack.c.l.b16 %v5643_v18  ;;  %v1639_v24 = vadd.f32 %v1638_v13, %v1625_v20  ;;  %v4899_v13 = vld [vmem:[#allocation16 + $0x74] sm:$0xf0]  ;;  %v4221_v20 = vor.u32 %v4915_v16, %v4220_v15 }
 0x23f   :  { %v4157_v19 = vor.u32 %v4899_v13, %v4156_v5 }
 0x240   :  { %v1819_v25 = vpack.c.b16 %v1818_v23, %v1817_v22  ;;  %v1653_v26 = vadd.f32 %v1652_v17, %v1639_v24  ;;  %v4897_v22 = vld [vmem:[#allocation16 + $0x64] sm:$0xf0]  ;;  %v4212_v23 = vld [vmem:[#allocation16 + $0xe0] sm:$0xf]  ;;  %3074 = vmatpush.bf16.msra.mxu3 %v4221_v20  ;;  %v4887_v20 = vld [vmem:[#allocation16 + $0x14] sm:$0xf0] }
 0x241   :  { %v4913_v24 = vld [vmem:[#allocation16 + $0xe4] sm:$0xf0]  ;;  %3060 = vmatpush.bf16.msra.mxu2 %v4157_v19  ;;  %v4108_v19 = vld [vmem:[#allocation16 + $0x10] sm:$0xf] }
 0x242   :  { %1877 = vmatmul.bf16.vlgmr.msrb.gmra.mxu3 %v1819_v25  ;;  %v1657_v28 = vsub.f32 0.0, %v1653_v26  ;;  %v4149_v25 = vor.u32 %v4897_v22, %v4148_v21  ;;  %v4172_v21 = vld [vmem:[#allocation16 + $0x90] sm:$0xf]  ;;  %v4109_v22 = vor.u32 %v4887_v20, %v4108_v19 }
 0x243   :  { %v1626_v29 = vpop.f32.mrf.mxu0 }
 0x244   :  { %v1659_v31 = vmul.f32 1.442695, %v1657_v28  ;;  %v1627_v32 = vadd.f32 %v1626_v29, %v1613_v27  ;;  %v4140_v27 = vld [vmem:[#allocation16 + $0x50] sm:$0xf]  ;;  %v4895_v28 = vld [vmem:[#allocation16 + $0x54] sm:$0xf0] }
 0x245   :  { %3061 = vmatpush.bf16.msra.mxu2 %v4149_v25  ;;  %v4100_v25 = vld [vmem:[#allocation16] sm:$0xf] }
 0x246   :  { %5139 = vpow2.f32 %v1659_v31  ;;  %v1641_v34 = vadd.f32 %v1640_v30, %v1627_v32  ;;  %v4204_v30 = vld [vmem:[#allocation16 + $0xd0] sm:$0xf]  ;;  %v4911_v31 = vld [vmem:[#allocation16 + $0xd4] sm:$0xf0] }
 0x248   :  { %v1655_v35 = vadd.f32 %v1654_v33, %v1641_v34 }
 0x24a   :  { %v1658_v36 = vsub.f32 0.0, %v1655_v35 }
 0x24c   :  { %v5140_v37 = vpop.eup %5139  ;;  %v1661_v38 = vmul.f32 1.442695, %v1658_v36 }
 0x24d   :  { %v1663_v39 = vadd.f32 1.0, %v5140_v37  ;;  %v4205_v37 = vor.u32 %v4911_v31, %v4204_v30  ;;  %v4963_v30 = vld [vmem:[#allocation16 + $0x274] sm:$0xf0] }
 0x24e   :  { %5141 = vpow2.f32 %v1661_v38  ;;  %v4132_v38 = vld [vmem:[#allocation16 + $0x40] sm:$0xf] }
 0x24f   :  { %5143 = vrcp.f32 %v1663_v39  ;;  %v4893_v39 = vld [vmem:[#allocation16 + $0x44] sm:$0xf0] }
 0x254   :  { %v5142_v40 = vpop.eup %5141 }
 0x255   :  { %v5144_v42 = vpop.eup %5143  ;;  %v1664_v43 = vadd.f32 1.0, %v5142_v40 }
 0x256   :  { %v1667_v44 = vmul.f32 %v5144_v42, %v1653_v26  ;;  %v4213_v26 = vor.u32 %v4913_v24, %v4212_v23  ;;  %v4909_v42 = vld [vmem:[#allocation16 + $0xc4] sm:$0xf0]  ;;  %v4903_v23 = vld [vmem:[#allocation16 + $0x94] sm:$0xf0] }
 0x257   :  { %5145 = vrcp.f32 %v1664_v43  ;;  %v4173_v24 = vor.u32 %v4903_v23, %v4172_v21 }
 0x258   :  { %v1673_v45 = vmul.f32 %v5085_v41, %v1667_v44  ;;  %3075 = vmatpush.bf16.msra.mxu3 %v4213_v26  ;;  %v4133_v44 = vor.u32 %v4893_v39, %v4132_v38  ;;  %v4885_v26 = vld [vmem:[#allocation16 + $0x4] sm:$0xf0]  ;;  %v4468_v38 = vld [vmem:[#allocation16 + $0x2e0] sm:$0xf] }
 0x25a   :  { %1675 = vadd.xlane.f32.xlu1 %v1673_v45 }
 0x25c   :  { %3076 = vmatpush.bf16.msra.mxu3 %v4205_v37  ;;  %v4961_v37 = vld [vmem:[#allocation16 + $0x264] sm:$0xf0] }
 0x25d   :  { %v5146_v46 = vpop.eup %5145 }
 0x25e   :  { %v1668_v47 = vmul.f32 %v5146_v46, %v1655_v35  ;;  %v4141_v35 = vor.u32 %v4895_v28, %v4140_v27  ;;  %v4164_v27 = vld [vmem:[#allocation16 + $0x80] sm:$0xf]  ;;  %v4101_v28 = vor.u32 %v4885_v26, %v4100_v25 }
 0x260   :  { %v1674_v48 = vmul.f32 %v5085_v41, %v1668_v47  ;;  %v4196_v41 = vld [vmem:[#allocation16 + $0xc0] sm:$0xf]  ;;  %3062 = vmatpush.bf16.msra.mxu2 %v4141_v35 }
 0x262   :  { %1677 = vadd.xlane.f32.xlu1 %v1674_v48  ;;  %v4197_v48 = vor.u32 %v4909_v42, %v4196_v41  ;;  %v4396_v42 = vld [vmem:[#allocation16 + $0x250] sm:$0xf] }
 0x264   :  { %3063 = vmatpush.bf16.msra.mxu2 %v4133_v44  ;;  %3077 = vmatpush.bf16.msra.mxu3 %v4197_v48  ;;  %v4460_v44 = vld [vmem:[#allocation16 + $0x2d0] sm:$0xf]  ;;  %v4957_v48 = vld [vmem:[#allocation16 + $0x244] sm:$0xf0] }
 0x2c5   :  { %v1878_v50 = vpop.f32.mrf.mxu3 }
 0x2c6   :  { %v1879_v51 = vadd.f32 %v5086_v49, %v1878_v50  ;;  %v4891_v50 = vld [vmem:[#allocation16 + $0x34] sm:$0xf0] }
 0x2c8   :  { %v1883_v52 = vsub.f32 0.0, %v1879_v51 }
 0x2ca   :  { %v1885_v55 = vmul.f32 1.442695, %v1883_v52 }
 0x2cc   :  { %5147 = vpow2.f32 %v1885_v55  ;;  %v4907_v55 = vld [vmem:[#allocation16 + $0xb4] sm:$0xf0] }
 0x2cd   :  { %v1880_v57 = vpop.f32.mrf.mxu3  ;;  %v1676_v58 = vpop.xlane.xlu1 %1675 }
 0x2ce   :  { %v1881_v60 = vadd.f32 %v5086_v49, %v1880_v57  ;;  %v1683_v61 = vadd.f32 %v5087_v56, %v1676_v58  ;;  %v4124_v49 = vld [vmem:[#allocation16 + $0x30] sm:$0xf]  ;;  %v4971_v58 = vld [vmem:[#allocation16 + $0x2b4] sm:$0xf0] }
 0x2d0   :  { %v1884_v54 = vsub.f32 0.0, %v1881_v60  ;;  %v1685_v62 = vsub.f32 %v1683_v61, %v1683_v61 }
 0x2d2   :  { %v5148_v63 = vpop.eup %5147  ;;  %v1887_v0 = vmul.f32 1.442695, %v1884_v54  ;;  %v1687_v1 = vmul.f32 1.442695, %v1685_v62  ;;  %v4125_v54 = vor.u32 %v4891_v50, %v4124_v49  ;;  %v4452_v50 = vld [vmem:[#allocation16 + $0x2c0] sm:$0xf] }
 0x2d3   :  { %v1889_v2 = vadd.f32 1.0, %v5148_v63  ;;  %v4189_v63 = vor.u32 %v4907_v55, %v4188_v53  ;;  %v4380_v55 = vld [vmem:[#allocation16 + $0x230] sm:$0xf] }
 0x2d4   :  { %5149 = vpow2.f32 %v1887_v0  ;;  %v4116_v0 = vld [vmem:[#allocation16 + $0x20] sm:$0xf]  ;;  %3064 = vmatpush.bf16.msra.mxu2 %v4125_v54 }
 0x2d5   :  { %5151 = vrcp.f32 %v1889_v2  ;;  %v1678_v59 = vpop.xlane.xlu1 %1677  ;;  %3078 = vmatpush.bf16.msra.mxu3 %v4189_v63  ;;  %v4372_v54 = vld [vmem:[#allocation16 + $0x220] sm:$0xf] }
 0x2d6   :  { %5153 = vpow2.f32 %v1687_v1  ;;  %v1684_v3 = vadd.f32 %v5087_v56, %v1678_v59  ;;  %v4889_v1 = vld [vmem:[#allocation16 + $0x24] sm:$0xf0] }
 0x2d8   :  { %v1686_v4 = vsub.f32 %v1684_v3, %v1684_v3  ;;  %v4180_v3 = vld [vmem:[#allocation16 + $0xa0] sm:$0xf] }
 0x2da   :  { %v5150_v6 = vpop.eup %5149  ;;  %v1689_v7 = vmul.f32 1.442695, %v1686_v4  ;;  %v4905_v4 = vld [vmem:[#allocation16 + $0xa4] sm:$0xf0] }
 0x2db   :  { %v5152_v9 = vpop.eup %5151  ;;  %v1890_v10 = vadd.f32 1.0, %v5150_v6 }
 0x2dc   :  { %v5656_v11 = vpop.eup %5153  ;;  %5155 = vpow2.f32 %v1689_v7  ;;  %v1893_v12 = vmul.f32 %v5152_v9, %v1879_v51 }
 0x2dd   :  { %5157 = vrcp.f32 %v1890_v10  ;;  %vm1698_vm1 = vweird.f32 %v5656_v11  ;;  %v1704_v47 = vand.u32 2147483648, %v5656_v11  ;;  %v1702_v52 = vand.u32 2147483647, %v5656_v11 }
 0x2de   :  { %v1899_v17 = vmul.f32 %v5088_v8, %v1893_v12  ;;  %5159 = vrcp.f32 %v5656_v11  ;;  %v4181_v10 = vor.u32 %v4905_v4, %v4180_v3  ;;  %v4364_v3 = vld [vmem:[#allocation16 + $0x210] sm:$0xf]  ;;  %v4951_v4 = vld [vmem:[#allocation16 + $0x214] sm:$0xf0] }
 0x2df   :  { %v1705_v62 = vor.u32 1.1754944e-38, %v1704_v47  ;;  %vm1703_vm6 = vcmp.eq.f32.partialorder %v1702_v52, 8.507059e+37  ;;  %v4388_v47 = vld [vmem:[#allocation16 + $0x240] sm:$0xf] }
 0x2e0   :  { %1901 = vadd.xlane.f32.xlu0 %v1899_v17  ;;  %3079 = vmatpush.bf16.msra.mxu3 %v4181_v10  ;;  %v4389_v52 = vor.u32 %v4957_v48, %v4388_v47  ;;  %v4949_v10 = vld [vmem:[#allocation16 + $0x204] sm:$0xf0] }
 0x2e2   :  { %v5659_v29 = vpop.eup %5155 }
 0x2e3   :  { %v5158_v32 = vpop.eup %5157  ;;  %5161 = vrcp.f32 %v5659_v29  ;;  %vm1713_vm3 = vweird.f32 %v5659_v29  ;;  %v1719_v56 = vand.u32 2147483648, %v5659_v29  ;;  %v1717_v61 = vand.u32 2147483647, %v5659_v29 }
 0x2e4   :  { %v5160_v33 = vpop.eup %5159  ;;  %v1894_v34 = vmul.f32 %v5158_v32, %v1881_v60  ;;  %3080 = vmatpush.bf16.msra.mxu3 %v4173_v24 }
 0x2e5   :  { %v1694_v36 = vmul.f32 %v5160_v33, %v5656_v11  ;;  %vm1699_vm2 = vweird.f32 %v5160_v33  ;;  %v1720_v6 = vor.u32 1.1754944e-38, %v1719_v56  ;;  %vm1718_vm8 = vcmp.eq.f32.partialorder %v1717_v61, 8.507059e+37  ;;  %v4955_v56 = vld [vmem:[#allocation16 + $0x234] sm:$0xf0] }
 0x2e6   :  { %v1900_v40 = vmul.f32 %v5088_v8, %v1894_v34  ;;  %vm5672_vm4 = vmor %vm1698_vm1, %vm1699_vm2  ;;  %v4117_v8 = vor.u32 %v4889_v1, %v4116_v0  ;;  %v4979_v34 = vld [vmem:[#allocation16 + $0x2f4] sm:$0xf0]  ;;  %v4436_v0 = vld [vmem:[#allocation16 + $0x2a0] sm:$0xf] }
 0x2e7   :  { %v1695_v43 = vsub.f32 1.0, %v1694_v36  ;;  %v4404_v36 = vld [vmem:[#allocation16 + $0x260] sm:$0xf]  ;;  %v4969_v1 = vld [vmem:[#allocation16 + $0x2a4] sm:$0xf0] }
 0x2e8   :  { %1903 = vadd.xlane.f32.xlu0 %v1900_v40  ;;  %3065 = vmatpush.bf16.msra.mxu2 %v4117_v8  ;;  %v4405_v39 = vor.u32 %v4961_v37, %v4404_v36  ;;  %v4977_v40 = vld [vmem:[#allocation16 + $0x2e4] sm:$0xf0]  ;;  %v4967_v8 = vld [vmem:[#allocation16 + $0x294] sm:$0xf0] }
 0x2e9   :  { %v5162_v45 = vpop.eup %5161  ;;  %v1696_v46 = vmul.f32 %v5160_v33, %v1695_v43  ;;  %v4469_v41 = vor.u32 %v4977_v40, %v4468_v38  ;;  %v4959_v43 = vld [vmem:[#allocation16 + $0x254] sm:$0xf0] }
 0x2ea   :  { %v1709_v51 = vmul.f32 %v5162_v45, %v5659_v29  ;;  %vm1714_vm5 = vweird.f32 %v5162_v45 }
 0x2eb   :  { %v1697_v57 = vadd.f32 %v5160_v33, %v1696_v46  ;;  %vm1715_vm7 = vmor %vm1713_vm3, %vm1714_vm5  ;;  %v4975_v46 = vld [vmem:[#allocation16 + $0x2d4] sm:$0xf0]  ;;  %vm3434_vm3 = vcmask 7168  }
 0x2ec   :  { %v1710_v60 = vsub.f32 1.0, %v1709_v51  ;;  %3066 = vmatpush.bf16.msra.mxu2 %v4109_v22  ;;  %v4461_v49 = vor.u32 %v4975_v46, %v4460_v44  ;;  %v4973_v51 = vld [vmem:[#allocation16 + $0x2c4] sm:$0xf0] }
 0x2ed   :  { %v1701_v59 = vsel %vm5672_vm4, %v5160_v33, %v1697_v57  ;;  %v4476_v33 = vld [vmem:[#allocation16 + $0x2f0] sm:$0xf]  ;;  %v4453_v53 = vor.u32 %v4973_v51, %v4452_v50  ;;  %v5027_v51 = vld [vmem:[#allocation16 + $0x474] sm:$0xf0] }
 0x2ee   :  { %v1711_v2 = vmul.f32 %v5162_v45, %v1710_v60  ;;  %v1706_v9 = vsel %vm1703_vm6, %v1705_v62, %v1701_v59  ;;  %v4477_v35 = vor.u32 %v4979_v34, %v4476_v33  ;;  %v4444_v57 = vld [vmem:[#allocation16 + $0x2b0] sm:$0xf]  ;;  %v4381_v60 = vor.u32 %v4955_v56, %v4380_v55  ;;  %v4953_v62 = vld [vmem:[#allocation16 + $0x224] sm:$0xf0]  ;;  %v5089_v59 = vld [vmem:[#allocation3] ss:$0 sm:$0xff] }
 0x2ef   :  { %v1707_v15 = vmul.f32 %v5656_v11, %v1706_v9  ;;  %v4412_v11 = vld [vmem:[#allocation16 + $0x270] sm:$0xf]  ;;  %v4445_v61 = vor.u32 %v4971_v58, %v4444_v57  ;;  %v4373_v63 = vor.u32 %v4953_v62, %v4372_v54  ;;  %v4356_v9 = vld [vmem:[#allocation16 + $0x200] sm:$0xf]  ;;  %v818_v34 = vld [vmem:[#allocation7 + $0x28] sm:$0xff] }
 0x2f0   :  { %v1712_v7 = vadd.f32 %v5162_v45, %v1711_v2  ;;  %v4413_v32 = vor.u32 %v4963_v30, %v4412_v11  ;;  %3067 = vmatpush.bf16.msra.mxu2 %v4101_v28  ;;  %v4437_v2 = vor.u32 %v4969_v1, %v4436_v0  ;;  %v4668_v50 = vld [vmem:[#allocation16 + $0x470] sm:$0xf]  ;;  %v5043_v55 = vld [vmem:[#allocation16 + $0x4f4] sm:$0xf0] }
 0x2f1   :  { %v1723_v17 = vpack.c.bf16 %v1707_v15, %v1707_v15  ;;  %v4965_v15 = vld [vmem:[#allocation16 + $0x284] sm:$0xf0]  ;;  %v4669_v62 = vor.u32 %v5027_v51, %v4668_v50  ;;  %v4628_v50 = vld [vmem:[#allocation16 + $0x420] sm:$0xf] }
 0x2f2   :  { %v1716_v12 = vsel %vm1715_vm7, %v5162_v45, %v1712_v7  ;;  %v4397_v45 = vor.u32 %v4959_v43, %v4396_v42  ;;  %v4365_v7 = vor.u32 %v4951_v4, %v4364_v3  ;;  %v1754_v42 = vunpack.c.h.bf16 %v818_v34  ;;  %v4660_v4 = vld [vmem:[#allocation16 + $0x460] sm:$0xf] }
 0x2f3   :  { %v1721_v5 = vsel %vm1718_vm8, %v1720_v6, %v1716_v12  ;;  %v4428_v6 = vld [vmem:[#allocation16 + $0x290] sm:$0xf] }
 0x2f4   :  { %v1722_v13 = vmul.f32 %v5659_v29, %v1721_v5  ;;  %v4901_v29 = vld [vmem:[#allocation16 + $0x84] sm:$0xf0]  ;;  %3116 = vmatpush.bf16.msrb.mxu2 %v4413_v32  ;;  %v4429_v5 = vor.u32 %v4967_v8, %v4428_v6 }
 0x2f5   :  { %v4165_v31 = vor.u32 %v4901_v29, %v4164_v27  ;;  %v5439_v27 = vmov 839922192  }
 0x2f6   :  { %v1724_v16 = vpack.c.bf16 %v1722_v13, %v1722_v13  ;;  %v4420_v13 = vld [vmem:[#allocation16 + $0x280] sm:$0xf]  ;;  %v1731_v28 = vunpack.c.l.s4 %v5439_v27 }
 0x2f7   :  { %3081 = vmatpush.bf16.msra.mxu3 %v4165_v31  ;;  %v4421_v20 = vor.u32 %v4965_v15, %v4420_v13 }
 0x2f8   :  { %1736 = vperm.xlu1 %5081, %v1724_v16   ;;  %3117 = vmatpush.bf16.msrb.mxu2 %v4405_v39  ;;  %v5683_v11 = vunpack.c.0.s8 %v1731_v28  ;;  %v813_v39 = vld [vmem:[#allocation7] sm:$0xff] }
 0x2f9   :  { %v1743_v48 = vunpack.c.l.bf16 %v813_v39 }
 0x2fb   :  { %3130 = vmatpush.bf16.msrb.mxu3 %v4477_v35 }
 0x2fc   :  { %1727 = vperm.xlu0 %5080, %v1723_v17   ;;  %3118 = vmatpush.bf16.msrb.mxu2 %v4397_v45  ;;  %v4357_v17 = vor.u32 %v4949_v10, %v4356_v9  ;;  %v5025_v10 = vld [vmem:[#allocation16 + $0x464] sm:$0xf0] }
 0x2ff   :  { %3131 = vmatpush.bf16.msrb.mxu3 %v4469_v41  ;;  %v1753_v41 = vunpack.c.l.bf16 %v818_v34 }
 0x300   :  { %3119 = vmatpush.bf16.msrb.mxu2 %v4389_v52 }
 0x303   :  { %3132 = vmatpush.bf16.msrb.mxu3 %v4461_v49  ;;  %v1744_v49 = vunpack.c.h.bf16 %v813_v39  ;;  %v5037_v39 = vld [vmem:[#allocation16 + $0x4c4] sm:$0xf0] }
 0x304   :  { %3120 = vmatpush.bf16.msrb.mxu2 %v4381_v60 }
 0x307   :  { %3133 = vmatpush.bf16.msrb.mxu3 %v4453_v53  ;;  %v4732_v53 = vld [vmem:[#allocation16 + $0x4f0] sm:$0xf] }
 0x308   :  { %3121 = vmatpush.bf16.msrb.mxu2 %v4373_v63 }
 0x30b   :  { %3134 = vmatpush.bf16.msrb.mxu3 %v4445_v61 }
 0x30c   :  { %3122 = vmatpush.bf16.msrb.mxu2 %v4365_v7 }
 0x30f   :  { %3135 = vmatpush.bf16.msrb.mxu3 %v4437_v2  ;;  %v4733_v2 = vor.u32 %v5043_v55, %v4732_v53 }
 0x310   :  { %3123 = vmatpush.bf16.msrb.mxu2 %v4357_v17 }
 0x313   :  { %3136 = vmatpush.bf16.msrb.mxu3 %v4429_v5  ;;  %v5041_v5 = vld [vmem:[#allocation16 + $0x4e4] sm:$0xf0] }
 0x317   :  { %3137 = vmatpush.bf16.msrb.mxu3 %v4421_v20  ;;  %v4652_v20 = vld [vmem:[#allocation16 + $0x450] sm:$0xf] }
 0x353   :  { %v1902_v12 = vpop.xlane.xlu0 %1901 }
 0x354   :  { %v1909_v16 = vadd.f32 %v5089_v59, %v1902_v12  ;;  %v4724_v12 = vld [vmem:[#allocation16 + $0x4e0] sm:$0xf] }
 0x355   :  { %v4725_v17 = vor.u32 %v5041_v5, %v4724_v12  ;;  %v822_v12 = vld [vmem:[#allocation7 + $0x48] sm:$0xff]  ;;  %v4084_v5 = vld [vmem:[#allocation18 + $0x60] sm:$0xf] }
 0x356   :  { %v1911_v19 = vsub.f32 %v1909_v16, %v1909_v16  ;;  %v4661_v16 = vor.u32 %v5025_v10, %v4660_v4  ;;  %v5031_v10 = vld [vmem:[#allocation16 + $0x494] sm:$0xf0] }
 0x358   :  { %v1913_v21 = vmul.f32 1.442695, %v1911_v19 }
 0x35a   :  { %5163 = vpow2.f32 %v1913_v21  ;;  %v815_v21 = vld [vmem:[#allocation7 + $0x10] sm:$0xff] }
 0x35b   :  { %v1904_v22 = vpop.xlane.xlu0 %1903  ;;  %v1747_v28 = vunpack.c.l.bf16 %v815_v21 }
 0x35c   :  { %v1910_v23 = vadd.f32 %v5089_v59, %v1904_v22  ;;  %v820_v22 = vld [vmem:[#allocation7 + $0x38] sm:$0xff] }
 0x35e   :  { %v1912_v24 = vsub.f32 %v1910_v23, %v1910_v23 }
 0x360   :  { %v5164_v25 = vpop.eup %5163  ;;  %v1915_v26 = vmul.f32 1.442695, %v1912_v24  ;;  %v5023_v24 = vld [vmem:[#allocation16 + $0x454] sm:$0xf0] }
 0x361   :  { %5165 = vrcp.f32 %v5164_v25  ;;  %v1930_v36 = vand.u32 2147483648, %v5164_v25  ;;  %v1928_v38 = vand.u32 2147483647, %v5164_v25  ;;  %vm1924_vm10 = vweird.f32 %v5164_v25 }
 0x362   :  { %5167 = vpow2.f32 %v1915_v26  ;;  %v5039_v26 = vld [vmem:[#allocation16 + $0x4d4] sm:$0xf0]  ;;  %v4653_v34 = vor.u32 %v5023_v24, %v4652_v20  ;;  %v4612_v20 = vld [vmem:[#allocation16 + $0x400] sm:$0xf] }
 0x363   :  { %v1931_v47 = vor.u32 1.1754944e-38, %v1930_v36  ;;  %vm1929_vm12 = vcmp.eq.f32.partialorder %v1928_v38, 8.507059e+37  ;;  %v4644_v36 = vld [vmem:[#allocation16 + $0x440] sm:$0xf] }
 0x364   :  { %v4708_v38 = vld [vmem:[#allocation16 + $0x4c0] sm:$0xf] }
 0x367   :  { %v5166_v29 = vpop.eup %5165 }
 0x368   :  { %v5685_v30 = vpop.eup %5167  ;;  %v1920_v31 = vmul.f32 %v5166_v29, %v5164_v25  ;;  %vm1925_vm9 = vweird.f32 %v5166_v29 }
 0x369   :  { %5169 = vrcp.f32 %v5685_v30  ;;  %vm1926_vm11 = vmor %vm1924_vm10, %vm1925_vm9  ;;  %v1945_v59 = vand.u32 2147483648, %v5685_v30  ;;  %v1943_v7 = vand.u32 2147483647, %v5685_v30  ;;  %vm1939_vm14 = vweird.f32 %v5685_v30 }
 0x36a   :  { %v1737_v32 = vpop.permute.xlu1 %1736  ;;  %v1921_v33 = vsub.f32 1.0, %v1920_v31  ;;  %v1748_v31 = vunpack.c.h.bf16 %v815_v21  ;;  %v5013_v21 = vld [vmem:[#allocation16 + $0x404] sm:$0xf0] }
 0x36b   :  { %v1742_v35 = vperm.slane %v1737_v32, %v5683_v11  ;;  %v1946_v15 = vor.u32 1.1754944e-38, %v1945_v59  ;;  %vm1944_vm0 = vcmp.eq.f32.partialorder %v1943_v7, 8.507059e+37  ;;  %v1758_v32 = vunpack.c.h.bf16 %v820_v22  ;;  %v817_v59 = vld [vmem:[#allocation7 + $0x20] sm:$0xff] }
 0x36c   :  { %v1922_v37 = vmul.f32 %v5166_v29, %v1921_v33  ;;  %v4684_v7 = vld [vmem:[#allocation16 + $0x490] sm:$0xf]  ;;  %v1752_v24 = vunpack.c.h.bf16 %v817_v59 }
 0x36d   :  { %v5689_v40 = vunpack.c.l.bf16 %v1742_v35 }
 0x36e   :  { %v1728_v43 = vpop.permute.xlu0 %1727  ;;  %v1923_v44 = vadd.f32 %v5166_v29, %v1922_v37  ;;  %v5021_v37 = vld [vmem:[#allocation16 + $0x444] sm:$0xf0] }
 0x36f   :  { %v5170_v45 = vpop.eup %5169  ;;  %v1733_v46 = vperm.slane %v1728_v43, %v5683_v11  ;;  %v1775_v60 = vmul.f32 %v5689_v40, %v1753_v41  ;;  %v1776_v61 = vmul.f32 %v5689_v40, %v1754_v42  ;;  %v1780_v43 = vmul.f32 %v5689_v40, %v1758_v32  ;;  %v4286_v32 = vld [vmem:[#allocation16 + $0x178] sm:$0xf0] }
 0x370   :  { %v1927_v52 = vsel %vm1926_vm11, %v5166_v29, %v1923_v44  ;;  %v1935_v56 = vmul.f32 %v5170_v45, %v5685_v30  ;;  %vm1940_vm13 = vweird.f32 %v5170_v45  ;;  %v1757_v29 = vunpack.c.l.bf16 %v820_v22  ;;  %v4676_v22 = vld [vmem:[#allocation16 + $0x480] sm:$0xf] }
 0x371   :  { %v5693_v57 = vunpack.c.l.bf16 %v1733_v46  ;;  %v1932_v58 = vsel %vm1929_vm12, %v1931_v47, %v1927_v52  ;;  %vm1941_vm15 = vmor %vm1939_vm14, %vm1940_vm13  ;;  %v4645_v44 = vor.u32 %v5021_v37, %v4644_v36  ;;  %v4636_v46 = vld [vmem:[#allocation16 + $0x430] sm:$0xf]  ;;  %v5019_v47 = vld [vmem:[#allocation16 + $0x434] sm:$0xf0] }
 0x372   :  { %v1933_v54 = vmul.f32 %v5164_v25, %v1932_v58  ;;  %v1936_v63 = vsub.f32 1.0, %v1935_v56  ;;  %v4716_v25 = vld [vmem:[#allocation16 + $0x4d0] sm:$0xf]  ;;  %v1779_v42 = vmul.f32 %v5689_v40, %v1757_v29  ;;  %v4637_v53 = vor.u32 %v5019_v47, %v4636_v46  ;;  %v5017_v56 = vld [vmem:[#allocation16 + $0x424] sm:$0xf0] }
 0x373   :  { %v1765_v0 = vmul.f32 %v5693_v57, %v1743_v48  ;;  %v1766_v1 = vmul.f32 %v5693_v57, %v1744_v49  ;;  %v4717_v35 = vor.u32 %v5039_v26, %v4716_v25  ;;  %v1769_v41 = vmul.f32 %v5693_v57, %v1747_v28  ;;  %v4700_v48 = vld [vmem:[#allocation16 + $0x4b0] sm:$0xf]  ;;  %v5035_v49 = vld [vmem:[#allocation16 + $0x4b4] sm:$0xf0]  ;;  %v4692_v58 = vld [vmem:[#allocation16 + $0x4a0] sm:$0xf] }
 0x374   :  { %v1949_v3 = vpack.c.bf16 %v1933_v54, %v1933_v54  ;;  %v1937_v6 = vmul.f32 %v5170_v45, %v1936_v63  ;;  %v4701_v55 = vor.u32 %v5035_v49, %v4700_v48  ;;  %v5059_v54 = vld [vmem:[#allocation18 + $0x74] sm:$0xf0]  ;;  %v4629_v4 = vor.u32 %v5017_v56, %v4628_v50  ;;  %v5029_v29 = vld [vmem:[#allocation16 + $0x484] sm:$0xf0]  ;;  %v4946_v36 = vld [vmem:[#allocation16 + $0x1f4] sm:$0xf] }
 0x375   :  { %v5701_v8 = vpack.c.bf16 %v1775_v60, %v1765_v0  ;;  %v5703_v9 = vpack.c.bf16 %v1776_v61, %v1766_v1  ;;  %v5713_v51 = vpack.c.bf16 %v1779_v42, %v1769_v41  ;;  %v5033_v60 = vld [vmem:[#allocation16 + $0x4a4] sm:$0xf0]  ;;  %v4092_v61 = vld [vmem:[#allocation18 + $0x70] sm:$0xf]  ;;  %v4094_v0 = vld [vmem:[#allocation18 + $0x78] sm:$0xf0]  ;;  %v1762_v25 = vunpack.c.h.bf16 %v822_v12 }
 0x376   :  { %1953 = vperm.xlu2 %5079, %v1949_v3   ;;  %v1938_v13 = vadd.f32 %v5170_v45, %v1937_v6  ;;  %v4093_v63 = vor.u32 %v5059_v54, %v4092_v61  ;;  %v4620_v1 = vld [vmem:[#allocation16 + $0x410] sm:$0xf]  ;;  %v4693_v6 = vor.u32 %v5033_v60, %v4692_v58  ;;  %v4685_v28 = vor.u32 %v5031_v10, %v4684_v7  ;;  %v4350_v37 = vld [vmem:[#allocation16 + $0x1f8] sm:$0xf0]  ;;  %v4928_v49 = vld [vmem:[#allocation16 + $0x164] sm:$0xf] }
 0x377   :  { %3068 = vmatmul.bf16.vlgmr.msra.gmra.mxu2 %v5701_v8  ;;  %3082 = vmatmul.bf16.vlgmr.msra.gmra.mxu3 %v5703_v9  ;;  %v4078_v41 = vld [vmem:[#allocation18 + $0x58] sm:$0xf0]  ;;  %v4677_v46 = vor.u32 %v5029_v29, %v4676_v22  ;;  %v4353_v48 = vor.u32 %v4946_v36, %v4350_v37  ;;  %v4278_v50 = vld [vmem:[#allocation16 + $0x168] sm:$0xf0]  ;;  %v4068_v56 = vld [vmem:[#allocation18 + $0x40] sm:$0xf] }
 0x378   :  { %3172 = vmatpush.bf16.msra.mxu2 %v4669_v62  ;;  %3186 = vmatpush.bf16.msra.mxu3 %v4733_v2  ;;  %v1942_v19 = vsel %vm1941_vm15, %v5170_v45, %v1938_v13  ;;  %v4709_v45 = vor.u32 %v5037_v39, %v4708_v38  ;;  %v5058_v62 = vld [vmem:[#allocation18 + $0x74] sm:$0xf]  ;;  %v5015_v2 = vld [vmem:[#allocation16 + $0x414] sm:$0xf0]  ;;  %v5057_v13 = vld [vmem:[#allocation18 + $0x64] sm:$0xf0] }
 0x379   :  { %v1947_v23 = vsel %vm1944_vm0, %v1946_v15, %v1942_v19  ;;  %v4097_v3 = vor.u32 %v5058_v62, %v4094_v0  ;;  %2232 = vmatpush.bf16.msra.mxu0 %v4093_v63  ;;  %v5056_v15 = vld [vmem:[#allocation18 + $0x64] sm:$0xf]  ;;  %v4086_v19 = vld [vmem:[#allocation18 + $0x68] sm:$0xf0]  ;;  %v5053_v58 = vld [vmem:[#allocation18 + $0x44] sm:$0xf0] }
 0x37a   :  { %v1948_v27 = vmul.f32 %v5685_v30, %v1947_v23  ;;  %v1770_v30 = vmul.f32 %v5693_v57, %v1748_v31  ;;  %v1761_v23 = vunpack.c.l.bf16 %v822_v12  ;;  %v4089_v26 = vor.u32 %v5056_v15, %v4086_v19  ;;  %v4930_v31 = vld [vmem:[#allocation16 + $0x174] sm:$0xf]  ;;  %v5052_v62 = vld [vmem:[#allocation18 + $0x44] sm:$0xf]  ;;  %v4070_v63 = vld [vmem:[#allocation18 + $0x48] sm:$0xf0] }
 0x37b   :  { %2246 = vmatpush.bf16.msra.mxu1 %v4097_v3  ;;  %v4289_v47 = vor.u32 %v4930_v31, %v4286_v32  ;;  %v4069_v54 = vor.u32 %v5053_v58, %v4068_v56  ;;  %v816_v0 = vld [vmem:[#allocation7 + $0x18] sm:$0xff]  ;;  %v4270_v10 = vld [vmem:[#allocation16 + $0x158] sm:$0xf0]  ;;  %v4942_v12 = vld [vmem:[#allocation16 + $0x1d4] sm:$0xf] }
 0x37c   :  { %3173 = vmatpush.bf16.msra.mxu2 %v4661_v16  ;;  %3187 = vmatpush.bf16.msra.mxu3 %v4725_v17  ;;  %v1950_v33 = vpack.c.bf16 %v1948_v27, %v1948_v27  ;;  %v5715_v52 = vpack.c.bf16 %v1780_v43, %v1770_v30  ;;  %v1751_v16 = vunpack.c.l.bf16 %v817_v59  ;;  %v4085_v17 = vor.u32 %v5057_v13, %v4084_v5  ;;  %v821_v59 = vld [vmem:[#allocation7 + $0x40] sm:$0xff]  ;;  %v4334_v5 = vld [vmem:[#allocation16 + $0x1d8] sm:$0xf0]  ;;  %v4262_v31 = vld [vmem:[#allocation16 + $0x148] sm:$0xf0] }
 0x37d   :  { %v4621_v27 = vor.u32 %v5015_v2, %v4620_v1  ;;  %v1783_v42 = vmul.f32 %v5689_v40, %v1761_v23  ;;  %v1774_v30 = vmul.f32 %v5693_v57, %v1752_v24  ;;  %v1784_v43 = vmul.f32 %v5689_v40, %v1762_v25  ;;  %v4926_v1 = vld [vmem:[#allocation16 + $0x154] sm:$0xf]  ;;  %v4062_v23 = vld [vmem:[#allocation18 + $0x38] sm:$0xf0]  ;;  %v4940_v32 = vld [vmem:[#allocation16 + $0x1c4] sm:$0xf] }
 0x37e   :  { %1962 = vperm.xlu2 %5079, %v1950_v33   ;;  %2233 = vmatpush.bf16.msra.mxu0 %v4085_v17  ;;  %v4076_v33 = vld [vmem:[#allocation18 + $0x50] sm:$0xf]  ;;  %v1773_v38 = vmul.f32 %v5693_v57, %v1751_v16  ;;  %v4073_v2 = vor.u32 %v5052_v62, %v4070_v63  ;;  %v1749_v3 = vunpack.c.l.bf16 %v816_v0  ;;  %v1759_v13 = vunpack.c.l.bf16 %v821_v59  ;;  %v5051_v17 = vld [vmem:[#allocation18 + $0x34] sm:$0xf0]  ;;  %v5050_v19 = vld [vmem:[#allocation18 + $0x34] sm:$0xf] }
 0x37f   :  { %2247 = vmatpush.bf16.msra.mxu1 %v4089_v26  ;;  %v5725_v61 = vpack.c.bf16 %v1784_v43, %v1774_v30  ;;  %v1760_v15 = vunpack.c.h.bf16 %v821_v59  ;;  %v4060_v16 = vld [vmem:[#allocation18 + $0x30] sm:$0xf]  ;;  %v4273_v26 = vor.u32 %v4926_v1, %v4270_v10  ;;  %v4337_v29 = vor.u32 %v4942_v12, %v4334_v5  ;;  %v4052_v36 = vld [vmem:[#allocation18 + $0x20] sm:$0xf]  ;;  %v5049_v37 = vld [vmem:[#allocation18 + $0x24] sm:$0xf0] }
 0x380   :  { %3174 = vmatpush.bf16.msra.mxu2 %v4653_v34  ;;  %3188 = vmatpush.bf16.msra.mxu3 %v4717_v35  ;;  %v5055_v34 = vld [vmem:[#allocation18 + $0x54] sm:$0xf0]  ;;  %v5054_v35 = vld [vmem:[#allocation18 + $0x54] sm:$0xf]  ;;  %v5723_v60 = vpack.c.bf16 %v1783_v42, %v1773_v38  ;;  %v4061_v22 = vor.u32 %v5051_v17, %v4060_v16  ;;  %v1781_v24 = vmul.f32 %v5689_v40, %v1759_v13  ;;  %v5048_v38 = vld [vmem:[#allocation18 + $0x24] sm:$0xf] }
 0x381   :  { %v4077_v39 = vor.u32 %v5055_v34, %v4076_v33  ;;  %v1782_v25 = vmul.f32 %v5689_v40, %v1760_v15  ;;  %v4326_v33 = vld [vmem:[#allocation16 + $0x1c8] sm:$0xf0]  ;;  %v4922_v42 = vld [vmem:[#allocation16 + $0x134] sm:$0xf]  ;;  %v4920_v56 = vld [vmem:[#allocation16 + $0x124] sm:$0xf] }
 0x382   :  { %v4246_v63 = vld [vmem:[#allocation16 + $0x128] sm:$0xf0]  ;;  %v5045_v59 = vld [vmem:[#allocation18 + $0x4] sm:$0xf0]  ;;  %v4931_v10 = vld [vmem:[#allocation16 + $0x174] sm:$0xf0] }
 0x383   :  { %2234 = vmatpush.bf16.msra.mxu0 %v4077_v39  ;;  %v4053_v39 = vor.u32 %v5049_v37, %v4052_v36  ;;  %v4310_v1 = vld [vmem:[#allocation16 + $0x1a8] sm:$0xf0]  ;;  %v4918_v12 = vld [vmem:[#allocation16 + $0x114] sm:$0xf]  ;;  %v4238_v5 = vld [vmem:[#allocation16 + $0x118] sm:$0xf0] }
 0x384   :  { %3175 = vmatpush.bf16.msra.mxu2 %v4645_v44  ;;  %3189 = vmatpush.bf16.msra.mxu3 %v4709_v45  ;;  %v4081_v44 = vor.u32 %v5054_v35, %v4078_v41  ;;  %v4613_v45 = vor.u32 %v5013_v21, %v4612_v20  ;;  %v1771_v20 = vmul.f32 %v5693_v57, %v1749_v3  ;;  %v4054_v41 = vld [vmem:[#allocation18 + $0x28] sm:$0xf0]  ;;  %v5044_v3 = vld [vmem:[#allocation18 + $0x4] sm:$0xf]  ;;  %v814_v13 = vld [vmem:[#allocation7 + $0x8] sm:$0xff] }
 0x385   :  { %v4057_v30 = vor.u32 %v5048_v38, %v4054_v41  ;;  %v4348_v17 = vld [vmem:[#allocation16 + $0x1f0] sm:$0xf]  ;;  %v4230_v36 = vld [vmem:[#allocation16 + $0x108] sm:$0xf0]  ;;  %v4932_v37 = vld [vmem:[#allocation16 + $0x184] sm:$0xf] }
 0x386   :  { %2248 = vmatpush.bf16.msra.mxu1 %v4081_v44  ;;  %v5733_v34 = vpack.c.bf16 %v1781_v24, %v1771_v20  ;;  %v4329_v44 = vor.u32 %v4940_v32, %v4326_v33  ;;  %v4249_v20 = vor.u32 %v4920_v56, %v4246_v63  ;;  %v819_v24 = vld [vmem:[#allocation7 + $0x30] sm:$0xff]  ;;  %v4945_v32 = vld [vmem:[#allocation16 + $0x1e4] sm:$0xf0] }
 0x387   :  { %3124 = vmatmul.bf16.vlgmr.msrb.gmra.mxu2 %v5713_v51  ;;  %3138 = vmatmul.bf16.vlgmr.msrb.gmra.mxu3 %v5715_v52  ;;  %v4916_v33 = vld [vmem:[#allocation16 + $0x104] sm:$0xf]  ;;  %v1755_v38 = vunpack.c.l.bf16 %v819_v24  ;;  %v1756_v41 = vunpack.c.h.bf16 %v819_v24  ;;  %v4590_v24 = vld [vmem:[#allocation16 + $0x3d8] sm:$0xf0] }
 0x388   :  { %3176 = vmatpush.bf16.msra.mxu2 %v4637_v53  ;;  %3190 = vmatpush.bf16.msra.mxu3 %v4701_v55  ;;  %v4944_v53 = vld [vmem:[#allocation16 + $0x1e4] sm:$0xf]  ;;  %v4342_v55 = vld [vmem:[#allocation16 + $0x1e8] sm:$0xf0] }
 0x389   :  { %v4345_v7 = vor.u32 %v4944_v53, %v4342_v55  ;;  %2235 = vmatpush.bf16.msra.mxu0 %v4069_v54  ;;  %v4046_v55 = vld [vmem:[#allocation18 + $0x18] sm:$0xf0]  ;;  %v1778_v63 = vmul.f32 %v5689_v40, %v1756_v41  ;;  %v4937_v41 = vld [vmem:[#allocation16 + $0x1a4] sm:$0xf0] }
 0x38a   :  { %2249 = vmatpush.bf16.msra.mxu1 %v4073_v2  ;;  %v4036_v2 = vld [vmem:[#allocation18] sm:$0xf] }
 0x38c   :  { %3177 = vmatpush.bf16.msra.mxu2 %v4629_v4  ;;  %3191 = vmatpush.bf16.msra.mxu3 %v4693_v6  ;;  %v1750_v4 = vunpack.c.h.bf16 %v816_v0  ;;  %v4281_v6 = vor.u32 %v4928_v49, %v4278_v50  ;;  %v5047_v49 = vld [vmem:[#allocation18 + $0x14] sm:$0xf0]  ;;  %v5046_v50 = vld [vmem:[#allocation18 + $0x14] sm:$0xf]  ;;  %v4936_v0 = vld [vmem:[#allocation16 + $0x1a4] sm:$0xf] }
 0x38d   :  { %2236 = vmatpush.bf16.msra.mxu0 %v4061_v22  ;;  %v4049_v58 = vor.u32 %v5046_v50, %v4046_v55  ;;  %v4934_v22 = vld [vmem:[#allocation16 + $0x194] sm:$0xf] }
 0x38e   :  { %v1772_v21 = vmul.f32 %v5693_v57, %v1750_v4  ;;  %v4037_v4 = vor.u32 %v5045_v59, %v4036_v2  ;;  %v5010_v50 = vld [vmem:[#allocation16 + $0x3f4] sm:$0xf]  ;;  %v4992_v59 = vld [vmem:[#allocation16 + $0x364] sm:$0xf] }
 0x390   :  { %3178 = vmatpush.bf16.msra.mxu2 %v4621_v27  ;;  %3192 = vmatpush.bf16.msra.mxu3 %v4685_v28  ;;  %v4924_v27 = vld [vmem:[#allocation16 + $0x144] sm:$0xf]  ;;  %v4065_v28 = vor.u32 %v5050_v19, %v4062_v23  ;;  %v5735_v35 = vpack.c.bf16 %v1782_v25, %v1772_v21  ;;  %v4947_v19 = vld [vmem:[#allocation16 + $0x1f4] sm:$0xf0]  ;;  %v4313_v21 = vor.u32 %v4936_v0, %v4310_v1  ;;  %v4302_v23 = vld [vmem:[#allocation16 + $0x198] sm:$0xf0] }
 0x391   :  { %v4265_v43 = vor.u32 %v4924_v27, %v4262_v31  ;;  %2237 = vmatpush.bf16.msra.mxu0 %v4053_v39  ;;  %v4349_v25 = vor.u32 %v4947_v19, %v4348_v17  ;;  %v4929_v27 = vld [vmem:[#allocation16 + $0x164] sm:$0xf0]  ;;  %v1746_v39 = vunpack.c.h.bf16 %v814_v13  ;;  %v4233_v1 = vor.u32 %v4916_v33, %v4230_v36 }
 0x392   :  { %2250 = vmatpush.bf16.msra.mxu1 %v4065_v28  ;;  %v4340_v28 = vld [vmem:[#allocation16 + $0x1e0] sm:$0xf] }
 0x394   :  { %3179 = vmatpush.bf16.msra.mxu2 %v4613_v45  ;;  %3193 = vmatpush.bf16.msra.mxu3 %v4677_v46  ;;  %v4254_v45 = vld [vmem:[#allocation16 + $0x138] sm:$0xf0]  ;;  %v4938_v46 = vld [vmem:[#allocation16 + $0x1b4] sm:$0xf] }
 0x395   :  { %v4257_v54 = vor.u32 %v4922_v42, %v4254_v45  ;;  %v4341_v42 = vor.u32 %v4945_v32, %v4340_v28  ;;  %v4994_v45 = vld [vmem:[#allocation16 + $0x374] sm:$0xf]  ;;  %v4921_v32 = vld [vmem:[#allocation16 + $0x124] sm:$0xf0] }
 0x396   :  { %2251 = vmatpush.bf16.msra.mxu1 %v4057_v30  ;;  %v4241_v30 = vor.u32 %v4918_v12, %v4238_v5  ;;  %v4324_v12 = vld [vmem:[#allocation16 + $0x1c0] sm:$0xf]  ;;  %v5008_v5 = vld [vmem:[#allocation16 + $0x3e4] sm:$0xf] }
 0x397   :  { %3180 = vmatmul.bf16.vlgmr.msra.gmra.mxu2 %v5723_v60  ;;  %3194 = vmatmul.bf16.vlgmr.msra.gmra.mxu3 %v5725_v61 }
 0x398   :  { %3228 = vmatpush.bf16.msrb.mxu2 %v4289_v47  ;;  %3242 = vmatpush.bf16.msrb.mxu3 %v4353_v48  ;;  %v4318_v47 = vld [vmem:[#allocation16 + $0x1b8] sm:$0xf0]  ;;  %v4044_v48 = vld [vmem:[#allocation18 + $0x10] sm:$0xf] }
 0x399   :  { %v4045_v53 = vor.u32 %v5047_v49, %v4044_v48  ;;  %v4321_v62 = vor.u32 %v4938_v46, %v4318_v47  ;;  %v4542_v46 = vld [vmem:[#allocation16 + $0x378] sm:$0xf0]  ;;  %v4268_v47 = vld [vmem:[#allocation16 + $0x150] sm:$0xf]  ;;  %v4927_v48 = vld [vmem:[#allocation16 + $0x154] sm:$0xf0] }
 0x39a   :  { %2252 = vmatpush.bf16.msra.mxu1 %v4049_v58  ;;  %v4332_v49 = vld [vmem:[#allocation16 + $0x1d0] sm:$0xf]  ;;  %v4269_v56 = vor.u32 %v4927_v48, %v4268_v47  ;;  %v4943_v58 = vld [vmem:[#allocation16 + $0x1d4] sm:$0xf0]  ;;  %v4986_v48 = vld [vmem:[#allocation16 + $0x334] sm:$0xf] }
 0x39b   :  { %2238 = vmatpush.bf16.msra.mxu0 %v4045_v53  ;;  %v4606_v53 = vld [vmem:[#allocation16 + $0x3f8] sm:$0xf0]  ;;  %v4333_v0 = vor.u32 %v4943_v58, %v4332_v49  ;;  %v4300_v58 = vld [vmem:[#allocation16 + $0x190] sm:$0xf] }
 0x39c   :  { %3229 = vmatpush.bf16.msrb.mxu2 %v4281_v6  ;;  %3243 = vmatpush.bf16.msrb.mxu3 %v4345_v7  ;;  %v4038_v6 = vld [vmem:[#allocation18 + $0x8] sm:$0xf0]  ;;  %v4284_v7 = vld [vmem:[#allocation16 + $0x170] sm:$0xf]  ;;  %v4510_v49 = vld [vmem:[#allocation16 + $0x338] sm:$0xf0] }
 0x39d   :  { %v4041_v15 = vor.u32 %v5044_v3, %v4038_v6  ;;  %v4285_v16 = vor.u32 %v4931_v10, %v4284_v7  ;;  %v4534_v3 = vld [vmem:[#allocation16 + $0x368] sm:$0xf0]  ;;  %v4609_v6 = vor.u32 %v5010_v50, %v4606_v53  ;;  %v4260_v7 = vld [vmem:[#allocation16 + $0x140] sm:$0xf]  ;;  %v4925_v10 = vld [vmem:[#allocation16 + $0x144] sm:$0xf0] }
 0x39e   :  { %v4537_v19 = vor.u32 %v4992_v59, %v4534_v3  ;;  %v5002_v50 = vld [vmem:[#allocation16 + $0x3b4] sm:$0xf]  ;;  %v4574_v53 = vld [vmem:[#allocation16 + $0x3b8] sm:$0xf0]  ;;  %v5000_v59 = vld [vmem:[#allocation16 + $0x3a4] sm:$0xf] }
 0x39f   :  { %2239 = vmatpush.bf16.msra.mxu0 %v4037_v4  ;;  %2253 = vmatpush.bf16.msra.mxu1 %v4041_v15  ;;  %v4545_v4 = vor.u32 %v4994_v45, %v4542_v46  ;;  %v4261_v15 = vor.u32 %v4925_v10, %v4260_v7  ;;  %v4566_v3 = vld [vmem:[#allocation16 + $0x3a8] sm:$0xf0]  ;;  %v4917_v7 = vld [vmem:[#allocation16 + $0x104] sm:$0xf0]  ;;  %v4292_v10 = vld [vmem:[#allocation16 + $0x180] sm:$0xf] }
 0x3a0   :  { %3230 = vmatpush.bf16.msrb.mxu2 %v4273_v26  ;;  %3244 = vmatpush.bf16.msrb.mxu3 %v4337_v29  ;;  %v4276_v26 = vld [vmem:[#allocation16 + $0x160] sm:$0xf]  ;;  %v1745_v29 = vunpack.c.l.bf16 %v814_v13  ;;  %v4598_v13 = vld [vmem:[#allocation16 + $0x3e8] sm:$0xf0] }
 0x3a1   :  { %v4277_v31 = vor.u32 %v4929_v27, %v4276_v26  ;;  %v4923_v26 = vld [vmem:[#allocation16 + $0x134] sm:$0xf0]  ;;  %v4316_v27 = vld [vmem:[#allocation16 + $0x1b0] sm:$0xf] }
 0x3a2   :  { %v1767_v55 = vmul.f32 %v5693_v57, %v1745_v29  ;;  %v4939_v29 = vld [vmem:[#allocation16 + $0x1b4] sm:$0xf0] }
 0x3a3   :  { %3088 = vmatpush.bf16.msrb.mxu0 %v4285_v16  ;;  %3102 = vmatpush.bf16.msrb.mxu1 %v4349_v25  ;;  %v4252_v25 = vld [vmem:[#allocation16 + $0x130] sm:$0xf] }
 0x3a4   :  { %3231 = vmatpush.bf16.msrb.mxu2 %v4265_v43  ;;  %3245 = vmatpush.bf16.msrb.mxu3 %v4329_v44  ;;  %v4305_v43 = vor.u32 %v4934_v22, %v4302_v23  ;;  %v4294_v44 = vld [vmem:[#allocation16 + $0x188] sm:$0xf0]  ;;  %v4526_v22 = vld [vmem:[#allocation16 + $0x358] sm:$0xf0]  ;;  %v5006_v23 = vld [vmem:[#allocation16 + $0x3d4] sm:$0xf]  ;;  %v4253_v28 = vor.u32 %v4923_v26, %v4252_v25 }
 0x3a5   :  { %v4297_v2 = vor.u32 %v4932_v37, %v4294_v44  ;;  %v4593_v36 = vor.u32 %v5006_v23, %v4590_v24  ;;  %v4988_v37 = vld [vmem:[#allocation16 + $0x344] sm:$0xf]  ;;  %v4486_v25 = vld [vmem:[#allocation16 + $0x308] sm:$0xf0] }
 0x3a6   :  { %v4980_v24 = vld [vmem:[#allocation16 + $0x304] sm:$0xf] }
 0x3a7   :  { %3089 = vmatpush.bf16.msrb.mxu0 %v4277_v31  ;;  %3103 = vmatpush.bf16.msrb.mxu1 %v4341_v42  ;;  %v4244_v31 = vld [vmem:[#allocation16 + $0x120] sm:$0xf]  ;;  %v4518_v42 = vld [vmem:[#allocation16 + $0x348] sm:$0xf0]  ;;  %v4996_v26 = vld [vmem:[#allocation16 + $0x384] sm:$0xf] }
 0x3a8   :  { %3232 = vmatpush.bf16.msrb.mxu2 %v4257_v54  ;;  %3246 = vmatpush.bf16.msrb.mxu3 %v4321_v62  ;;  %v1777_v54 = vmul.f32 %v5689_v40, %v1755_v38  ;;  %v1768_v62 = vmul.f32 %v5693_v57, %v1746_v39  ;;  %v4941_v57 = vld [vmem:[#allocation16 + $0x1c4] sm:$0xf0]  ;;  %v4317_v38 = vor.u32 %v4939_v29, %v4316_v27  ;;  %v4308_v39 = vld [vmem:[#allocation16 + $0x1a0] sm:$0xf]  ;;  %v4550_v27 = vld [vmem:[#allocation16 + $0x388] sm:$0xf0] }
 0x3a9   :  { %v4325_v17 = vor.u32 %v4941_v57, %v4324_v12  ;;  %v4245_v44 = vor.u32 %v4921_v32, %v4244_v31  ;;  %v4309_v45 = vor.u32 %v4937_v41, %v4308_v39  ;;  %v4521_v46 = vor.u32 %v4988_v37, %v4518_v42 }
 0x3aa   :  { %v5741_v16 = vpack.c.bf16 %v1777_v54, %v1767_v55  ;;  %v5743_v40 = vpack.c.bf16 %v1778_v63, %v1768_v62  ;;  %v4236_v55 = vld [vmem:[#allocation16 + $0x110] sm:$0xf]  ;;  %v4984_v54 = vld [vmem:[#allocation16 + $0x324] sm:$0xf]  ;;  %v4935_v63 = vld [vmem:[#allocation16 + $0x194] sm:$0xf0]  ;;  %v4569_v57 = vor.u32 %v5000_v59, %v4566_v3  ;;  %v4553_v29 = vor.u32 %v4996_v26, %v4550_v27 }
 0x3ab   :  { %3090 = vmatpush.bf16.msrb.mxu0 %v4269_v56  ;;  %3104 = vmatpush.bf16.msrb.mxu1 %v4333_v0  ;;  %v4919_v56 = vld [vmem:[#allocation16 + $0x114] sm:$0xf0]  ;;  %v4513_v0 = vor.u32 %v4986_v48, %v4510_v49  ;;  %v1969_v39 = vunpack.c.l.bf16 %v5641_v14  ;;  %v1970_v41 = vunpack.c.l.bf16 %v5643_v18  ;;  %v4532_v49 = vld [vmem:[#allocation16 + $0x360] sm:$0xf]  ;;  %v4524_v18 = vld [vmem:[#allocation16 + $0x350] sm:$0xf] }
 0x3ac   :  { %3233 = vmatpush.bf16.msrb.mxu2 %v4249_v20  ;;  %3247 = vmatpush.bf16.msrb.mxu3 %v4313_v21  ;;  %v4601_v20 = vor.u32 %v5008_v5, %v4598_v13  ;;  %v4990_v21 = vld [vmem:[#allocation16 + $0x354] sm:$0xf]  ;;  %v4237_v62 = vor.u32 %v4919_v56, %v4236_v55  ;;  %v4933_v5 = vld [vmem:[#allocation16 + $0x184] sm:$0xf0]  ;;  %v4596_v55 = vld [vmem:[#allocation16 + $0x3e0] sm:$0xf] }
 0x3ad   :  { %v4529_v33 = vor.u32 %v4990_v21, %v4526_v22  ;;  %v4293_v13 = vor.u32 %v4933_v5, %v4292_v10  ;;  %v4558_v21 = vld [vmem:[#allocation16 + $0x398] sm:$0xf0]  ;;  %v5009_v56 = vld [vmem:[#allocation16 + $0x3e4] sm:$0xf0]  ;;  %v4580_v59 = vld [vmem:[#allocation16 + $0x3c0] sm:$0xf] }
 0x3ae   :  { %v5005_v3 = vld [vmem:[#allocation16 + $0x3c4] sm:$0xf0]  ;;  %v4987_v10 = vld [vmem:[#allocation16 + $0x334] sm:$0xf0] }
 0x3af   :  { %3091 = vmatpush.bf16.msrb.mxu0 %v4261_v15  ;;  %3105 = vmatpush.bf16.msrb.mxu1 %v4325_v17  ;;  %v4982_v17 = vld [vmem:[#allocation16 + $0x314] sm:$0xf]  ;;  %v5003_v5 = vld [vmem:[#allocation16 + $0x3b4] sm:$0xf0] }
 0x3b0   :  { %3234 = vmatpush.bf16.msrb.mxu2 %v4241_v30  ;;  %3248 = vmatpush.bf16.msrb.mxu3 %v4305_v43  ;;  %v5004_v30 = vld [vmem:[#allocation16 + $0x3c4] sm:$0xf]  ;;  %v4582_v43 = vld [vmem:[#allocation16 + $0x3c8] sm:$0xf0]  ;;  %v4999_v26 = vld [vmem:[#allocation16 + $0x394] sm:$0xf0] }
 0x3b1   :  { %v4585_v47 = vor.u32 %v5004_v30, %v4582_v43  ;;  %v4995_v30 = vld [vmem:[#allocation16 + $0x374] sm:$0xf0]  ;;  %v4604_v43 = vld [vmem:[#allocation16 + $0x3f0] sm:$0xf] }
 0x3b3   :  { %3092 = vmatpush.bf16.msrb.mxu0 %v4253_v28  ;;  %3106 = vmatpush.bf16.msrb.mxu1 %v4317_v38  ;;  %v4489_v28 = vor.u32 %v4980_v24, %v4486_v25  ;;  %v4540_v38 = vld [vmem:[#allocation16 + $0x370] sm:$0xf]  ;;  %v4983_v24 = vld [vmem:[#allocation16 + $0x314] sm:$0xf0] }
 0x3b4   :  { %3235 = vmatpush.bf16.msrb.mxu2 %v4233_v1  ;;  %3249 = vmatpush.bf16.msrb.mxu3 %v4297_v2  ;;  %v4577_v1 = vor.u32 %v5002_v50, %v4574_v53  ;;  %v4502_v2 = vld [vmem:[#allocation16 + $0x328] sm:$0xf0]  ;;  %v4993_v53 = vld [vmem:[#allocation16 + $0x364] sm:$0xf0]  ;;  %v4556_v25 = vld [vmem:[#allocation16 + $0x390] sm:$0xf] }
 0x3b5   :  { %v4505_v15 = vor.u32 %v4984_v54, %v4502_v2  ;;  %v4533_v14 = vor.u32 %v4993_v53, %v4532_v49  ;;  %v4588_v54 = vld [vmem:[#allocation16 + $0x3d0] sm:$0xf]  ;;  %v4989_v2 = vld [vmem:[#allocation16 + $0x344] sm:$0xf0]  ;;  %v4142_v49 = vld [vmem:[#allocation16 + $0x58] sm:$0xf0] }
 0x3b6   :  { %v4206_v53 = vld [vmem:[#allocation16 + $0xd8] sm:$0xf0] }
 0x3b7   :  { %3236 = vmatmul.bf16.vlgmr.msrb.gmra.mxu2 %v5741_v16  ;;  %3250 = vmatmul.bf16.vlgmr.msrb.gmra.mxu3 %v5743_v40 }
 0x3b8   :  { %3284 = vmatpush.bf16.msra.mxu2 %v4545_v4  ;;  %3298 = vmatpush.bf16.msra.mxu3 %v4609_v6  ;;  %v4301_v4 = vor.u32 %v4935_v63, %v4300_v58  ;;  %v4228_v6 = vld [vmem:[#allocation16 + $0x100] sm:$0xf]  ;;  %v4991_v58 = vld [vmem:[#allocation16 + $0x354] sm:$0xf0] }
 0x3b9   :  { %3093 = vmatpush.bf16.msrb.mxu0 %v4245_v44  ;;  %3107 = vmatpush.bf16.msrb.mxu1 %v4309_v45  ;;  %v4229_v12 = vor.u32 %v4917_v7, %v4228_v6  ;;  %v5011_v44 = vld [vmem:[#allocation16 + $0x3f4] sm:$0xf0]  ;;  %v4525_v63 = vor.u32 %v4991_v58, %v4524_v18  ;;  %v4581_v6 = vor.u32 %v5005_v3, %v4580_v59  ;;  %v4508_v7 = vld [vmem:[#allocation16 + $0x330] sm:$0xf]  ;;  %v4908_v18 = vld [vmem:[#allocation16 + $0xc4] sm:$0xf] }
 0x3ba   :  { %v4605_v48 = vor.u32 %v5011_v44, %v4604_v43  ;;  %v4150_v43 = vld [vmem:[#allocation16 + $0x68] sm:$0xf0]  ;;  %v4912_v44 = vld [vmem:[#allocation16 + $0xe4] sm:$0xf] }
 0x3bb   :  { %v4198_v58 = vld [vmem:[#allocation16 + $0xc8] sm:$0xf0]  ;;  %v4888_v59 = vld [vmem:[#allocation16 + $0x24] sm:$0xf] }
 0x3bc   :  { %3285 = vmatpush.bf16.msra.mxu2 %v4537_v19  ;;  %3299 = vmatpush.bf16.msra.mxu3 %v4601_v20  ;;  %v4494_v19 = vld [vmem:[#allocation16 + $0x318] sm:$0xf0]  ;;  %v4998_v20 = vld [vmem:[#allocation16 + $0x394] sm:$0xf]  ;;  %v4118_v3 = vld [vmem:[#allocation16 + $0x28] sm:$0xf0] }
 0x3bd   :  { %3094 = vmatpush.bf16.msrb.mxu0 %v4237_v62  ;;  %3108 = vmatpush.bf16.msrb.mxu1 %v4301_v4  ;;  %v4497_v22 = vor.u32 %v4982_v17, %v4494_v19  ;;  %v4561_v23 = vor.u32 %v4998_v20, %v4558_v21  ;;  %v5007_v62 = vld [vmem:[#allocation16 + $0x3d4] sm:$0xf0]  ;;  %v4985_v17 = vld [vmem:[#allocation16 + $0x324] sm:$0xf0]  ;;  %v4564_v19 = vld [vmem:[#allocation16 + $0x3a0] sm:$0xf] }
 0x3be   :  { %v5001_v20 = vld [vmem:[#allocation16 + $0x3a4] sm:$0xf0] }
 0x3c0   :  { %3286 = vmatpush.bf16.msra.mxu2 %v4529_v33  ;;  %3300 = vmatpush.bf16.msra.mxu3 %v4593_v36 }
 0x3c1   :  { %3095 = vmatpush.bf16.msrb.mxu0 %v4229_v12  ;;  %3109 = vmatpush.bf16.msrb.mxu1 %v4293_v13  ;;  %v4572_v12 = vld [vmem:[#allocation16 + $0x3b0] sm:$0xf]  ;;  %v4509_v13 = vor.u32 %v4987_v10, %v4508_v7  ;;  %v4121_v7 = vor.u32 %v4888_v59, %v4118_v3  ;;  %v4948_v59 = vld [vmem:[#allocation16 + $0x204] sm:$0xf]  ;;  %v4358_v3 = vld [vmem:[#allocation16 + $0x208] sm:$0xf0] }
 0x3c4   :  { %3287 = vmatpush.bf16.msra.mxu2 %v4521_v46  ;;  %3301 = vmatpush.bf16.msra.mxu3 %v4585_v47  ;;  %v4541_v47 = vor.u32 %v4995_v30, %v4540_v38  ;;  %v4896_v30 = vld [vmem:[#allocation16 + $0x64] sm:$0xf] }
 0x3c8   :  { %3288 = vmatpush.bf16.msra.mxu2 %v4513_v0  ;;  %3302 = vmatpush.bf16.msra.mxu3 %v4577_v1  ;;  %v4589_v0 = vor.u32 %v5007_v62, %v4588_v54  ;;  %v4516_v1 = vld [vmem:[#allocation16 + $0x340] sm:$0xf]  ;;  %v4201_v62 = vor.u32 %v4908_v18, %v4198_v58  ;;  %v4968_v18 = vld [vmem:[#allocation16 + $0x2a4] sm:$0xf]  ;;  %v4438_v58 = vld [vmem:[#allocation16 + $0x2a8] sm:$0xf0] }
 0x3c9   :  { %v4517_v4 = vor.u32 %v4989_v2, %v4516_v1  ;;  %v4906_v1 = vld [vmem:[#allocation16 + $0xb4] sm:$0xf]  ;;  %v4190_v2 = vld [vmem:[#allocation16 + $0xb8] sm:$0xf0] }
 0x3cc   :  { %3289 = vmatpush.bf16.msra.mxu2 %v4505_v15  ;;  %3303 = vmatpush.bf16.msra.mxu3 %v4569_v57  ;;  %v4573_v15 = vor.u32 %v5003_v5, %v4572_v12  ;;  %v4500_v57 = vld [vmem:[#allocation16 + $0x320] sm:$0xf]  ;;  %v4886_v12 = vld [vmem:[#allocation16 + $0x14] sm:$0xf]  ;;  %v4110_v5 = vld [vmem:[#allocation16 + $0x18] sm:$0xf0] }
 0x3cd   :  { %v4501_v21 = vor.u32 %v4985_v17, %v4500_v57  ;;  %v4113_v57 = vor.u32 %v4886_v12, %v4110_v5  ;;  %v5042_v12 = vld [vmem:[#allocation16 + $0x4f4] sm:$0xf]  ;;  %v4734_v5 = vld [vmem:[#allocation16 + $0x4f8] sm:$0xf0] }
 0x3d0   :  { %3290 = vmatpush.bf16.msra.mxu2 %v4497_v22  ;;  %3304 = vmatpush.bf16.msra.mxu3 %v4561_v23  ;;  %v1954_v31 = vpop.permute.xlu2 %1953  ;;  %v4565_v22 = vor.u32 %v5001_v20, %v4564_v19  ;;  %v4492_v23 = vld [vmem:[#allocation16 + $0x310] sm:$0xf]  ;;  %v4884_v19 = vld [vmem:[#allocation16 + $0x4] sm:$0xf]  ;;  %v4102_v20 = vld [vmem:[#allocation16 + $0x8] sm:$0xf0] }
 0x3d1   :  { %v1959_v32 = vperm.slane %v1954_v31, %v5683_v11  ;;  %v4493_v27 = vor.u32 %v4983_v24, %v4492_v23  ;;  %v4981_v31 = vld [vmem:[#allocation16 + $0x304] sm:$0xf0]  ;;  %v4962_v23 = vld [vmem:[#allocation16 + $0x274] sm:$0xf]  ;;  %v4414_v24 = vld [vmem:[#allocation16 + $0x278] sm:$0xf0] }
 0x3d3   :  { %v1971_v36 = vunpack.c.l.bf16 %v1959_v32  ;;  %v4548_v32 = vld [vmem:[#allocation16 + $0x380] sm:$0xf] }
 0x3d4   :  { %3291 = vmatpush.bf16.msra.mxu2 %v4489_v28  ;;  %3305 = vmatpush.bf16.msra.mxu3 %v4553_v29  ;;  %v4557_v28 = vor.u32 %v4999_v26, %v4556_v25  ;;  %v4484_v29 = vld [vmem:[#allocation16 + $0x300] sm:$0xf]  ;;  %v4978_v25 = vld [vmem:[#allocation16 + $0x2f4] sm:$0xf]  ;;  %v4478_v26 = vld [vmem:[#allocation16 + $0x2f8] sm:$0xf0] }
 0x3d5   :  { %v1973_v45 = vmul.f32 %v1971_v36, %v1969_v39  ;;  %v4898_v36 = vld [vmem:[#allocation16 + $0x74] sm:$0xf]  ;;  %v4485_v38 = vor.u32 %v4981_v31, %v4484_v29  ;;  %v4417_v29 = vor.u32 %v4962_v23, %v4414_v24  ;;  %v4481_v31 = vor.u32 %v4978_v25, %v4478_v26  ;;  %v4654_v26 = vld [vmem:[#allocation16 + $0x458] sm:$0xf0] }
 0x3d6   :  { %v5022_v25 = vld [vmem:[#allocation16 + $0x454] sm:$0xf] }
 0x3d7   :  { %3292 = vmatmul.bf16.vlgmr.msra.gmra.mxu2 %v5733_v34  ;;  %3306 = vmatmul.bf16.vlgmr.msra.gmra.mxu3 %v5735_v35 }
 0x3d8   :  { %v1963_v33 = vpop.permute.xlu2 %1962 }
 0x3d9   :  { %v1968_v37 = vperm.slane %v1963_v33, %v5683_v11  ;;  %v4597_v11 = vor.u32 %v5009_v56, %v4596_v55  ;;  %v4997_v33 = vld [vmem:[#allocation16 + $0x384] sm:$0xf0] }
 0x3da   :  { %v4549_v39 = vor.u32 %v4997_v33, %v4548_v32  ;;  %v4960_v32 = vld [vmem:[#allocation16 + $0x264] sm:$0xf]  ;;  %v4406_v33 = vld [vmem:[#allocation16 + $0x268] sm:$0xf0] }
 0x3db   :  { %v1972_v42 = vunpack.c.l.bf16 %v1968_v37  ;;  %v4914_v37 = vld [vmem:[#allocation16 + $0xf4] sm:$0xf] }
 0x3dd   :  { %v1974_v46 = vmul.f32 %v1972_v42, %v1970_v41 }
 0x3df   :  { %v1975_v50 = vpack.c.bf16 %v1974_v46, %v1973_v45  ;;  %v4214_v45 = vld [vmem:[#allocation16 + $0xe8] sm:$0xf0]  ;;  %v4153_v46 = vor.u32 %v4896_v30, %v4150_v43 }
 0x3e1   :  { %2240 = vmatmul.bf16.vlgmr.msra.gmra.mxu0 %v1975_v50  ;;  %2254 = vmatmul.bf16.vlgmr.msra.gmra.mxu1 %v1975_v50  ;;  %v4910_v50 = vld [vmem:[#allocation16 + $0xd4] sm:$0xf] }
 0x3e2   :  { %3144 = vmatpush.bf16.msra.mxu0 %v4541_v47  ;;  %3158 = vmatpush.bf16.msra.mxu1 %v4605_v48  ;;  %v4217_v47 = vor.u32 %v4912_v44, %v4214_v45  ;;  %v4894_v48 = vld [vmem:[#allocation16 + $0x54] sm:$0xf]  ;;  %v4209_v56 = vor.u32 %v4910_v50, %v4206_v53  ;;  %v4956_v44 = vld [vmem:[#allocation16 + $0x244] sm:$0xf]  ;;  %v4390_v45 = vld [vmem:[#allocation16 + $0x248] sm:$0xf0] }
 0x3e3   :  { %v4145_v55 = vor.u32 %v4894_v48, %v4142_v49  ;;  %v4393_v48 = vor.u32 %v4956_v44, %v4390_v45  ;;  %v4954_v50 = vld [vmem:[#allocation16 + $0x234] sm:$0xf]  ;;  %v4382_v53 = vld [vmem:[#allocation16 + $0x238] sm:$0xf0]  ;;  %v5032_v44 = vld [vmem:[#allocation16 + $0x4a4] sm:$0xf] }
 0x3e4   :  { %v4694_v45 = vld [vmem:[#allocation16 + $0x4a8] sm:$0xf0] }
 0x3e6   :  { %3145 = vmatpush.bf16.msra.mxu0 %v4533_v14  ;;  %3159 = vmatpush.bf16.msra.mxu1 %v4597_v11  ;;  %v4892_v14 = vld [vmem:[#allocation16 + $0x44] sm:$0xf]  ;;  %v4134_v11 = vld [vmem:[#allocation16 + $0x48] sm:$0xf0] }
 0x3e7   :  { %v4137_v54 = vor.u32 %v4892_v14, %v4134_v11  ;;  %v4952_v14 = vld [vmem:[#allocation16 + $0x224] sm:$0xf]  ;;  %v4374_v11 = vld [vmem:[#allocation16 + $0x228] sm:$0xf0] }
 0x3ea   :  { %3146 = vmatpush.bf16.msra.mxu0 %v4525_v63  ;;  %3160 = vmatpush.bf16.msra.mxu1 %v4589_v0  ;;  %v4890_v63 = vld [vmem:[#allocation16 + $0x34] sm:$0xf]  ;;  %v4126_v0 = vld [vmem:[#allocation16 + $0x38] sm:$0xf0] }
 0x3ee   :  { %3147 = vmatpush.bf16.msra.mxu0 %v4517_v4  ;;  %3161 = vmatpush.bf16.msra.mxu1 %v4581_v6  ;;  %v4904_v4 = vld [vmem:[#allocation16 + $0xa4] sm:$0xf]  ;;  %v4182_v6 = vld [vmem:[#allocation16 + $0xa8] sm:$0xf0] }
 0x3ef   :  { %v4185_v10 = vor.u32 %v4904_v4, %v4182_v6  ;;  %v4964_v4 = vld [vmem:[#allocation16 + $0x284] sm:$0xf]  ;;  %v4422_v6 = vld [vmem:[#allocation16 + $0x288] sm:$0xf0] }
 0x3f1   :  { %3096 = vmatmul.bf16.vlgmr.msrb.gmra.mxu0 %v5741_v16  ;;  %3110 = vmatmul.bf16.vlgmr.msrb.gmra.mxu1 %v5743_v40  ;;  %v4158_v16 = vld [vmem:[#allocation16 + $0x78] sm:$0xf0] }
 0x3f2   :  { %3148 = vmatpush.bf16.msra.mxu0 %v4509_v13  ;;  %3162 = vmatpush.bf16.msra.mxu1 %v4573_v15  ;;  %v4222_v40 = vld [vmem:[#allocation16 + $0xf8] sm:$0xf0]  ;;  %v4161_v41 = vor.u32 %v4898_v36, %v4158_v16  ;;  %v4902_v13 = vld [vmem:[#allocation16 + $0x94] sm:$0xf]  ;;  %v4976_v36 = vld [vmem:[#allocation16 + $0x2e4] sm:$0xf] }
 0x3f3   :  { %v4225_v42 = vor.u32 %v4914_v37, %v4222_v40  ;;  %v4174_v15 = vld [vmem:[#allocation16 + $0x98] sm:$0xf0]  ;;  %v4470_v16 = vld [vmem:[#allocation16 + $0x2e8] sm:$0xf0]  ;;  %v4409_v37 = vor.u32 %v4960_v32, %v4406_v33  ;;  %v5020_v32 = vld [vmem:[#allocation16 + $0x444] sm:$0xf] }
 0x3f4   :  { %v4177_v17 = vor.u32 %v4902_v13, %v4174_v15  ;;  %v4473_v40 = vor.u32 %v4976_v36, %v4470_v16  ;;  %v4361_v13 = vor.u32 %v4948_v59, %v4358_v3  ;;  %v4425_v15 = vor.u32 %v4964_v4, %v4422_v6  ;;  %v4646_v33 = vld [vmem:[#allocation16 + $0x448] sm:$0xf0]  ;;  %v5036_v36 = vld [vmem:[#allocation16 + $0x4c4] sm:$0xf] }
 0x3f5   :  { %v4710_v16 = vld [vmem:[#allocation16 + $0x4c8] sm:$0xf0] }
 0x3f6   :  { %3149 = vmatpush.bf16.msra.mxu0 %v4501_v21  ;;  %3163 = vmatpush.bf16.msra.mxu1 %v4565_v22  ;;  %v4900_v21 = vld [vmem:[#allocation16 + $0x84] sm:$0xf]  ;;  %v4166_v22 = vld [vmem:[#allocation16 + $0x88] sm:$0xf0] }
 0x3fa   :  { %3150 = vmatpush.bf16.msra.mxu0 %v4493_v27  ;;  %3164 = vmatpush.bf16.msra.mxu1 %v4557_v28  ;;  %v4105_v27 = vor.u32 %v4884_v19, %v4102_v20  ;;  %v4169_v28 = vor.u32 %v4900_v21, %v4166_v22  ;;  %v5024_v19 = vld [vmem:[#allocation16 + $0x464] sm:$0xf]  ;;  %v4662_v20 = vld [vmem:[#allocation16 + $0x468] sm:$0xf0] }
 0x3fb   :  { %v5040_v21 = vld [vmem:[#allocation16 + $0x4e4] sm:$0xf]  ;;  %v4726_v22 = vld [vmem:[#allocation16 + $0x4e8] sm:$0xf0]  ;;  %v4665_v23 = vor.u32 %v5024_v19, %v4662_v20 }
 0x3fc   :  { %v4729_v24 = vor.u32 %v5040_v21, %v4726_v22 }
 0x3fe   :  { %3151 = vmatpush.bf16.msra.mxu0 %v4485_v38  ;;  %3165 = vmatpush.bf16.msra.mxu1 %v4549_v39  ;;  %v4958_v38 = vld [vmem:[#allocation16 + $0x254] sm:$0xf]  ;;  %v4398_v39 = vld [vmem:[#allocation16 + $0x258] sm:$0xf0] }
 0x3ff   :  { %v4401_v30 = vor.u32 %v4958_v38, %v4398_v39  ;;  %v5018_v38 = vld [vmem:[#allocation16 + $0x434] sm:$0xf]  ;;  %v4638_v39 = vld [vmem:[#allocation16 + $0x438] sm:$0xf0] }
 0x401   :  { %3152 = vmatmul.bf16.vlgmr.msra.gmra.mxu0 %v5733_v34  ;;  %3166 = vmatmul.bf16.vlgmr.msra.gmra.mxu1 %v5735_v35  ;;  %v4129_v34 = vor.u32 %v4890_v63, %v4126_v0  ;;  %v4193_v35 = vor.u32 %v4906_v1, %v4190_v2  ;;  %v4950_v63 = vld [vmem:[#allocation16 + $0x214] sm:$0xf]  ;;  %v4366_v0 = vld [vmem:[#allocation16 + $0x218] sm:$0xf0] }
 0x402   :  { %3200 = vmatpush.bf16.msrb.mxu0 %v4161_v41  ;;  %3214 = vmatpush.bf16.msrb.mxu1 %v4225_v42  ;;  %v4974_v41 = vld [vmem:[#allocation16 + $0x2d4] sm:$0xf]  ;;  %v4462_v42 = vld [vmem:[#allocation16 + $0x2d8] sm:$0xf0] }
 0x403   :  { %v4465_v43 = vor.u32 %v4974_v41, %v4462_v42  ;;  %v4966_v1 = vld [vmem:[#allocation16 + $0x294] sm:$0xf]  ;;  %v4430_v2 = vld [vmem:[#allocation16 + $0x298] sm:$0xf0] }
 0x404   :  { %v5034_v41 = vld [vmem:[#allocation16 + $0x4b4] sm:$0xf]  ;;  %v4702_v42 = vld [vmem:[#allocation16 + $0x4b8] sm:$0xf0] }
 0x406   :  { %3201 = vmatpush.bf16.msrb.mxu0 %v4153_v46  ;;  %3215 = vmatpush.bf16.msrb.mxu1 %v4217_v47  ;;  %v4972_v46 = vld [vmem:[#allocation16 + $0x2c4] sm:$0xf]  ;;  %v4454_v47 = vld [vmem:[#allocation16 + $0x2c8] sm:$0xf0] }
 0x407   :  { %v4457_v49 = vor.u32 %v4972_v46, %v4454_v47  ;;  %v4697_v47 = vor.u32 %v5032_v44, %v4694_v45 }
 0x40a   :  { %3202 = vmatpush.bf16.msrb.mxu0 %v4145_v55  ;;  %3216 = vmatpush.bf16.msrb.mxu1 %v4209_v56  ;;  %v4970_v55 = vld [vmem:[#allocation16 + $0x2b4] sm:$0xf]  ;;  %v4446_v56 = vld [vmem:[#allocation16 + $0x2b8] sm:$0xf0] }
 0x40e   :  { %3203 = vmatpush.bf16.msrb.mxu0 %v4137_v54  ;;  %3217 = vmatpush.bf16.msrb.mxu1 %v4201_v62  ;;  %v4377_v54 = vor.u32 %v4952_v14, %v4374_v11  ;;  %v4441_v62 = vor.u32 %v4968_v18, %v4438_v58  ;;  %v5028_v14 = vld [vmem:[#allocation16 + $0x484] sm:$0xf]  ;;  %v4678_v11 = vld [vmem:[#allocation16 + $0x488] sm:$0xf0] }
 0x40f   :  { %v4681_v58 = vor.u32 %v5028_v14, %v4678_v11 }
 0x412   :  { %3204 = vmatpush.bf16.msrb.mxu0 %v4129_v34  ;;  %3218 = vmatpush.bf16.msrb.mxu1 %v4193_v35  ;;  %v4369_v34 = vor.u32 %v4950_v63, %v4366_v0  ;;  %v4433_v35 = vor.u32 %v4966_v1, %v4430_v2  ;;  %v3069_v63 = vpop.f32.mrf.mxu2  ;;  %v3083_v2 = vpop.f32.mrf.mxu3 }
 0x416   :  { %3205 = vmatpush.bf16.msrb.mxu0 %v4121_v7  ;;  %3219 = vmatpush.bf16.msrb.mxu1 %v4185_v10  ;;  %v5026_v7 = vld [vmem:[#allocation16 + $0x474] sm:$0xf]  ;;  %v4670_v10 = vld [vmem:[#allocation16 + $0x478] sm:$0xf0] }
 0x41a   :  { %3206 = vmatpush.bf16.msrb.mxu0 %v4113_v57  ;;  %3220 = vmatpush.bf16.msrb.mxu1 %v4177_v17  ;;  %v4673_v57 = vor.u32 %v5026_v7, %v4670_v10  ;;  %v4737_v17 = vor.u32 %v5042_v12, %v4734_v5  ;;  %v3085_v3 = vpop.f32.mrf.mxu3 }
 0x41e   :  { %3207 = vmatpush.bf16.msrb.mxu0 %v4105_v27  ;;  %3221 = vmatpush.bf16.msrb.mxu1 %v4169_v28  ;;  %v5038_v27 = vld [vmem:[#allocation16 + $0x4d4] sm:$0xf]  ;;  %v4718_v28 = vld [vmem:[#allocation16 + $0x4d8] sm:$0xf0] }
 0x421   :  { %3208 = vmatmul.bf16.vlgmr.msrb.gmra.mxu0 %v5701_v8  ;;  %3222 = vmatmul.bf16.vlgmr.msrb.gmra.mxu1 %v5703_v9  ;;  %v4385_v8 = vor.u32 %v4954_v50, %v4382_v53  ;;  %v4449_v9 = vor.u32 %v4970_v55, %v4446_v56  ;;  %v5030_v50 = vld [vmem:[#allocation16 + $0x494] sm:$0xf]  ;;  %v4686_v53 = vld [vmem:[#allocation16 + $0x498] sm:$0xf0] }
 0x422   :  { %3256 = vmatpush.bf16.msra.mxu0 %v4417_v29  ;;  %3270 = vmatpush.bf16.msra.mxu1 %v4481_v31  ;;  %v4657_v29 = vor.u32 %v5022_v25, %v4654_v26  ;;  %v4721_v31 = vor.u32 %v5038_v27, %v4718_v28  ;;  %v4689_v56 = vor.u32 %v5030_v50, %v4686_v53  ;;  %v3139_v10 = vpop.f32.mrf.mxu3 }
 0x426   :  { %3257 = vmatpush.bf16.msra.mxu0 %v4409_v37  ;;  %3271 = vmatpush.bf16.msra.mxu1 %v4473_v40  ;;  %v4649_v37 = vor.u32 %v5020_v32, %v4646_v33  ;;  %v4713_v40 = vor.u32 %v5036_v36, %v4710_v16 }
 0x42a   :  { %3258 = vmatpush.bf16.msra.mxu0 %v4401_v30  ;;  %3272 = vmatpush.bf16.msra.mxu1 %v4465_v43  ;;  %v5016_v30 = vld [vmem:[#allocation16 + $0x424] sm:$0xf]  ;;  %v4630_v43 = vld [vmem:[#allocation16 + $0x428] sm:$0xf0] }
 0x42b   :  { %v4633_v46 = vor.u32 %v5016_v30, %v4630_v43 }
 0x42e   :  { %3259 = vmatpush.bf16.msra.mxu0 %v4393_v48  ;;  %3273 = vmatpush.bf16.msra.mxu1 %v4457_v49  ;;  %v5014_v48 = vld [vmem:[#allocation16 + $0x414] sm:$0xf]  ;;  %v4622_v49 = vld [vmem:[#allocation16 + $0x418] sm:$0xf0] }
 0x42f   :  { %v4625_v55 = vor.u32 %v5014_v48, %v4622_v49  ;;  %v3340_v49 = vld [vmem:[%s5794_s18] sm:$0x3] }
 0x432   :  { %3260 = vmatpush.bf16.msra.mxu0 %v4385_v8  ;;  %3274 = vmatpush.bf16.msra.mxu1 %v4449_v9  ;;  %v5012_v8 = vld [vmem:[#allocation16 + $0x404] sm:$0xf]  ;;  %v4614_v9 = vld [vmem:[#allocation16 + $0x408] sm:$0xf0] }
 0x433   :  { %v4617_v18 = vor.u32 %v5012_v8, %v4614_v9  ;;  %v3342_v9 = vperm.slane %v3340_v49, 0 }
 0x436   :  { %3261 = vmatpush.bf16.msra.mxu0 %v4377_v54  ;;  %3275 = vmatpush.bf16.msra.mxu1 %v4441_v62 }
 0x43a   :  { %3262 = vmatpush.bf16.msra.mxu0 %v4369_v34  ;;  %3276 = vmatpush.bf16.msra.mxu1 %v4433_v35  ;;  %v3071_v34 = vpop.f32.mrf.mxu2 }
 0x43e   :  { %3263 = vmatpush.bf16.msra.mxu0 %v4361_v13  ;;  %3277 = vmatpush.bf16.msra.mxu1 %v4425_v15 }
 0x441   :  { %3264 = vmatmul.bf16.vlgmr.msra.gmra.mxu0 %v5713_v51  ;;  %3278 = vmatmul.bf16.vlgmr.msra.gmra.mxu1 %v5715_v52  ;;  %v4641_v51 = vor.u32 %v5018_v38, %v4638_v39  ;;  %v4705_v52 = vor.u32 %v5034_v41, %v4702_v42 }
 0x442   :  { %3312 = vmatpush.bf16.msrb.mxu0 %v4673_v57  ;;  %3326 = vmatpush.bf16.msrb.mxu1 %v4737_v17  ;;  %v3125_v4 = vpop.f32.mrf.mxu2 }
 0x446   :  { %3313 = vmatpush.bf16.msrb.mxu0 %v4665_v23  ;;  %3327 = vmatpush.bf16.msrb.mxu1 %v4729_v24 }
 0x44a   :  { %3314 = vmatpush.bf16.msrb.mxu0 %v4657_v29  ;;  %3328 = vmatpush.bf16.msrb.mxu1 %v4721_v31  ;;  %v3127_v12 = vpop.f32.mrf.mxu2 }
 0x44e   :  { %3315 = vmatpush.bf16.msrb.mxu0 %v4649_v37  ;;  %3329 = vmatpush.bf16.msrb.mxu1 %v4713_v40 }
 0x452   :  { %3316 = vmatpush.bf16.msrb.mxu0 %v4641_v51  ;;  %3330 = vmatpush.bf16.msrb.mxu1 %v4705_v52  ;;  %v3181_v15 = vpop.f32.mrf.mxu2 }
 0x456   :  { %3317 = vmatpush.bf16.msrb.mxu0 %v4633_v46  ;;  %3331 = vmatpush.bf16.msrb.mxu1 %v4697_v47 }
 0x45a   :  { %3318 = vmatpush.bf16.msrb.mxu0 %v4625_v55  ;;  %3332 = vmatpush.bf16.msrb.mxu1 %v4689_v56  ;;  %v3183_v23 = vpop.f32.mrf.mxu2 }
 0x45e   :  { %3319 = vmatpush.bf16.msrb.mxu0 %v4617_v18  ;;  %3333 = vmatpush.bf16.msrb.mxu1 %v4681_v58  ;;  %v2241_v54 = vpop.f32.mrf.mxu0  ;;  %v2255_v62 = vpop.f32.mrf.mxu1 }
 0x461   :  { %3320 = vmatmul.bf16.vlgmr.msrb.gmra.mxu0 %v5723_v60  ;;  %3334 = vmatmul.bf16.vlgmr.msrb.gmra.mxu1 %v5725_v61  ;;  %v3141_v60 = vpop.f32.mrf.mxu3  ;;  %v3070_v61 = vadd.f32 %v3069_v63, %v2241_v54 }
 0x462   :  { %v3237_v33 = vpop.f32.mrf.mxu2 }
 0x463   :  { %v3084_v20 = vadd.f32 %v3083_v2, %v3070_v61 }
 0x466   :  { %v2243_v0 = vpop.f32.mrf.mxu0  ;;  %v2257_v1 = vpop.f32.mrf.mxu1 }
 0x467   :  { %v3072_v22 = vadd.f32 %v3071_v34, %v2243_v0 }
 0x469   :  { %v3195_v19 = vpop.f32.mrf.mxu3  ;;  %v3086_v27 = vadd.f32 %v3085_v3, %v3072_v22 }
 0x46a   :  { %v3239_v47 = vpop.f32.mrf.mxu2 }
 0x46e   :  { %v3097_v35 = vpop.f32.mrf.mxu0  ;;  %v3111_v59 = vpop.f32.mrf.mxu1 }
 0x46f   :  { %v3098_v21 = vadd.f32 %v3097_v35, %v3084_v20 }
 0x471   :  { %v3112_v26 = vadd.f32 %v3111_v59, %v3098_v21  ;;  %v3197_v28 = vpop.f32.mrf.mxu3 }
 0x472   :  { %v3293_v58 = vpop.f32.mrf.mxu2 }
 0x473   :  { %v3126_v31 = vadd.f32 %v3125_v4, %v3112_v26 }
 0x475   :  { %v3140_v36 = vadd.f32 %v3139_v10, %v3126_v31 }
 0x476   :  { %v3099_v6 = vpop.f32.mrf.mxu0  ;;  %v3113_v7 = vpop.f32.mrf.mxu1 }
 0x477   :  { %v3100_v29 = vadd.f32 %v3099_v6, %v3086_v27 }
 0x479   :  { %v3114_v32 = vadd.f32 %v3113_v7, %v3100_v29  ;;  %v3251_v42 = vpop.f32.mrf.mxu3 }
 0x47b   :  { %v3128_v39 = vadd.f32 %v3127_v12, %v3114_v32 }
 0x47d   :  { %v3142_v52 = vadd.f32 %v3141_v60, %v3128_v39  ;;  %v3343_v60 = vperm.slane %v3340_v49, 1 }
 0x47e   :  { %v3153_v5 = vpop.f32.mrf.mxu0  ;;  %v3167_v13 = vpop.f32.mrf.mxu1 }
 0x47f   :  { %v3154_v38 = vadd.f32 %v3153_v5, %v3140_v36 }
 0x481   :  { %v3168_v51 = vadd.f32 %v3167_v13, %v3154_v38  ;;  %v3253_v14 = vpop.f32.mrf.mxu3 }
 0x483   :  { %v3182_v48 = vadd.f32 %v3181_v15, %v3168_v51  ;;  %v3295_v15 = vpop.f32.mrf.mxu2 }
 0x485   :  { %v3196_v56 = vadd.f32 %v3195_v19, %v3182_v48 }
 0x486   :  { %v3155_v57 = vpop.f32.mrf.mxu0  ;;  %v3169_v17 = vpop.f32.mrf.mxu1 }
 0x487   :  { %v3156_v44 = vadd.f32 %v3155_v57, %v3142_v52 }
 0x489   :  { %v3170_v55 = vadd.f32 %v3169_v17, %v3156_v44  ;;  %v3307_v3 = vpop.f32.mrf.mxu3 }
 0x48b   :  { %v3184_v18 = vadd.f32 %v3183_v23, %v3170_v55 }
 0x48d   :  { %v3198_v2 = vadd.f32 %v3197_v28, %v3184_v18 }
 0x48f   :  { %v3348_v4 = vadd.f32 %v3342_v9, %v3198_v2 }
 0x491   :  { %v3352_v61 = vsub.f32 0.0, %v3348_v4  ;;  %v3309_v20 = vpop.f32.mrf.mxu3 }
 0x493   :  { %v3358_v21 = vmul.f32 1.442695, %v3352_v61 }
 0x49e   :  { %v3209_v24 = vpop.f32.mrf.mxu0  ;;  %v3223_v25 = vpop.f32.mrf.mxu1 }
 0x49f   :  { %v3210_v16 = vadd.f32 %v3209_v24, %v2255_v62  ;;  %v3346_v62 = vadd.f32 %v3342_v9, %v3196_v56 }
 0x4a1   :  { %v3224_v41 = vadd.f32 %v3223_v25, %v3210_v16  ;;  %v3350_v59 = vsub.f32 0.0, %v3346_v62 }
 0x4a3   :  { %v3238_v30 = vadd.f32 %v3237_v33, %v3224_v41  ;;  %v3354_v10 = vmul.f32 1.442695, %v3350_v59  ;;  %v3374_v41 = vld [vmem:[%s5795_s19] sm:$0x3] }
 0x4a4   :  { %v3376_v52 = vperm.slane %v3374_v41, 0 }
 0x4a5   :  { %v3252_v53 = vadd.f32 %v3251_v42, %v3238_v30  ;;  %5171 = vpow2.f32 %v3354_v10  ;;  %v3377_v30 = vperm.slane %v3374_v41, 1 }
 0x4a6   :  { %v3211_v37 = vpop.f32.mrf.mxu0  ;;  %v3225_v40 = vpop.f32.mrf.mxu1  ;;  %5173 = vpow2.f32 %v3358_v21 }
 0x4a7   :  { %v3212_v43 = vadd.f32 %v3211_v37, %v2257_v1 }
 0x4a9   :  { %v3226_v50 = vadd.f32 %v3225_v40, %v3212_v43 }
 0x4ab   :  { %v3240_v11 = vadd.f32 %v3239_v47, %v3226_v50  ;;  %v5172_v25 = vpop.eup %5171 }
 0x4ac   :  { %v3362_v31 = vadd.f32 1.0, %v5172_v25  ;;  %v5174_v36 = vpop.eup %5173 }
 0x4ad   :  { %v3254_v1 = vadd.f32 %v3253_v14, %v3240_v11  ;;  %v3364_v38 = vadd.f32 1.0, %v5174_v36  ;;  %v5090_v14 = vld [vmem:[#allocation4] ss:$0 sm:$0xff] }
 0x4be   :  { %v3265_v45 = vpop.f32.mrf.mxu0  ;;  %v3279_v46 = vpop.f32.mrf.mxu1 }
 0x4bf   :  { %v3266_v8 = vadd.f32 %v3265_v45, %v3252_v53 }
 0x4c1   :  { %v3280_v54 = vadd.f32 %v3279_v46, %v3266_v8 }
 0x4c3   :  { %v3294_v34 = vadd.f32 %v3293_v58, %v3280_v54 }
 0x4c5   :  { %v3308_v7 = vadd.f32 %v3307_v3, %v3294_v34 }
 0x4c6   :  { %v3267_v63 = vpop.f32.mrf.mxu0  ;;  %v3281_v0 = vpop.f32.mrf.mxu1 }
 0x4c7   :  { %v3268_v35 = vadd.f32 %v3267_v63, %v3254_v1 }
 0x4c9   :  { %v3282_v6 = vadd.f32 %v3281_v0, %v3268_v35 }
 0x4cb   :  { %v3296_v57 = vadd.f32 %v3295_v15, %v3282_v6 }
 0x4cd   :  { %v3310_v23 = vadd.f32 %v3309_v20, %v3296_v57 }
 0x4de   :  { %v3321_v12 = vpop.f32.mrf.mxu0  ;;  %v3335_v5 = vpop.f32.mrf.mxu1 }
 0x4df   :  { %v3322_v13 = vadd.f32 %v3321_v12, %v3308_v7 }
 0x4e1   :  { %v3336_v17 = vadd.f32 %v3335_v5, %v3322_v13 }
 0x4e3   :  { %v3347_v19 = vadd.f32 %v3343_v60, %v3336_v17 }
 0x4e5   :  { %v3351_v22 = vsub.f32 0.0, %v3347_v19 }
 0x4e6   :  { %v3323_v24 = vpop.f32.mrf.mxu0  ;;  %v3337_v28 = vpop.f32.mrf.mxu1 }
 0x4e7   :  { %v3356_v26 = vmul.f32 1.442695, %v3351_v22  ;;  %v3324_v27 = vadd.f32 %v3323_v24, %v3310_v23 }
 0x4e9   :  { %5175 = vpow2.f32 %v3356_v26  ;;  %v3338_v29 = vadd.f32 %v3337_v28, %v3324_v27 }
 0x4ea   :  { %5177 = vrcp.f32 %v3362_v31 }
 0x4eb   :  { %v3349_v32 = vadd.f32 %v3343_v60, %v3338_v29 }
 0x4ed   :  { %v3353_v33 = vsub.f32 0.0, %v3349_v32 }
 0x4ef   :  { %v5176_v16 = vpop.eup %5175  ;;  %v3360_v37 = vmul.f32 1.442695, %v3353_v33 }
 0x4f0   :  { %v3363_v40 = vadd.f32 1.0, %v5176_v16  ;;  %v5178_v39 = vpop.eup %5177 }
 0x4f1   :  { %5179 = vpow2.f32 %v3360_v37  ;;  %v3370_v51 = vmul.f32 %v5178_v39, %v3346_v62 }
 0x4f2   :  { %5181 = vrcp.f32 %v3363_v40 }
 0x4f3   :  { %5183 = vrcp.f32 %v3364_v38  ;;  %v3380_v46 = vmul.f32 %v3376_v52, %v3370_v51 }
 0x4f7   :  { %v5180_v42 = vpop.eup %5179 }
 0x4f8   :  { %v5182_v43 = vpop.eup %5181  ;;  %v3365_v44 = vadd.f32 1.0, %v5180_v42 }
 0x4f9   :  { %v3371_v45 = vmul.f32 %v5182_v43, %v3347_v19  ;;  %v5184_v48 = vpop.eup %5183 }
 0x4fa   :  { %5185 = vrcp.f32 %v3365_v44  ;;  %v3372_v50 = vmul.f32 %v5184_v48, %v3348_v4 }
 0x4fb   :  { %v3381_v47 = vmul.f32 %v3377_v30, %v3371_v45 }
 0x4fc   :  { %v3382_v56 = vmul.f32 %v3376_v52, %v3372_v50 }
 0x4fd   :  { %v3384_v49 = vadd.f32 %v3381_v47, %v3380_v46 }
 0x4ff   :  { %3385 = vadd.xlane.f32.xlu2 %v3384_v49 }
 0x500   :  { %v5186_v53 = vpop.eup %5185 }
 0x501   :  { %v3373_v55 = vmul.f32 %v5186_v53, %v3349_v32 }
 0x503   :  { %v3383_v8 = vmul.f32 %v3377_v30, %v3373_v55 }
 0x505   :  { %v3387_v9 = vadd.f32 %v3383_v8, %v3382_v56 }
 0x507   :  { %3388 = vadd.xlane.f32.xlu1 %v3387_v9 }
 0x572   :  { %v3386_v11 = vpop.xlane.xlu2 %3385 }
 0x573   :  { %v3394_v18 = vadd.f32 %v5090_v14, %v3386_v11 }
 0x575   :  { %v3396_v58 = vsub.f32 0.0, %v3394_v18 }
 0x577   :  { %v3398_v54 = vmul.f32 1.442695, %v3396_v58 }
 0x579   :  { %5187 = vpow2.f32 %v3398_v54 }
 0x57a   :  { %v3389_v62 = vpop.xlane.xlu1 %3388 }
 0x57b   :  { %v3395_v63 = vadd.f32 %v5090_v14, %v3389_v62 }
 0x57d   :  { %v3397_v0 = vsub.f32 0.0, %v3395_v63 }
 0x57f   :  { %v5188_v1 = vpop.eup %5187  ;;  %v3400_v2 = vmul.f32 1.442695, %v3397_v0 }
 0x580   :  { %v3402_v34 = vadd.f32 1.0, %v5188_v1 }
 0x581   :  { %5189 = vpow2.f32 %v3400_v2 }
 0x582   :  { %5191 = vrcp.f32 %v3402_v34  ;;  %v3415_v7 = vand.u32 2147483648, %v3402_v34  ;;  %v3413_v12 = vand.u32 2147483647, %v3402_v34  ;;  %vm3409_vm2 = vweird.f32 %v3402_v34 }
 0x584   :  { %v3416_v60 = vor.u32 1.1754944e-38, %v3415_v7  ;;  %vm3414_vm5 = vcmp.eq.f32.partialorder %v3413_v12, 8.507059e+37 }
 0x587   :  { %v5190_v35 = vpop.eup %5189 }
 0x588   :  { %v5192_v59 = vpop.eup %5191  ;;  %v3403_v3 = vadd.f32 1.0, %v5190_v35 }
 0x589   :  { %v3405_v4 = vmul.f32 %v5192_v59, %v3402_v34  ;;  %vm3410_vm1 = vweird.f32 %v5192_v59 }
 0x58a   :  { %5193 = vrcp.f32 %v3403_v3  ;;  %vm3411_vm4 = vmor %vm3409_vm2, %vm3410_vm1  ;;  %v3430_v19 = vand.u32 2147483648, %v3403_v3  ;;  %v3428_v21 = vand.u32 2147483647, %v3403_v3  ;;  %vm3424_vm7 = vweird.f32 %v3403_v3 }
 0x58b   :  { %v3406_v6 = vsub.f32 1.0, %v3405_v4 }
 0x58c   :  { %v3431_v23 = vor.u32 1.1754944e-38, %v3430_v19  ;;  %vm3429_vm9 = vcmp.eq.f32.partialorder %v3428_v21, 8.507059e+37 }
 0x58d   :  { %v3407_v10 = vmul.f32 %v5192_v59, %v3406_v6 }
 0x58f   :  { %v3408_v5 = vadd.f32 %v5192_v59, %v3407_v10 }
 0x590   :  { %v5194_v13 = vpop.eup %5193 }
 0x591   :  { %v3412_v15 = vsel %vm3411_vm4, %v5192_v59, %v3408_v5  ;;  %v3420_v61 = vmul.f32 %v5194_v13, %v3403_v3  ;;  %vm3425_vm6 = vweird.f32 %v5194_v13 }
 0x592   :  { %v3417_v57 = vsel %vm3414_vm5, %v3416_v60, %v3412_v15  ;;  %vm3426_vm8 = vmor %vm3424_vm7, %vm3425_vm6 }
 0x593   :  { %3435 = vst.msk [vmem:[%s5796_s21] sm:$0xff] %vm3434_vm3, %v3417_v57  ;;  %v3421_v17 = vsub.f32 1.0, %v3420_v61 }
 0x595   :  { %v3422_v20 = vmul.f32 %v5194_v13, %v3421_v17 }
 0x597   :  { %v3423_v22 = vadd.f32 %v5194_v13, %v3422_v20 }
 0x599   :  { %v3427_v24 = vsel %vm3426_vm8, %v5194_v13, %v3423_v22 }
 0x59a   :  { %v3432_v25 = vsel %vm3429_vm9, %v3431_v23, %v3427_v24 }
 0x59b   :  { %3436 = vst.msk [vmem:[%s5796_s21 + $0x8] sm:$0xff] %vm3434_vm3, %v3432_v25 }
 0x59c   :  { %3441 = vsyncpa [#allocation6], 1 }
 0x59d   :  { %3442 = vsyncpa [#allocation8], 1 }
 0x59e   :  { %3443 = vsyncpa [#allocation11], 1 }
 0x59f   :  { %3444 = vsyncpa [#allocation14], 1 }
 0x5a0   :  { %3445 = vsyncpa [#allocation17], 1 }

</bundles_post_ra>
